<compile_context>
chip_gen: v6e
topology: v6e:2x2x1
jax: 0.10.0
libtpu: 0.0.40
codegen_flags: <defaults>
</compile_context>

<pallas_src>
import functools
import numpy as np
import jax
import jax.numpy as jnp
from jax.experimental import pallas as pl
from jax.experimental.pallas import tpu as pltpu

EPS = 1e-5  # PyTorch BatchNorm2d default eps


# ----------------------------- host-side constant matrices -----------------------------

@functools.lru_cache(maxsize=None)
def _tap_masks(h, w):
    """(9, h*w) 0/1 masks: tap (sy, sx) is valid at flat position p=y*w+x iff the
    shifted source pixel (y+sy, x+sx) lies inside the image (pad=1 zero padding)."""
    yy, xx = np.meshgrid(np.arange(h), np.arange(w), indexing="ij")
    rows = []
    for sy in (-1, 0, 1):
        for sx in (-1, 0, 1):
            ok = (yy + sy >= 0) & (yy + sy < h) & (xx + sx >= 0) & (xx + sx < w)
            rows.append(ok.reshape(-1))
    return jnp.asarray(np.stack(rows).astype(np.float32))


@functools.lru_cache(maxsize=None)
def _pool_select_matrix(h, w):
    """(h*w, (h//2)*(w//2)) 0/1 matrix selecting the top-left corner of every 2x2
    window from the row-major-flattened full-resolution plane."""
    ho, wo = h // 2, w // 2
    g = np.zeros((h * w, ho * wo), np.float32)
    for i in range(ho):
        for j in range(wo):
            g[(2 * i) * w + 2 * j, i * wo + j] = 1.0
    return jnp.asarray(g)


def _interp_weights(size_in, size_out):
    """(size_out, size_in) 1-D linear interpolation matrix, align_corners=True."""
    i = np.arange(size_out, dtype=np.float64)
    if size_out > 1 and size_in > 1:
        src = i * (size_in - 1) / (size_out - 1)
    else:
        src = np.zeros_like(i)
    p0 = np.clip(np.floor(src).astype(np.int64), 0, size_in - 1)
    p1 = np.clip(p0 + 1, 0, size_in - 1)
    frac = src - p0
    m = np.zeros((size_out, size_in), np.float64)
    r = np.arange(size_out)
    m[r, p0] += 1.0 - frac
    m[r, p1] += frac
    return m


@functools.lru_cache(maxsize=None)
def _upsample_matrix(h, w):
    """(h*w, 4*h*w): row-major-flattened bilinear x2 upsample, align_corners=True."""
    mh = _interp_weights(h, 2 * h)                    # (2h, h)
    mw = _interp_weights(w, 2 * w)                    # (2w, w)
    u = np.einsum("Yy,Xx->yxYX", mh, mw).reshape(h * w, 4 * h * w)
    return jnp.asarray(u.astype(np.float32))


# ----------------------------------- Pallas kernel -----------------------------------

def _roll_lanes(v, d):
    """Circular shift along the flattened-spatial (lane) axis: result[:, p] = v[:, (p+d) % HW]."""
    hw = v.shape[-1]
    k = d % hw
    if k == 0:
        return v
    return jnp.concatenate([v[:, k:], v[:, :k]], axis=1)


def _fused_block_kernel(*refs, pool, upsample, w_in, w_c):
    it = iter(refs)
    x_ref = next(it)
    g_ref = next(it) if pool else None
    up_ref = next(it) if upsample else None
    u_ref = next(it) if upsample else None
    mask_ref = next(it)
    w1_ref, b1_ref, w2_ref, b2_ref, w3_ref, b3_ref, o_ref = (
        next(it), next(it), next(it), next(it), next(it), next(it), next(it))

    x = x_ref[0].astype(jnp.float32)                            # (C, H*W)

    if pool:
        # fused MaxPool2d(2, 2): elementwise max of the 4 corners of each 2x2 window,
        # then a 0/1 selection matmul to compact to the pooled, lane-dense layout.
        m = x
        for d in (1, w_in, w_in + 1):
            m = jnp.maximum(m, _roll_lanes(x, d))
        x = jnp.dot(m, g_ref[...], preferred_element_type=jnp.float32)   # (C, Hc*Wc)

    masks = mask_ref[...]                                       # (9, Hc*Wc) 0/1 f32

    # conv 1x1 -> (folded) BN -> ReLU
    h1 = jnp.dot(w1_ref[...], x.astype(jnp.bfloat16),
                 preferred_element_type=jnp.float32) + b1_ref[...]
    h1 = jnp.maximum(h1, 0.0)                                   # (half, Hc*Wc) f32

    # conv 3x3 (stride 1, pad 1) -> (folded) BN -> ReLU: 9 shifted-tap matmuls,
    # float32 accumulation, intermediates stay in VMEM/vregs.
    acc = jnp.zeros(h1.shape, jnp.float32)
    tap = 0
    for sy in (-1, 0, 1):
        for sx in (-1, 0, 1):
            d = sy * w_c + sx
            shifted = _roll_lanes(h1, d) if d else h1
            shifted = shifted * masks[tap:tap + 1, :]           # zero out-of-image taps
            acc = acc + jnp.dot(w2_ref[tap], shifted.astype(jnp.bfloat16),
                                preferred_element_type=jnp.float32)
            tap += 1
    h2 = jnp.maximum(acc + b2_ref[...], 0.0)                    # (half, Hc*Wc)

    # conv 1x1 -> (folded) BN, + residual skip (block input, post-pool)
    y = x + jnp.dot(w3_ref[...], h2.astype(jnp.bfloat16),
                    preferred_element_type=jnp.float32) + b3_ref[...]     # (C, Hc*Wc)

    if upsample:
        # fused bilinear x2 upsample (align_corners=True) as one matmul, then + up1
        y = jnp.dot(y, u_ref[...], preferred_element_type=jnp.float32)    # (C, 4*Hc*Wc)
        y = y + up_ref[0].astype(jnp.float32)

    o_ref[0] = y.astype(o_ref.dtype)


# ----------------------------------- call wrapper -----------------------------------

def _bcast_spec(shape):
    rank = len(shape)
    return pl.BlockSpec(tuple(shape), lambda *_: (0,) * rank)


def fused_residual_block(x, p, *, pool=False, up1=None):
    """One pallas_call: [maxpool2x2] -> ResidualBlock(f, f) -> [bilinear x2 + up1 add].

    x: (N, C, H, W) float32.  p: packed params (BN folded into bf16 weights).
    """
    N, C, H, W = x.shape
    upsample = up1 is not None
    Hc, Wc = (H // 2, W // 2) if pool else (H, W)       # residual-block resolution
    HWin, HWc = H * W, Hc * Wc
    Ho, Wo = (2 * Hc, 2 * Wc) if upsample else (Hc, Wc)
    HWo = Ho * Wo

    args = [x.reshape(N, C, HWin)]
    in_specs = [pl.BlockSpec((1, C, HWin), lambda n: (n, 0, 0))]
    if pool:
        g = _pool_select_matrix(H, W)                   # (HWin, HWc)
        args.append(g)
        in_specs.append(_bcast_spec(g.shape))
    if upsample:
        u = _upsample_matrix(Hc, Wc)                    # (HWc, HWo)
        args.append(up1.reshape(N, C, HWo))
        in_specs.append(pl.BlockSpec((1, C, HWo), lambda n: (n, 0, 0)))
        args.append(u)
        in_specs.append(_bcast_spec(u.shape))
    masks = _tap_masks(Hc, Wc)                          # (9, HWc)
    args.append(masks)
    in_specs.append(_bcast_spec(masks.shape))
    for name in ("w1", "b1", "w2", "b2", "w3", "b3"):
        args.append(p[name])
        in_specs.append(_bcast_spec(p[name].shape))

    kernel = functools.partial(_fused_block_kernel, pool=pool, upsample=upsample,
                               w_in=W, w_c=Wc)

    out = pl.pallas_call(
        kernel,
        out_shape=jax.ShapeDtypeStruct((N, C, HWo), x.dtype),
        grid=(N,),
        in_specs=in_specs,
        out_specs=pl.BlockSpec((1, C, HWo), lambda n: (n, 0, 0)),
        compiler_params=pltpu.CompilerParams(dimension_semantics=("parallel",)),
    )(*args)
    return out.reshape(N, C, Ho, Wo)


# ------------------------------ parameters & module logic ------------------------------

def _make_conv_bn(key, co, ci, k):
    """Conv2d(ci->co, k) + BatchNorm2d(co) params (inference-mode BN)."""
    k1, k2, k3, k4, k5, k6 = jax.random.split(key, 6)
    fan_in = ci * k * k
    bound = 1.0 / np.sqrt(fan_in)
    w = jax.random.uniform(k1, (co, ci, k, k), jnp.float32, -bound, bound)
    b = jax.random.uniform(k2, (co,), jnp.float32, -bound, bound)
    gamma = jax.random.uniform(k3, (co,), jnp.float32, 0.5, 1.5)
    beta = 0.1 * jax.random.normal(k4, (co,), jnp.float32)
    mean = 0.1 * jax.random.normal(k5, (co,), jnp.float32)
    var = jax.random.uniform(k6, (co,), jnp.float32, 0.5, 1.5)
    scale = gamma / jnp.sqrt(var + EPS)
    bias_eff = beta - mean * scale + b * scale
    return w, scale, bias_eff


def _init_residual(key, f):
    """ResidualBlock(f, f, need_bn=True): 1x1 (f->f/2), 3x3 (f/2->f/2), 1x1 (f/2->f).
    BN scale is folded into the (bf16) weights; biases stay float32."""
    half = f // 2
    k1, k2, k3 = jax.random.split(key, 3)
    w1, s1, b1 = _make_conv_bn(k1, half, f, 1)
    w2, s2, b2 = _make_conv_bn(k2, half, half, 3)
    w3, s3, b3 = _make_conv_bn(k3, f, half, 1)
    w1f = (w1[:, :, 0, 0] * s1[:, None]).astype(jnp.bfloat16)                  # (half, f)
    w2f = jnp.transpose(w2 * s2[:, None, None, None], (2, 3, 0, 1))
    w2f = w2f.reshape(9, half, half).astype(jnp.bfloat16)                      # tap-major
    w3f = (w3[:, :, 0, 0] * s3[:, None]).astype(jnp.bfloat16)                  # (f, half)
    return {"w1": w1f, "b1": b1.reshape(half, 1),
            "w2": w2f, "b2": b2.reshape(half, 1),
            "w3": w3f, "b3": b3.reshape(f, 1)}


def init_hourglass_params(key, num_layer, num_feature):
    params = {}
    for lvl in range(num_layer, 0, -1):
        for suffix in ("_1", "_2", "_3"):
            key, sub = jax.random.split(key)
            params["res%d%s" % (lvl, suffix)] = _init_residual(sub, num_feature)
    key, sub = jax.random.split(key)
    params["res_center"] = _init_residual(sub, num_feature)
    return params


def hourglass_forward(x, params, n):
    # num_in == num_out everywhere inside HourGlass -> skip_layer is None -> skip = x
    up1 = fused_residual_block(x, params["res%d_1" % n])
    low1 = fused_residual_block(x, params["res%d_2" % n], pool=True)   # pool fused in
    if n > 1:
        low2 = hourglass_forward(low1, params, n - 1)
    else:
        low2 = fused_residual_block(low1, params["res_center"])
    # res*_3 with bilinear x2 upsample (align_corners=True) + up1 add fused in
    return fused_residual_block(low2, params["res%d_3" % n], up1=up1)


if __name__ == "__main__":
    num_layer, num_feature = 2, 4            # HourGlass(num_layer=2, num_feature=4)
    key = jax.random.PRNGKey(0)
    kx, kp = jax.random.split(key)
    x = jax.random.normal(kx, (2, num_feature, 16, 16), jnp.float32)   # NCHW
    params = init_hourglass_params(kp, num_layer, num_feature)

    fwd = jax.jit(functools.partial(hourglass_forward, n=num_layer))
    out = jax.block_until_ready(fwd(x, params))

    assert out.shape == x.shape, out.shape
    assert bool(jnp.all(jnp.isfinite(out)))
    print("KERNEL_OK")
</pallas_src>

<mosaic_0001>
module attributes {stable_mosaic.version = 11 : i64} {
  func.func @_fused_block_kernel(%arg0: i32, %arg1: memref<1x4x16xf32, #tpu.memory_space<vmem>>, %arg2: memref<9x16xf32, #tpu.memory_space<vmem>>, %arg3: memref<2x4xbf16, #tpu.memory_space<vmem>>, %arg4: memref<2x1xf32, #tpu.memory_space<vmem>>, %arg5: memref<9x2x2xbf16, #tpu.memory_space<vmem>>, %arg6: memref<2x1xf32, #tpu.memory_space<vmem>>, %arg7: memref<4x2xbf16, #tpu.memory_space<vmem>>, %arg8: memref<4x1xf32, #tpu.memory_space<vmem>>, %arg9: memref<1x4x16xf32, #tpu.memory_space<vmem>>) attributes {dimension_semantics = [#tpu.dimension_semantics<parallel>], iteration_bounds = array<i64: 2>, scalar_prefetch = 0 : i64, scratch_operands = 0 : i64, tpu.core_type = #tpu.core_type<tc>, window_params = [{transform_indices = @transform_0, window_bounds = array<i64: 1, 4, 16>}, {pipeline_mode = #tpu.pipeline_mode<synchronous>, transform_indices = @transform_1, window_bounds = array<i64: 9, 16>}, {pipeline_mode = #tpu.pipeline_mode<synchronous>, transform_indices = @transform_2, window_bounds = array<i64: 2, 4>}, {pipeline_mode = #tpu.pipeline_mode<synchronous>, transform_indices = @transform_3, window_bounds = array<i64: 2, 1>}, {pipeline_mode = #tpu.pipeline_mode<synchronous>, transform_indices = @transform_4, window_bounds = array<i64: 9, 2, 2>}, {pipeline_mode = #tpu.pipeline_mode<synchronous>, transform_indices = @transform_5, window_bounds = array<i64: 2, 1>}, {pipeline_mode = #tpu.pipeline_mode<synchronous>, transform_indices = @transform_6, window_bounds = array<i64: 4, 2>}, {pipeline_mode = #tpu.pipeline_mode<synchronous>, transform_indices = @transform_7, window_bounds = array<i64: 4, 1>}, {transform_indices = @transform_8, window_bounds = array<i64: 1, 4, 16>}]} {
    %c0 = arith.constant 0 : index
    %c0_0 = arith.constant 0 : index
    %c0_1 = arith.constant 0 : index
    %0 = vector.load %arg1[%c0, %c0_0, %c0_1] : memref<1x4x16xf32, #tpu.memory_space<vmem>>, vector<1x4x16xf32>
    %1 = vector.shape_cast %0 : vector<1x4x16xf32> to vector<4x16xf32>
    %c0_2 = arith.constant 0 : index
    %c0_3 = arith.constant 0 : index
    %2 = vector.load %arg2[%c0_2, %c0_3] : memref<9x16xf32, #tpu.memory_space<vmem>>, vector<9x16xf32>
    %c0_4 = arith.constant 0 : index
    %c0_5 = arith.constant 0 : index
    %3 = vector.load %arg3[%c0_4, %c0_5] : memref<2x4xbf16, #tpu.memory_space<vmem>>, vector<2x4xbf16>
    %4 = arith.truncf %1 : vector<4x16xf32> to vector<4x16xbf16>
    %cst = arith.constant dense<0.000000e+00> : vector<2x16xf32>
    %5 = tpu.matmul %3, %4, %cst {dimension_numbers = #tpu.dot_dimension_numbers<[1], [0], [0], [1], [0, 0, 1, 1], [], []>} : vector<2x4xbf16>, vector<4x16xbf16>, vector<2x16xf32> -> vector<2x16xf32>
    %c0_6 = arith.constant 0 : index
    %c0_7 = arith.constant 0 : index
    %6 = vector.load %arg4[%c0_6, %c0_7] : memref<2x1xf32, #tpu.memory_space<vmem>>, vector<2x1xf32>
    %7 = vector.broadcast %6 : vector<2x1xf32> to vector<2x16xf32>
    %8 = arith.addf %5, %7 : vector<2x16xf32>
    %cst_8 = arith.constant 0.000000e+00 : f32
    %9 = vector.broadcast %cst_8 : f32 to vector<2x16xf32>
    %10 = arith.maximumf %8, %9 : vector<2x16xf32>
    %cst_9 = arith.constant 0.000000e+00 : f32
    %11 = vector.broadcast %cst_9 : f32 to vector<2x16xf32>
    %12 = vector.extract_strided_slice %10 {offsets = [0, 11], sizes = [2, 5], strides = [1, 1]} : vector<2x16xf32> to vector<2x5xf32>
    %13 = vector.extract_strided_slice %10 {offsets = [0, 0], sizes = [2, 11], strides = [1, 1]} : vector<2x16xf32> to vector<2x11xf32>
    %14 = tpu.concatenate %12, %13 in 1 : vector<2x5xf32>, vector<2x11xf32> -> vector<2x16xf32>
    %15 = vector.extract_strided_slice %2 {offsets = [0, 0], sizes = [1, 16], strides = [1, 1]} : vector<9x16xf32> to vector<1x16xf32>
    %16 = vector.broadcast %15 : vector<1x16xf32> to vector<2x16xf32>
    %17 = arith.mulf %14, %16 : vector<2x16xf32>
    %c0_10 = arith.constant 0 : index
    %c0_11 = arith.constant 0 : index
    %c0_12 = arith.constant 0 : index
    %18 = vector.load %arg5[%c0_10, %c0_11, %c0_12] : memref<9x2x2xbf16, #tpu.memory_space<vmem>>, vector<1x2x2xbf16>
    %19 = vector.shape_cast %18 : vector<1x2x2xbf16> to vector<2x2xbf16>
    %20 = arith.truncf %17 : vector<2x16xf32> to vector<2x16xbf16>
    %cst_13 = arith.constant dense<0.000000e+00> : vector<2x16xf32>
    %21 = tpu.matmul %19, %20, %cst_13 {dimension_numbers = #tpu.dot_dimension_numbers<[1], [0], [0], [1], [0, 0, 1, 1], [], []>} : vector<2x2xbf16>, vector<2x16xbf16>, vector<2x16xf32> -> vector<2x16xf32>
    %22 = arith.addf %11, %21 : vector<2x16xf32>
    %23 = vector.extract_strided_slice %10 {offsets = [0, 12], sizes = [2, 4], strides = [1, 1]} : vector<2x16xf32> to vector<2x4xf32>
    %24 = vector.extract_strided_slice %10 {offsets = [0, 0], sizes = [2, 12], strides = [1, 1]} : vector<2x16xf32> to vector<2x12xf32>
    %25 = tpu.concatenate %23, %24 in 1 : vector<2x4xf32>, vector<2x12xf32> -> vector<2x16xf32>
    %26 = vector.extract_strided_slice %2 {offsets = [1, 0], sizes = [1, 16], strides = [1, 1]} : vector<9x16xf32> to vector<1x16xf32>
    %27 = vector.broadcast %26 : vector<1x16xf32> to vector<2x16xf32>
    %28 = arith.mulf %25, %27 : vector<2x16xf32>
    %c1 = arith.constant 1 : index
    %c0_14 = arith.constant 0 : index
    %c0_15 = arith.constant 0 : index
    %29 = vector.load %arg5[%c1, %c0_14, %c0_15] : memref<9x2x2xbf16, #tpu.memory_space<vmem>>, vector<1x2x2xbf16>
    %30 = vector.shape_cast %29 : vector<1x2x2xbf16> to vector<2x2xbf16>
    %31 = arith.truncf %28 : vector<2x16xf32> to vector<2x16xbf16>
    %cst_16 = arith.constant dense<0.000000e+00> : vector<2x16xf32>
    %32 = tpu.matmul %30, %31, %cst_16 {dimension_numbers = #tpu.dot_dimension_numbers<[1], [0], [0], [1], [0, 0, 1, 1], [], []>} : vector<2x2xbf16>, vector<2x16xbf16>, vector<2x16xf32> -> vector<2x16xf32>
    %33 = arith.addf %22, %32 : vector<2x16xf32>
    %34 = vector.extract_strided_slice %10 {offsets = [0, 13], sizes = [2, 3], strides = [1, 1]} : vector<2x16xf32> to vector<2x3xf32>
    %35 = vector.extract_strided_slice %10 {offsets = [0, 0], sizes = [2, 13], strides = [1, 1]} : vector<2x16xf32> to vector<2x13xf32>
    %36 = tpu.concatenate %34, %35 in 1 : vector<2x3xf32>, vector<2x13xf32> -> vector<2x16xf32>
    %37 = vector.extract_strided_slice %2 {offsets = [2, 0], sizes = [1, 16], strides = [1, 1]} : vector<9x16xf32> to vector<1x16xf32>
    %38 = vector.broadcast %37 : vector<1x16xf32> to vector<2x16xf32>
    %39 = arith.mulf %36, %38 : vector<2x16xf32>
    %c2 = arith.constant 2 : index
    %c0_17 = arith.constant 0 : index
    %c0_18 = arith.constant 0 : index
    %40 = vector.load %arg5[%c2, %c0_17, %c0_18] : memref<9x2x2xbf16, #tpu.memory_space<vmem>>, vector<1x2x2xbf16>
    %41 = vector.shape_cast %40 : vector<1x2x2xbf16> to vector<2x2xbf16>
    %42 = arith.truncf %39 : vector<2x16xf32> to vector<2x16xbf16>
    %cst_19 = arith.constant dense<0.000000e+00> : vector<2x16xf32>
    %43 = tpu.matmul %41, %42, %cst_19 {dimension_numbers = #tpu.dot_dimension_numbers<[1], [0], [0], [1], [0, 0, 1, 1], [], []>} : vector<2x2xbf16>, vector<2x16xbf16>, vector<2x16xf32> -> vector<2x16xf32>
    %44 = arith.addf %33, %43 : vector<2x16xf32>
    %45 = vector.extract_strided_slice %10 {offsets = [0, 15], sizes = [2, 1], strides = [1, 1]} : vector<2x16xf32> to vector<2x1xf32>
    %46 = vector.extract_strided_slice %10 {offsets = [0, 0], sizes = [2, 15], strides = [1, 1]} : vector<2x16xf32> to vector<2x15xf32>
    %47 = tpu.concatenate %45, %46 in 1 : vector<2x1xf32>, vector<2x15xf32> -> vector<2x16xf32>
    %48 = vector.extract_strided_slice %2 {offsets = [3, 0], sizes = [1, 16], strides = [1, 1]} : vector<9x16xf32> to vector<1x16xf32>
    %49 = vector.broadcast %48 : vector<1x16xf32> to vector<2x16xf32>
    %50 = arith.mulf %47, %49 : vector<2x16xf32>
    %c3 = arith.constant 3 : index
    %c0_20 = arith.constant 0 : index
    %c0_21 = arith.constant 0 : index
    %51 = vector.load %arg5[%c3, %c0_20, %c0_21] : memref<9x2x2xbf16, #tpu.memory_space<vmem>>, vector<1x2x2xbf16>
    %52 = vector.shape_cast %51 : vector<1x2x2xbf16> to vector<2x2xbf16>
    %53 = arith.truncf %50 : vector<2x16xf32> to vector<2x16xbf16>
    %cst_22 = arith.constant dense<0.000000e+00> : vector<2x16xf32>
    %54 = tpu.matmul %52, %53, %cst_22 {dimension_numbers = #tpu.dot_dimension_numbers<[1], [0], [0], [1], [0, 0, 1, 1], [], []>} : vector<2x2xbf16>, vector<2x16xbf16>, vector<2x16xf32> -> vector<2x16xf32>
    %55 = arith.addf %44, %54 : vector<2x16xf32>
    %56 = vector.extract_strided_slice %2 {offsets = [4, 0], sizes = [1, 16], strides = [1, 1]} : vector<9x16xf32> to vector<1x16xf32>
    %57 = vector.broadcast %56 : vector<1x16xf32> to vector<2x16xf32>
    %58 = arith.mulf %10, %57 : vector<2x16xf32>
    %c4 = arith.constant 4 : index
    %c0_23 = arith.constant 0 : index
    %c0_24 = arith.constant 0 : index
    %59 = vector.load %arg5[%c4, %c0_23, %c0_24] : memref<9x2x2xbf16, #tpu.memory_space<vmem>>, vector<1x2x2xbf16>
    %60 = vector.shape_cast %59 : vector<1x2x2xbf16> to vector<2x2xbf16>
    %61 = arith.truncf %58 : vector<2x16xf32> to vector<2x16xbf16>
    %cst_25 = arith.constant dense<0.000000e+00> : vector<2x16xf32>
    %62 = tpu.matmul %60, %61, %cst_25 {dimension_numbers = #tpu.dot_dimension_numbers<[1], [0], [0], [1], [0, 0, 1, 1], [], []>} : vector<2x2xbf16>, vector<2x16xbf16>, vector<2x16xf32> -> vector<2x16xf32>
    %63 = arith.addf %55, %62 : vector<2x16xf32>
    %64 = vector.extract_strided_slice %10 {offsets = [0, 1], sizes = [2, 15], strides = [1, 1]} : vector<2x16xf32> to vector<2x15xf32>
    %65 = vector.extract_strided_slice %10 {offsets = [0, 0], sizes = [2, 1], strides = [1, 1]} : vector<2x16xf32> to vector<2x1xf32>
    %66 = tpu.concatenate %64, %65 in 1 : vector<2x15xf32>, vector<2x1xf32> -> vector<2x16xf32>
    %67 = vector.extract_strided_slice %2 {offsets = [5, 0], sizes = [1, 16], strides = [1, 1]} : vector<9x16xf32> to vector<1x16xf32>
    %68 = vector.broadcast %67 : vector<1x16xf32> to vector<2x16xf32>
    %69 = arith.mulf %66, %68 : vector<2x16xf32>
    %c5 = arith.constant 5 : index
    %c0_26 = arith.constant 0 : index
    %c0_27 = arith.constant 0 : index
    %70 = vector.load %arg5[%c5, %c0_26, %c0_27] : memref<9x2x2xbf16, #tpu.memory_space<vmem>>, vector<1x2x2xbf16>
    %71 = vector.shape_cast %70 : vector<1x2x2xbf16> to vector<2x2xbf16>
    %72 = arith.truncf %69 : vector<2x16xf32> to vector<2x16xbf16>
    %cst_28 = arith.constant dense<0.000000e+00> : vector<2x16xf32>
    %73 = tpu.matmul %71, %72, %cst_28 {dimension_numbers = #tpu.dot_dimension_numbers<[1], [0], [0], [1], [0, 0, 1, 1], [], []>} : vector<2x2xbf16>, vector<2x16xbf16>, vector<2x16xf32> -> vector<2x16xf32>
    %74 = arith.addf %63, %73 : vector<2x16xf32>
    %75 = vector.extract_strided_slice %10 {offsets = [0, 3], sizes = [2, 13], strides = [1, 1]} : vector<2x16xf32> to vector<2x13xf32>
    %76 = vector.extract_strided_slice %10 {offsets = [0, 0], sizes = [2, 3], strides = [1, 1]} : vector<2x16xf32> to vector<2x3xf32>
    %77 = tpu.concatenate %75, %76 in 1 : vector<2x13xf32>, vector<2x3xf32> -> vector<2x16xf32>
    %78 = vector.extract_strided_slice %2 {offsets = [6, 0], sizes = [1, 16], strides = [1, 1]} : vector<9x16xf32> to vector<1x16xf32>
    %79 = vector.broadcast %78 : vector<1x16xf32> to vector<2x16xf32>
    %80 = arith.mulf %77, %79 : vector<2x16xf32>
    %c6 = arith.constant 6 : index
    %c0_29 = arith.constant 0 : index
    %c0_30 = arith.constant 0 : index
    %81 = vector.load %arg5[%c6, %c0_29, %c0_30] : memref<9x2x2xbf16, #tpu.memory_space<vmem>>, vector<1x2x2xbf16>
    %82 = vector.shape_cast %81 : vector<1x2x2xbf16> to vector<2x2xbf16>
    %83 = arith.truncf %80 : vector<2x16xf32> to vector<2x16xbf16>
    %cst_31 = arith.constant dense<0.000000e+00> : vector<2x16xf32>
    %84 = tpu.matmul %82, %83, %cst_31 {dimension_numbers = #tpu.dot_dimension_numbers<[1], [0], [0], [1], [0, 0, 1, 1], [], []>} : vector<2x2xbf16>, vector<2x16xbf16>, vector<2x16xf32> -> vector<2x16xf32>
    %85 = arith.addf %74, %84 : vector<2x16xf32>
    %86 = vector.extract_strided_slice %10 {offsets = [0, 4], sizes = [2, 12], strides = [1, 1]} : vector<2x16xf32> to vector<2x12xf32>
    %87 = vector.extract_strided_slice %10 {offsets = [0, 0], sizes = [2, 4], strides = [1, 1]} : vector<2x16xf32> to vector<2x4xf32>
    %88 = tpu.concatenate %86, %87 in 1 : vector<2x12xf32>, vector<2x4xf32> -> vector<2x16xf32>
    %89 = vector.extract_strided_slice %2 {offsets = [7, 0], sizes = [1, 16], strides = [1, 1]} : vector<9x16xf32> to vector<1x16xf32>
    %90 = vector.broadcast %89 : vector<1x16xf32> to vector<2x16xf32>
    %91 = arith.mulf %88, %90 : vector<2x16xf32>
    %c7 = arith.constant 7 : index
    %c0_32 = arith.constant 0 : index
    %c0_33 = arith.constant 0 : index
    %92 = vector.load %arg5[%c7, %c0_32, %c0_33] : memref<9x2x2xbf16, #tpu.memory_space<vmem>>, vector<1x2x2xbf16>
    %93 = vector.shape_cast %92 : vector<1x2x2xbf16> to vector<2x2xbf16>
    %94 = arith.truncf %91 : vector<2x16xf32> to vector<2x16xbf16>
    %cst_34 = arith.constant dense<0.000000e+00> : vector<2x16xf32>
    %95 = tpu.matmul %93, %94, %cst_34 {dimension_numbers = #tpu.dot_dimension_numbers<[1], [0], [0], [1], [0, 0, 1, 1], [], []>} : vector<2x2xbf16>, vector<2x16xbf16>, vector<2x16xf32> -> vector<2x16xf32>
    %96 = arith.addf %85, %95 : vector<2x16xf32>
    %97 = vector.extract_strided_slice %10 {offsets = [0, 5], sizes = [2, 11], strides = [1, 1]} : vector<2x16xf32> to vector<2x11xf32>
    %98 = vector.extract_strided_slice %10 {offsets = [0, 0], sizes = [2, 5], strides = [1, 1]} : vector<2x16xf32> to vector<2x5xf32>
    %99 = tpu.concatenate %97, %98 in 1 : vector<2x11xf32>, vector<2x5xf32> -> vector<2x16xf32>
    %100 = vector.extract_strided_slice %2 {offsets = [8, 0], sizes = [1, 16], strides = [1, 1]} : vector<9x16xf32> to vector<1x16xf32>
    %101 = vector.broadcast %100 : vector<1x16xf32> to vector<2x16xf32>
    %102 = arith.mulf %99, %101 : vector<2x16xf32>
    %c8 = arith.constant 8 : index
    %c0_35 = arith.constant 0 : index
    %c0_36 = arith.constant 0 : index
    %103 = vector.load %arg5[%c8, %c0_35, %c0_36] : memref<9x2x2xbf16, #tpu.memory_space<vmem>>, vector<1x2x2xbf16>
    %104 = vector.shape_cast %103 : vector<1x2x2xbf16> to vector<2x2xbf16>
    %105 = arith.truncf %102 : vector<2x16xf32> to vector<2x16xbf16>
    %cst_37 = arith.constant dense<0.000000e+00> : vector<2x16xf32>
    %106 = tpu.matmul %104, %105, %cst_37 {dimension_numbers = #tpu.dot_dimension_numbers<[1], [0], [0], [1], [0, 0, 1, 1], [], []>} : vector<2x2xbf16>, vector<2x16xbf16>, vector<2x16xf32> -> vector<2x16xf32>
    %107 = arith.addf %96, %106 : vector<2x16xf32>
    %c0_38 = arith.constant 0 : index
    %c0_39 = arith.constant 0 : index
    %108 = vector.load %arg6[%c0_38, %c0_39] : memref<2x1xf32, #tpu.memory_space<vmem>>, vector<2x1xf32>
    %109 = vector.broadcast %108 : vector<2x1xf32> to vector<2x16xf32>
    %110 = arith.addf %107, %109 : vector<2x16xf32>
    %cst_40 = arith.constant 0.000000e+00 : f32
    %111 = vector.broadcast %cst_40 : f32 to vector<2x16xf32>
    %112 = arith.maximumf %110, %111 : vector<2x16xf32>
    %c0_41 = arith.constant 0 : index
    %c0_42 = arith.constant 0 : index
    %113 = vector.load %arg7[%c0_41, %c0_42] : memref<4x2xbf16, #tpu.memory_space<vmem>>, vector<4x2xbf16>
    %114 = arith.truncf %112 : vector<2x16xf32> to vector<2x16xbf16>
    %cst_43 = arith.constant dense<0.000000e+00> : vector<4x16xf32>
    %115 = tpu.matmul %113, %114, %cst_43 {dimension_numbers = #tpu.dot_dimension_numbers<[1], [0], [0], [1], [0, 0, 1, 1], [], []>} : vector<4x2xbf16>, vector<2x16xbf16>, vector<4x16xf32> -> vector<4x16xf32>
    %116 = arith.addf %1, %115 : vector<4x16xf32>
    %c0_44 = arith.constant 0 : index
    %c0_45 = arith.constant 0 : index
    %117 = vector.load %arg8[%c0_44, %c0_45] : memref<4x1xf32, #tpu.memory_space<vmem>>, vector<4x1xf32>
    %118 = vector.broadcast %117 : vector<4x1xf32> to vector<4x16xf32>
    %119 = arith.addf %116, %118 : vector<4x16xf32>
    %c0_46 = arith.constant 0 : index
    %c0_47 = arith.constant 0 : index
    %c0_48 = arith.constant 0 : index
    %120 = vector.load %arg9[%c0_46, %c0_47, %c0_48] : memref<1x4x16xf32, #tpu.memory_space<vmem>>, vector<1x4x16xf32>
    %121 = vector.shape_cast %120 : vector<1x4x16xf32> to vector<4x16xf32>
    %122 = vector.shape_cast %119 : vector<4x16xf32> to vector<1x4x16xf32>
    tpu.vector_store %arg9[%c0_46, %c0_47, %c0_48], %122 {strides = array<i32>} : memref<1x4x16xf32, #tpu.memory_space<vmem>>, vector<1x4x16xf32>,
    return
  }
  func.func @transform_0(%arg0: i32) -> (i32, i32, i32) {
    %c0_i32 = arith.constant 0 : i32
    %c0_i32_0 = arith.constant 0 : i32
    %c0_i32_1 = arith.constant 0 : i32
    return %arg0, %c0_i32, %c0_i32_0 : i32, i32, i32
  }
  func.func @transform_1(%arg0: i32) -> (i32, i32) {
    %c0_i32 = arith.constant 0 : i32
    %c0_i32_0 = arith.constant 0 : i32
    %c0_i32_1 = arith.constant 0 : i32
    return %c0_i32, %c0_i32_0 : i32, i32
  }
  func.func @transform_2(%arg0: i32) -> (i32, i32) {
    %c0_i32 = arith.constant 0 : i32
    %c0_i32_0 = arith.constant 0 : i32
    %c0_i32_1 = arith.constant 0 : i32
    return %c0_i32, %c0_i32_0 : i32, i32
  }
  func.func @transform_3(%arg0: i32) -> (i32, i32) {
    %c0_i32 = arith.constant 0 : i32
    %c0_i32_0 = arith.constant 0 : i32
    %c0_i32_1 = arith.constant 0 : i32
    return %c0_i32, %c0_i32_0 : i32, i32
  }
  func.func @transform_4(%arg0: i32) -> (i32, i32, i32) {
    %c0_i32 = arith.constant 0 : i32
    %c0_i32_0 = arith.constant 0 : i32
    %c0_i32_1 = arith.constant 0 : i32
    %c0_i32_2 = arith.constant 0 : i32
    return %c0_i32, %c0_i32_0, %c0_i32_1 : i32, i32, i32
  }
  func.func @transform_5(%arg0: i32) -> (i32, i32) {
    %c0_i32 = arith.constant 0 : i32
    %c0_i32_0 = arith.constant 0 : i32
    %c0_i32_1 = arith.constant 0 : i32
    return %c0_i32, %c0_i32_0 : i32, i32
  }
  func.func @transform_6(%arg0: i32) -> (i32, i32) {
    %c0_i32 = arith.constant 0 : i32
    %c0_i32_0 = arith.constant 0 : i32
    %c0_i32_1 = arith.constant 0 : i32
    return %c0_i32, %c0_i32_0 : i32, i32
  }
  func.func @transform_7(%arg0: i32) -> (i32, i32) {
    %c0_i32 = arith.constant 0 : i32
    %c0_i32_0 = arith.constant 0 : i32
    %c0_i32_1 = arith.constant 0 : i32
    return %c0_i32, %c0_i32_0 : i32, i32
  }
  func.func @transform_8(%arg0: i32) -> (i32, i32, i32) {
    %c0_i32 = arith.constant 0 : i32
    %c0_i32_0 = arith.constant 0 : i32
    %c0_i32_1 = arith.constant 0 : i32
    return %arg0, %c0_i32, %c0_i32_0 : i32, i32, i32
  }
}

module attributes {stable_mosaic.version = 11 : i64} {
  func.func @_fused_block_kernel(%arg0: i32, %arg1: memref<1x4x256xf32, #tpu.memory_space<vmem>>, %arg2: memref<256x64xf32, #tpu.memory_space<vmem>>, %arg3: memref<9x64xf32, #tpu.memory_space<vmem>>, %arg4: memref<2x4xbf16, #tpu.memory_space<vmem>>, %arg5: memref<2x1xf32, #tpu.memory_space<vmem>>, %arg6: memref<9x2x2xbf16, #tpu.memory_space<vmem>>, %arg7: memref<2x1xf32, #tpu.memory_space<vmem>>, %arg8: memref<4x2xbf16, #tpu.memory_space<vmem>>, %arg9: memref<4x1xf32, #tpu.memory_space<vmem>>, %arg10: memref<1x4x64xf32, #tpu.memory_space<vmem>>) attributes {dimension_semantics = [#tpu.dimension_semantics<parallel>], iteration_bounds = array<i64: 2>, scalar_prefetch = 0 : i64, scratch_operands = 0 : i64, tpu.core_type = #tpu.core_type<tc>, window_params = [{transform_indices = @transform_0, window_bounds = array<i64: 1, 4, 256>}, {pipeline_mode = #tpu.pipeline_mode<synchronous>, transform_indices = @transform_1, window_bounds = array<i64: 256, 64>}, {pipeline_mode = #tpu.pipeline_mode<synchronous>, transform_indices = @transform_2, window_bounds = array<i64: 9, 64>}, {pipeline_mode = #tpu.pipeline_mode<synchronous>, transform_indices = @transform_3, window_bounds = array<i64: 2, 4>}, {pipeline_mode = #tpu.pipeline_mode<synchronous>, transform_indices = @transform_4, window_bounds = array<i64: 2, 1>}, {pipeline_mode = #tpu.pipeline_mode<synchronous>, transform_indices = @transform_5, window_bounds = array<i64: 9, 2, 2>}, {pipeline_mode = #tpu.pipeline_mode<synchronous>, transform_indices = @transform_6, window_bounds = array<i64: 2, 1>}, {pipeline_mode = #tpu.pipeline_mode<synchronous>, transform_indices = @transform_7, window_bounds = array<i64: 4, 2>}, {pipeline_mode = #tpu.pipeline_mode<synchronous>, transform_indices = @transform_8, window_bounds = array<i64: 4, 1>}, {transform_indices = @transform_9, window_bounds = array<i64: 1, 4, 64>}]} {
    %c0 = arith.constant 0 : index
    %c0_0 = arith.constant 0 : index
    %c0_1 = arith.constant 0 : index
    %0 = vector.load %arg1[%c0, %c0_0, %c0_1] : memref<1x4x256xf32, #tpu.memory_space<vmem>>, vector<1x4x256xf32>
    %1 = vector.shape_cast %0 : vector<1x4x256xf32> to vector<4x256xf32>
    %2 = vector.extract_strided_slice %1 {offsets = [0, 1], sizes = [4, 255], strides = [1, 1]} : vector<4x256xf32> to vector<4x255xf32>
    %3 = vector.extract_strided_slice %1 {offsets = [0, 0], sizes = [4, 1], strides = [1, 1]} : vector<4x256xf32> to vector<4x1xf32>
    %4 = tpu.concatenate %2, %3 in 1 : vector<4x255xf32>, vector<4x1xf32> -> vector<4x256xf32>
    %5 = arith.maximumf %1, %4 : vector<4x256xf32>
    %6 = vector.extract_strided_slice %1 {offsets = [0, 16], sizes = [4, 240], strides = [1, 1]} : vector<4x256xf32> to vector<4x240xf32>
    %7 = vector.extract_strided_slice %1 {offsets = [0, 0], sizes = [4, 16], strides = [1, 1]} : vector<4x256xf32> to vector<4x16xf32>
    %8 = tpu.concatenate %6, %7 in 1 : vector<4x240xf32>, vector<4x16xf32> -> vector<4x256xf32>
    %9 = arith.maximumf %5, %8 : vector<4x256xf32>
    %10 = vector.extract_strided_slice %1 {offsets = [0, 17], sizes = [4, 239], strides = [1, 1]} : vector<4x256xf32> to vector<4x239xf32>
    %11 = vector.extract_strided_slice %1 {offsets = [0, 0], sizes = [4, 17], strides = [1, 1]} : vector<4x256xf32> to vector<4x17xf32>
    %12 = tpu.concatenate %10, %11 in 1 : vector<4x239xf32>, vector<4x17xf32> -> vector<4x256xf32>
    %13 = arith.maximumf %9, %12 : vector<4x256xf32>
    %c0_2 = arith.constant 0 : index
    %c0_3 = arith.constant 0 : index
    %14 = vector.load %arg2[%c0_2, %c0_3] : memref<256x64xf32, #tpu.memory_space<vmem>>, vector<256x64xf32>
    %cst = arith.constant dense<0.000000e+00> : vector<4x64xf32>
    %15 = tpu.matmul %13, %14, %cst {dimension_numbers = #tpu.dot_dimension_numbers<[1], [0], [0], [1], [0, 0, 1, 1], [], []>} : vector<4x256xf32>, vector<256x64xf32>, vector<4x64xf32> -> vector<4x64xf32>
    %c0_4 = arith.constant 0 : index
    %c0_5 = arith.constant 0 : index
    %16 = vector.load %arg3[%c0_4, %c0_5] : memref<9x64xf32, #tpu.memory_space<vmem>>, vector<9x64xf32>
    %c0_6 = arith.constant 0 : index
    %c0_7 = arith.constant 0 : index
    %17 = vector.load %arg4[%c0_6, %c0_7] : memref<2x4xbf16, #tpu.memory_space<vmem>>, vector<2x4xbf16>
    %18 = arith.truncf %15 : vector<4x64xf32> to vector<4x64xbf16>
    %cst_8 = arith.constant dense<0.000000e+00> : vector<2x64xf32>
    %19 = tpu.matmul %17, %18, %cst_8 {dimension_numbers = #tpu.dot_dimension_numbers<[1], [0], [0], [1], [0, 0, 1, 1], [], []>} : vector<2x4xbf16>, vector<4x64xbf16>, vector<2x64xf32> -> vector<2x64xf32>
    %c0_9 = arith.constant 0 : index
    %c0_10 = arith.constant 0 : index
    %20 = vector.load %arg5[%c0_9, %c0_10] : memref<2x1xf32, #tpu.memory_space<vmem>>, vector<2x1xf32>
    %21 = vector.broadcast %20 : vector<2x1xf32> to vector<2x64xf32>
    %22 = arith.addf %19, %21 : vector<2x64xf32>
    %cst_11 = arith.constant 0.000000e+00 : f32
    %23 = vector.broadcast %cst_11 : f32 to vector<2x64xf32>
    %24 = arith.maximumf %22, %23 : vector<2x64xf32>
    %cst_12 = arith.constant 0.000000e+00 : f32
    %25 = vector.broadcast %cst_12 : f32 to vector<2x64xf32>
    %26 = vector.extract_strided_slice %24 {offsets = [0, 55], sizes = [2, 9], strides = [1, 1]} : vector<2x64xf32> to vector<2x9xf32>
    %27 = vector.extract_strided_slice %24 {offsets = [0, 0], sizes = [2, 55], strides = [1, 1]} : vector<2x64xf32> to vector<2x55xf32>
    %28 = tpu.concatenate %26, %27 in 1 : vector<2x9xf32>, vector<2x55xf32> -> vector<2x64xf32>
    %29 = vector.extract_strided_slice %16 {offsets = [0, 0], sizes = [1, 64], strides = [1, 1]} : vector<9x64xf32> to vector<1x64xf32>
    %30 = vector.broadcast %29 : vector<1x64xf32> to vector<2x64xf32>
    %31 = arith.mulf %28, %30 : vector<2x64xf32>
    %c0_13 = arith.constant 0 : index
    %c0_14 = arith.constant 0 : index
    %c0_15 = arith.constant 0 : index
    %32 = vector.load %arg6[%c0_13, %c0_14, %c0_15] : memref<9x2x2xbf16, #tpu.memory_space<vmem>>, vector<1x2x2xbf16>
    %33 = vector.shape_cast %32 : vector<1x2x2xbf16> to vector<2x2xbf16>
    %34 = arith.truncf %31 : vector<2x64xf32> to vector<2x64xbf16>
    %cst_16 = arith.constant dense<0.000000e+00> : vector<2x64xf32>
    %35 = tpu.matmul %33, %34, %cst_16 {dimension_numbers = #tpu.dot_dimension_numbers<[1], [0], [0], [1], [0, 0, 1, 1], [], []>} : vector<2x2xbf16>, vector<2x64xbf16>, vector<2x64xf32> -> vector<2x64xf32>
    %36 = arith.addf %25, %35 : vector<2x64xf32>
    %37 = vector.extract_strided_slice %24 {offsets = [0, 56], sizes = [2, 8], strides = [1, 1]} : vector<2x64xf32> to vector<2x8xf32>
    %38 = vector.extract_strided_slice %24 {offsets = [0, 0], sizes = [2, 56], strides = [1, 1]} : vector<2x64xf32> to vector<2x56xf32>
    %39 = tpu.concatenate %37, %38 in 1 : vector<2x8xf32>, vector<2x56xf32> -> vector<2x64xf32>
    %40 = vector.extract_strided_slice %16 {offsets = [1, 0], sizes = [1, 64], strides = [1, 1]} : vector<9x64xf32> to vector<1x64xf32>
    %41 = vector.broadcast %40 : vector<1x64xf32> to vector<2x64xf32>
    %42 = arith.mulf %39, %41 : vector<2x64xf32>
    %c1 = arith.constant 1 : index
    %c0_17 = arith.constant 0 : index
    %c0_18 = arith.constant 0 : index
    %43 = vector.load %arg6[%c1, %c0_17, %c0_18] : memref<9x2x2xbf16, #tpu.memory_space<vmem>>, vector<1x2x2xbf16>
    %44 = vector.shape_cast %43 : vector<1x2x2xbf16> to vector<2x2xbf16>
    %45 = arith.truncf %42 : vector<2x64xf32> to vector<2x64xbf16>
    %cst_19 = arith.constant dense<0.000000e+00> : vector<2x64xf32>
    %46 = tpu.matmul %44, %45, %cst_19 {dimension_numbers = #tpu.dot_dimension_numbers<[1], [0], [0], [1], [0, 0, 1, 1], [], []>} : vector<2x2xbf16>, vector<2x64xbf16>, vector<2x64xf32> -> vector<2x64xf32>
    %47 = arith.addf %36, %46 : vector<2x64xf32>
    %48 = vector.extract_strided_slice %24 {offsets = [0, 57], sizes = [2, 7], strides = [1, 1]} : vector<2x64xf32> to vector<2x7xf32>
    %49 = vector.extract_strided_slice %24 {offsets = [0, 0], sizes = [2, 57], strides = [1, 1]} : vector<2x64xf32> to vector<2x57xf32>
    %50 = tpu.concatenate %48, %49 in 1 : vector<2x7xf32>, vector<2x57xf32> -> vector<2x64xf32>
    %51 = vector.extract_strided_slice %16 {offsets = [2, 0], sizes = [1, 64], strides = [1, 1]} : vector<9x64xf32> to vector<1x64xf32>
    %52 = vector.broadcast %51 : vector<1x64xf32> to vector<2x64xf32>
    %53 = arith.mulf %50, %52 : vector<2x64xf32>
    %c2 = arith.constant 2 : index
    %c0_20 = arith.constant 0 : index
    %c0_21 = arith.constant 0 : index
    %54 = vector.load %arg6[%c2, %c0_20, %c0_21] : memref<9x2x2xbf16, #tpu.memory_space<vmem>>, vector<1x2x2xbf16>
    %55 = vector.shape_cast %54 : vector<1x2x2xbf16> to vector<2x2xbf16>
    %56 = arith.truncf %53 : vector<2x64xf32> to vector<2x64xbf16>
    %cst_22 = arith.constant dense<0.000000e+00> : vector<2x64xf32>
    %57 = tpu.matmul %55, %56, %cst_22 {dimension_numbers = #tpu.dot_dimension_numbers<[1], [0], [0], [1], [0, 0, 1, 1], [], []>} : vector<2x2xbf16>, vector<2x64xbf16>, vector<2x64xf32> -> vector<2x64xf32>
    %58 = arith.addf %47, %57 : vector<2x64xf32>
    %59 = vector.extract_strided_slice %24 {offsets = [0, 63], sizes = [2, 1], strides = [1, 1]} : vector<2x64xf32> to vector<2x1xf32>
    %60 = vector.extract_strided_slice %24 {offsets = [0, 0], sizes = [2, 63], strides = [1, 1]} : vector<2x64xf32> to vector<2x63xf32>
    %61 = tpu.concatenate %59, %60 in 1 : vector<2x1xf32>, vector<2x63xf32> -> vector<2x64xf32>
    %62 = vector.extract_strided_slice %16 {offsets = [3, 0], sizes = [1, 64], strides = [1, 1]} : vector<9x64xf32> to vector<1x64xf32>
    %63 = vector.broadcast %62 : vector<1x64xf32> to vector<2x64xf32>
    %64 = arith.mulf %61, %63 : vector<2x64xf32>
    %c3 = arith.constant 3 : index
    %c0_23 = arith.constant 0 : index
    %c0_24 = arith.constant 0 : index
    %65 = vector.load %arg6[%c3, %c0_23, %c0_24] : memref<9x2x2xbf16, #tpu.memory_space<vmem>>, vector<1x2x2xbf16>
    %66 = vector.shape_cast %65 : vector<1x2x2xbf16> to vector<2x2xbf16>
    %67 = arith.truncf %64 : vector<2x64xf32> to vector<2x64xbf16>
    %cst_25 = arith.constant dense<0.000000e+00> : vector<2x64xf32>
    %68 = tpu.matmul %66, %67, %cst_25 {dimension_numbers = #tpu.dot_dimension_numbers<[1], [0], [0], [1], [0, 0, 1, 1], [], []>} : vector<2x2xbf16>, vector<2x64xbf16>, vector<2x64xf32> -> vector<2x64xf32>
    %69 = arith.addf %58, %68 : vector<2x64xf32>
    %70 = vector.extract_strided_slice %16 {offsets = [4, 0], sizes = [1, 64], strides = [1, 1]} : vector<9x64xf32> to vector<1x64xf32>
    %71 = vector.broadcast %70 : vector<1x64xf32> to vector<2x64xf32>
    %72 = arith.mulf %24, %71 : vector<2x64xf32>
    %c4 = arith.constant 4 : index
    %c0_26 = arith.constant 0 : index
    %c0_27 = arith.constant 0 : index
    %73 = vector.load %arg6[%c4, %c0_26, %c0_27] : memref<9x2x2xbf16, #tpu.memory_space<vmem>>, vector<1x2x2xbf16>
    %74 = vector.shape_cast %73 : vector<1x2x2xbf16> to vector<2x2xbf16>
    %75 = arith.truncf %72 : vector<2x64xf32> to vector<2x64xbf16>
    %cst_28 = arith.constant dense<0.000000e+00> : vector<2x64xf32>
    %76 = tpu.matmul %74, %75, %cst_28 {dimension_numbers = #tpu.dot_dimension_numbers<[1], [0], [0], [1], [0, 0, 1, 1], [], []>} : vector<2x2xbf16>, vector<2x64xbf16>, vector<2x64xf32> -> vector<2x64xf32>
    %77 = arith.addf %69, %76 : vector<2x64xf32>
    %78 = vector.extract_strided_slice %24 {offsets = [0, 1], sizes = [2, 63], strides = [1, 1]} : vector<2x64xf32> to vector<2x63xf32>
    %79 = vector.extract_strided_slice %24 {offsets = [0, 0], sizes = [2, 1], strides = [1, 1]} : vector<2x64xf32> to vector<2x1xf32>
    %80 = tpu.concatenate %78, %79 in 1 : vector<2x63xf32>, vector<2x1xf32> -> vector<2x64xf32>
    %81 = vector.extract_strided_slice %16 {offsets = [5, 0], sizes = [1, 64], strides = [1, 1]} : vector<9x64xf32> to vector<1x64xf32>
    %82 = vector.broadcast %81 : vector<1x64xf32> to vector<2x64xf32>
    %83 = arith.mulf %80, %82 : vector<2x64xf32>
    %c5 = arith.constant 5 : index
    %c0_29 = arith.constant 0 : index
    %c0_30 = arith.constant 0 : index
    %84 = vector.load %arg6[%c5, %c0_29, %c0_30] : memref<9x2x2xbf16, #tpu.memory_space<vmem>>, vector<1x2x2xbf16>
    %85 = vector.shape_cast %84 : vector<1x2x2xbf16> to vector<2x2xbf16>
    %86 = arith.truncf %83 : vector<2x64xf32> to vector<2x64xbf16>
    %cst_31 = arith.constant dense<0.000000e+00> : vector<2x64xf32>
    %87 = tpu.matmul %85, %86, %cst_31 {dimension_numbers = #tpu.dot_dimension_numbers<[1], [0], [0], [1], [0, 0, 1, 1], [], []>} : vector<2x2xbf16>, vector<2x64xbf16>, vector<2x64xf32> -> vector<2x64xf32>
    %88 = arith.addf %77, %87 : vector<2x64xf32>
    %89 = vector.extract_strided_slice %24 {offsets = [0, 7], sizes = [2, 57], strides = [1, 1]} : vector<2x64xf32> to vector<2x57xf32>
    %90 = vector.extract_strided_slice %24 {offsets = [0, 0], sizes = [2, 7], strides = [1, 1]} : vector<2x64xf32> to vector<2x7xf32>
    %91 = tpu.concatenate %89, %90 in 1 : vector<2x57xf32>, vector<2x7xf32> -> vector<2x64xf32>
    %92 = vector.extract_strided_slice %16 {offsets = [6, 0], sizes = [1, 64], strides = [1, 1]} : vector<9x64xf32> to vector<1x64xf32>
    %93 = vector.broadcast %92 : vector<1x64xf32> to vector<2x64xf32>
    %94 = arith.mulf %91, %93 : vector<2x64xf32>
    %c6 = arith.constant 6 : index
    %c0_32 = arith.constant 0 : index
    %c0_33 = arith.constant 0 : index
    %95 = vector.load %arg6[%c6, %c0_32, %c0_33] : memref<9x2x2xbf16, #tpu.memory_space<vmem>>, vector<1x2x2xbf16>
    %96 = vector.shape_cast %95 : vector<1x2x2xbf16> to vector<2x2xbf16>
    %97 = arith.truncf %94 : vector<2x64xf32> to vector<2x64xbf16>
    %cst_34 = arith.constant dense<0.000000e+00> : vector<2x64xf32>
    %98 = tpu.matmul %96, %97, %cst_34 {dimension_numbers = #tpu.dot_dimension_numbers<[1], [0], [0], [1], [0, 0, 1, 1], [], []>} : vector<2x2xbf16>, vector<2x64xbf16>, vector<2x64xf32> -> vector<2x64xf32>
    %99 = arith.addf %88, %98 : vector<2x64xf32>
    %100 = vector.extract_strided_slice %24 {offsets = [0, 8], sizes = [2, 56], strides = [1, 1]} : vector<2x64xf32> to vector<2x56xf32>
    %101 = vector.extract_strided_slice %24 {offsets = [0, 0], sizes = [2, 8], strides = [1, 1]} : vector<2x64xf32> to vector<2x8xf32>
    %102 = tpu.concatenate %100, %101 in 1 : vector<2x56xf32>, vector<2x8xf32> -> vector<2x64xf32>
    %103 = vector.extract_strided_slice %16 {offsets = [7, 0], sizes = [1, 64], strides = [1, 1]} : vector<9x64xf32> to vector<1x64xf32>
    %104 = vector.broadcast %103 : vector<1x64xf32> to vector<2x64xf32>
    %105 = arith.mulf %102, %104 : vector<2x64xf32>
    %c7 = arith.constant 7 : index
    %c0_35 = arith.constant 0 : index
    %c0_36 = arith.constant 0 : index
    %106 = vector.load %arg6[%c7, %c0_35, %c0_36] : memref<9x2x2xbf16, #tpu.memory_space<vmem>>, vector<1x2x2xbf16>
    %107 = vector.shape_cast %106 : vector<1x2x2xbf16> to vector<2x2xbf16>
    %108 = arith.truncf %105 : vector<2x64xf32> to vector<2x64xbf16>
    %cst_37 = arith.constant dense<0.000000e+00> : vector<2x64xf32>
    %109 = tpu.matmul %107, %108, %cst_37 {dimension_numbers = #tpu.dot_dimension_numbers<[1], [0], [0], [1], [0, 0, 1, 1], [], []>} : vector<2x2xbf16>, vector<2x64xbf16>, vector<2x64xf32> -> vector<2x64xf32>
    %110 = arith.addf %99, %109 : vector<2x64xf32>
    %111 = vector.extract_strided_slice %24 {offsets = [0, 9], sizes = [2, 55], strides = [1, 1]} : vector<2x64xf32> to vector<2x55xf32>
    %112 = vector.extract_strided_slice %24 {offsets = [0, 0], sizes = [2, 9], strides = [1, 1]} : vector<2x64xf32> to vector<2x9xf32>
    %113 = tpu.concatenate %111, %112 in 1 : vector<2x55xf32>, vector<2x9xf32> -> vector<2x64xf32>
    %114 = vector.extract_strided_slice %16 {offsets = [8, 0], sizes = [1, 64], strides = [1, 1]} : vector<9x64xf32> to vector<1x64xf32>
    %115 = vector.broadcast %114 : vector<1x64xf32> to vector<2x64xf32>
    %116 = arith.mulf %113, %115 : vector<2x64xf32>
    %c8 = arith.constant 8 : index
    %c0_38 = arith.constant 0 : index
    %c0_39 = arith.constant 0 : index
    %117 = vector.load %arg6[%c8, %c0_38, %c0_39] : memref<9x2x2xbf16, #tpu.memory_space<vmem>>, vector<1x2x2xbf16>
    %118 = vector.shape_cast %117 : vector<1x2x2xbf16> to vector<2x2xbf16>
    %119 = arith.truncf %116 : vector<2x64xf32> to vector<2x64xbf16>
    %cst_40 = arith.constant dense<0.000000e+00> : vector<2x64xf32>
    %120 = tpu.matmul %118, %119, %cst_40 {dimension_numbers = #tpu.dot_dimension_numbers<[1], [0], [0], [1], [0, 0, 1, 1], [], []>} : vector<2x2xbf16>, vector<2x64xbf16>, vector<2x64xf32> -> vector<2x64xf32>
    %121 = arith.addf %110, %120 : vector<2x64xf32>
    %c0_41 = arith.constant 0 : index
    %c0_42 = arith.constant 0 : index
    %122 = vector.load %arg7[%c0_41, %c0_42] : memref<2x1xf32, #tpu.memory_space<vmem>>, vector<2x1xf32>
    %123 = vector.broadcast %122 : vector<2x1xf32> to vector<2x64xf32>
    %124 = arith.addf %121, %123 : vector<2x64xf32>
    %cst_43 = arith.constant 0.000000e+00 : f32
    %125 = vector.broadcast %cst_43 : f32 to vector<2x64xf32>
    %126 = arith.maximumf %124, %125 : vector<2x64xf32>
    %c0_44 = arith.constant 0 : index
    %c0_45 = arith.constant 0 : index
    %127 = vector.load %arg8[%c0_44, %c0_45] : memref<4x2xbf16, #tpu.memory_space<vmem>>, vector<4x2xbf16>
    %128 = arith.truncf %126 : vector<2x64xf32> to vector<2x64xbf16>
    %cst_46 = arith.constant dense<0.000000e+00> : vector<4x64xf32>
    %129 = tpu.matmul %127, %128, %cst_46 {dimension_numbers = #tpu.dot_dimension_numbers<[1], [0], [0], [1], [0, 0, 1, 1], [], []>} : vector<4x2xbf16>, vector<2x64xbf16>, vector<4x64xf32> -> vector<4x64xf32>
    %130 = arith.addf %15, %129 : vector<4x64xf32>
    %c0_47 = arith.constant 0 : index
    %c0_48 = arith.constant 0 : index
    %131 = vector.load %arg9[%c0_47, %c0_48] : memref<4x1xf32, #tpu.memory_space<vmem>>, vector<4x1xf32>
    %132 = vector.broadcast %131 : vector<4x1xf32> to vector<4x64xf32>
    %133 = arith.addf %130, %132 : vector<4x64xf32>
    %c0_49 = arith.constant 0 : index
    %c0_50 = arith.constant 0 : index
    %c0_51 = arith.constant 0 : index
    %134 = vector.load %arg10[%c0_49, %c0_50, %c0_51] : memref<1x4x64xf32, #tpu.memory_space<vmem>>, vector<1x4x64xf32>
    %135 = vector.shape_cast %134 : vector<1x4x64xf32> to vector<4x64xf32>
    %136 = vector.shape_cast %133 : vector<4x64xf32> to vector<1x4x64xf32>
    tpu.vector_store %arg10[%c0_49, %c0_50, %c0_51], %136 {strides = array<i32>} : memref<1x4x64xf32, #tpu.memory_space<vmem>>, vector<1x4x64xf32>,
    return
  }
  func.func @transform_0(%arg0: i32) -> (i32, i32, i32) {
    %c0_i32 = arith.constant 0 : i32
    %c0_i32_0 = arith.constant 0 : i32
    %c0_i32_1 = arith.constant 0 : i32
    return %arg0, %c0_i32, %c0_i32_0 : i32, i32, i32
  }
  func.func @transform_1(%arg0: i32) -> (i32, i32) {
    %c0_i32 = arith.constant 0 : i32
    %c0_i32_0 = arith.constant 0 : i32
    %c0_i32_1 = arith.constant 0 : i32
    return %c0_i32, %c0_i32_0 : i32, i32
  }
  func.func @transform_2(%arg0: i32) -> (i32, i32) {
    %c0_i32 = arith.constant 0 : i32
    %c0_i32_0 = arith.constant 0 : i32
    %c0_i32_1 = arith.constant 0 : i32
    return %c0_i32, %c0_i32_0 : i32, i32
  }
  func.func @transform_3(%arg0: i32) -> (i32, i32) {
    %c0_i32 = arith.constant 0 : i32
    %c0_i32_0 = arith.constant 0 : i32
    %c0_i32_1 = arith.constant 0 : i32
    return %c0_i32, %c0_i32_0 : i32, i32
  }
  func.func @transform_4(%arg0: i32) -> (i32, i32) {
    %c0_i32 = arith.constant 0 : i32
    %c0_i32_0 = arith.constant 0 : i32
    %c0_i32_1 = arith.constant 0 : i32
    return %c0_i32, %c0_i32_0 : i32, i32
  }
  func.func @transform_5(%arg0: i32) -> (i32, i32, i32) {
    %c0_i32 = arith.constant 0 : i32
    %c0_i32_0 = arith.constant 0 : i32
    %c0_i32_1 = arith.constant 0 : i32
    %c0_i32_2 = arith.constant 0 : i32
    return %c0_i32, %c0_i32_0, %c0_i32_1 : i32, i32, i32
  }
  func.func @transform_6(%arg0: i32) -> (i32, i32) {
    %c0_i32 = arith.constant 0 : i32
    %c0_i32_0 = arith.constant 0 : i32
    %c0_i32_1 = arith.constant 0 : i32
    return %c0_i32, %c0_i32_0 : i32, i32
  }
  func.func @transform_7(%arg0: i32) -> (i32, i32) {
    %c0_i32 = arith.constant 0 : i32
    %c0_i32_0 = arith.constant 0 : i32
    %c0_i32_1 = arith.constant 0 : i32
    return %c0_i32, %c0_i32_0 : i32, i32
  }
  func.func @transform_8(%arg0: i32) -> (i32, i32) {
    %c0_i32 = arith.constant 0 : i32
    %c0_i32_0 = arith.constant 0 : i32
    %c0_i32_1 = arith.constant 0 : i32
    return %c0_i32, %c0_i32_0 : i32, i32
  }
  func.func @transform_9(%arg0: i32) -> (i32, i32, i32) {
    %c0_i32 = arith.constant 0 : i32
    %c0_i32_0 = arith.constant 0 : i32
    %c0_i32_1 = arith.constant 0 : i32
    return %arg0, %c0_i32, %c0_i32_0 : i32, i32, i32
  }
}

module attributes {stable_mosaic.version = 11 : i64} {
  func.func @_fused_block_kernel(%arg0: i32, %arg1: memref<1x4x64xf32, #tpu.memory_space<vmem>>, %arg2: memref<9x64xf32, #tpu.memory_space<vmem>>, %arg3: memref<2x4xbf16, #tpu.memory_space<vmem>>, %arg4: memref<2x1xf32, #tpu.memory_space<vmem>>, %arg5: memref<9x2x2xbf16, #tpu.memory_space<vmem>>, %arg6: memref<2x1xf32, #tpu.memory_space<vmem>>, %arg7: memref<4x2xbf16, #tpu.memory_space<vmem>>, %arg8: memref<4x1xf32, #tpu.memory_space<vmem>>, %arg9: memref<1x4x64xf32, #tpu.memory_space<vmem>>) attributes {dimension_semantics = [#tpu.dimension_semantics<parallel>], iteration_bounds = array<i64: 2>, scalar_prefetch = 0 : i64, scratch_operands = 0 : i64, tpu.core_type = #tpu.core_type<tc>, window_params = [{transform_indices = @transform_0, window_bounds = array<i64: 1, 4, 64>}, {pipeline_mode = #tpu.pipeline_mode<synchronous>, transform_indices = @transform_1, window_bounds = array<i64: 9, 64>}, {pipeline_mode = #tpu.pipeline_mode<synchronous>, transform_indices = @transform_2, window_bounds = array<i64: 2, 4>}, {pipeline_mode = #tpu.pipeline_mode<synchronous>, transform_indices = @transform_3, window_bounds = array<i64: 2, 1>}, {pipeline_mode = #tpu.pipeline_mode<synchronous>, transform_indices = @transform_4, window_bounds = array<i64: 9, 2, 2>}, {pipeline_mode = #tpu.pipeline_mode<synchronous>, transform_indices = @transform_5, window_bounds = array<i64: 2, 1>}, {pipeline_mode = #tpu.pipeline_mode<synchronous>, transform_indices = @transform_6, window_bounds = array<i64: 4, 2>}, {pipeline_mode = #tpu.pipeline_mode<synchronous>, transform_indices = @transform_7, window_bounds = array<i64: 4, 1>}, {transform_indices = @transform_8, window_bounds = array<i64: 1, 4, 64>}]} {
    %c0 = arith.constant 0 : index
    %c0_0 = arith.constant 0 : index
    %c0_1 = arith.constant 0 : index
    %0 = vector.load %arg1[%c0, %c0_0, %c0_1] : memref<1x4x64xf32, #tpu.memory_space<vmem>>, vector<1x4x64xf32>
    %1 = vector.shape_cast %0 : vector<1x4x64xf32> to vector<4x64xf32>
    %c0_2 = arith.constant 0 : index
    %c0_3 = arith.constant 0 : index
    %2 = vector.load %arg2[%c0_2, %c0_3] : memref<9x64xf32, #tpu.memory_space<vmem>>, vector<9x64xf32>
    %c0_4 = arith.constant 0 : index
    %c0_5 = arith.constant 0 : index
    %3 = vector.load %arg3[%c0_4, %c0_5] : memref<2x4xbf16, #tpu.memory_space<vmem>>, vector<2x4xbf16>
    %4 = arith.truncf %1 : vector<4x64xf32> to vector<4x64xbf16>
    %cst = arith.constant dense<0.000000e+00> : vector<2x64xf32>
    %5 = tpu.matmul %3, %4, %cst {dimension_numbers = #tpu.dot_dimension_numbers<[1], [0], [0], [1], [0, 0, 1, 1], [], []>} : vector<2x4xbf16>, vector<4x64xbf16>, vector<2x64xf32> -> vector<2x64xf32>
    %c0_6 = arith.constant 0 : index
    %c0_7 = arith.constant 0 : index
    %6 = vector.load %arg4[%c0_6, %c0_7] : memref<2x1xf32, #tpu.memory_space<vmem>>, vector<2x1xf32>
    %7 = vector.broadcast %6 : vector<2x1xf32> to vector<2x64xf32>
    %8 = arith.addf %5, %7 : vector<2x64xf32>
    %cst_8 = arith.constant 0.000000e+00 : f32
    %9 = vector.broadcast %cst_8 : f32 to vector<2x64xf32>
    %10 = arith.maximumf %8, %9 : vector<2x64xf32>
    %cst_9 = arith.constant 0.000000e+00 : f32
    %11 = vector.broadcast %cst_9 : f32 to vector<2x64xf32>
    %12 = vector.extract_strided_slice %10 {offsets = [0, 55], sizes = [2, 9], strides = [1, 1]} : vector<2x64xf32> to vector<2x9xf32>
    %13 = vector.extract_strided_slice %10 {offsets = [0, 0], sizes = [2, 55], strides = [1, 1]} : vector<2x64xf32> to vector<2x55xf32>
    %14 = tpu.concatenate %12, %13 in 1 : vector<2x9xf32>, vector<2x55xf32> -> vector<2x64xf32>
    %15 = vector.extract_strided_slice %2 {offsets = [0, 0], sizes = [1, 64], strides = [1, 1]} : vector<9x64xf32> to vector<1x64xf32>
    %16 = vector.broadcast %15 : vector<1x64xf32> to vector<2x64xf32>
    %17 = arith.mulf %14, %16 : vector<2x64xf32>
    %c0_10 = arith.constant 0 : index
    %c0_11 = arith.constant 0 : index
    %c0_12 = arith.constant 0 : index
    %18 = vector.load %arg5[%c0_10, %c0_11, %c0_12] : memref<9x2x2xbf16, #tpu.memory_space<vmem>>, vector<1x2x2xbf16>
    %19 = vector.shape_cast %18 : vector<1x2x2xbf16> to vector<2x2xbf16>
    %20 = arith.truncf %17 : vector<2x64xf32> to vector<2x64xbf16>
    %cst_13 = arith.constant dense<0.000000e+00> : vector<2x64xf32>
    %21 = tpu.matmul %19, %20, %cst_13 {dimension_numbers = #tpu.dot_dimension_numbers<[1], [0], [0], [1], [0, 0, 1, 1], [], []>} : vector<2x2xbf16>, vector<2x64xbf16>, vector<2x64xf32> -> vector<2x64xf32>
    %22 = arith.addf %11, %21 : vector<2x64xf32>
    %23 = vector.extract_strided_slice %10 {offsets = [0, 56], sizes = [2, 8], strides = [1, 1]} : vector<2x64xf32> to vector<2x8xf32>
    %24 = vector.extract_strided_slice %10 {offsets = [0, 0], sizes = [2, 56], strides = [1, 1]} : vector<2x64xf32> to vector<2x56xf32>
    %25 = tpu.concatenate %23, %24 in 1 : vector<2x8xf32>, vector<2x56xf32> -> vector<2x64xf32>
    %26 = vector.extract_strided_slice %2 {offsets = [1, 0], sizes = [1, 64], strides = [1, 1]} : vector<9x64xf32> to vector<1x64xf32>
    %27 = vector.broadcast %26 : vector<1x64xf32> to vector<2x64xf32>
    %28 = arith.mulf %25, %27 : vector<2x64xf32>
    %c1 = arith.constant 1 : index
    %c0_14 = arith.constant 0 : index
    %c0_15 = arith.constant 0 : index
    %29 = vector.load %arg5[%c1, %c0_14, %c0_15] : memref<9x2x2xbf16, #tpu.memory_space<vmem>>, vector<1x2x2xbf16>
    %30 = vector.shape_cast %29 : vector<1x2x2xbf16> to vector<2x2xbf16>
    %31 = arith.truncf %28 : vector<2x64xf32> to vector<2x64xbf16>
    %cst_16 = arith.constant dense<0.000000e+00> : vector<2x64xf32>
    %32 = tpu.matmul %30, %31, %cst_16 {dimension_numbers = #tpu.dot_dimension_numbers<[1], [0], [0], [1], [0, 0, 1, 1], [], []>} : vector<2x2xbf16>, vector<2x64xbf16>, vector<2x64xf32> -> vector<2x64xf32>
    %33 = arith.addf %22, %32 : vector<2x64xf32>
    %34 = vector.extract_strided_slice %10 {offsets = [0, 57], sizes = [2, 7], strides = [1, 1]} : vector<2x64xf32> to vector<2x7xf32>
    %35 = vector.extract_strided_slice %10 {offsets = [0, 0], sizes = [2, 57], strides = [1, 1]} : vector<2x64xf32> to vector<2x57xf32>
    %36 = tpu.concatenate %34, %35 in 1 : vector<2x7xf32>, vector<2x57xf32> -> vector<2x64xf32>
    %37 = vector.extract_strided_slice %2 {offsets = [2, 0], sizes = [1, 64], strides = [1, 1]} : vector<9x64xf32> to vector<1x64xf32>
    %38 = vector.broadcast %37 : vector<1x64xf32> to vector<2x64xf32>
    %39 = arith.mulf %36, %38 : vector<2x64xf32>
    %c2 = arith.constant 2 : index
    %c0_17 = arith.constant 0 : index
    %c0_18 = arith.constant 0 : index
    %40 = vector.load %arg5[%c2, %c0_17, %c0_18] : memref<9x2x2xbf16, #tpu.memory_space<vmem>>, vector<1x2x2xbf16>
    %41 = vector.shape_cast %40 : vector<1x2x2xbf16> to vector<2x2xbf16>
    %42 = arith.truncf %39 : vector<2x64xf32> to vector<2x64xbf16>
    %cst_19 = arith.constant dense<0.000000e+00> : vector<2x64xf32>
    %43 = tpu.matmul %41, %42, %cst_19 {dimension_numbers = #tpu.dot_dimension_numbers<[1], [0], [0], [1], [0, 0, 1, 1], [], []>} : vector<2x2xbf16>, vector<2x64xbf16>, vector<2x64xf32> -> vector<2x64xf32>
    %44 = arith.addf %33, %43 : vector<2x64xf32>
    %45 = vector.extract_strided_slice %10 {offsets = [0, 63], sizes = [2, 1], strides = [1, 1]} : vector<2x64xf32> to vector<2x1xf32>
    %46 = vector.extract_strided_slice %10 {offsets = [0, 0], sizes = [2, 63], strides = [1, 1]} : vector<2x64xf32> to vector<2x63xf32>
    %47 = tpu.concatenate %45, %46 in 1 : vector<2x1xf32>, vector<2x63xf32> -> vector<2x64xf32>
    %48 = vector.extract_strided_slice %2 {offsets = [3, 0], sizes = [1, 64], strides = [1, 1]} : vector<9x64xf32> to vector<1x64xf32>
    %49 = vector.broadcast %48 : vector<1x64xf32> to vector<2x64xf32>
    %50 = arith.mulf %47, %49 : vector<2x64xf32>
    %c3 = arith.constant 3 : index
    %c0_20 = arith.constant 0 : index
    %c0_21 = arith.constant 0 : index
    %51 = vector.load %arg5[%c3, %c0_20, %c0_21] : memref<9x2x2xbf16, #tpu.memory_space<vmem>>, vector<1x2x2xbf16>
    %52 = vector.shape_cast %51 : vector<1x2x2xbf16> to vector<2x2xbf16>
    %53 = arith.truncf %50 : vector<2x64xf32> to vector<2x64xbf16>
    %cst_22 = arith.constant dense<0.000000e+00> : vector<2x64xf32>
    %54 = tpu.matmul %52, %53, %cst_22 {dimension_numbers = #tpu.dot_dimension_numbers<[1], [0], [0], [1], [0, 0, 1, 1], [], []>} : vector<2x2xbf16>, vector<2x64xbf16>, vector<2x64xf32> -> vector<2x64xf32>
    %55 = arith.addf %44, %54 : vector<2x64xf32>
    %56 = vector.extract_strided_slice %2 {offsets = [4, 0], sizes = [1, 64], strides = [1, 1]} : vector<9x64xf32> to vector<1x64xf32>
    %57 = vector.broadcast %56 : vector<1x64xf32> to vector<2x64xf32>
    %58 = arith.mulf %10, %57 : vector<2x64xf32>
    %c4 = arith.constant 4 : index
    %c0_23 = arith.constant 0 : index
    %c0_24 = arith.constant 0 : index
    %59 = vector.load %arg5[%c4, %c0_23, %c0_24] : memref<9x2x2xbf16, #tpu.memory_space<vmem>>, vector<1x2x2xbf16>
    %60 = vector.shape_cast %59 : vector<1x2x2xbf16> to vector<2x2xbf16>
    %61 = arith.truncf %58 : vector<2x64xf32> to vector<2x64xbf16>
    %cst_25 = arith.constant dense<0.000000e+00> : vector<2x64xf32>
    %62 = tpu.matmul %60, %61, %cst_25 {dimension_numbers = #tpu.dot_dimension_numbers<[1], [0], [0], [1], [0, 0, 1, 1], [], []>} : vector<2x2xbf16>, vector<2x64xbf16>, vector<2x64xf32> -> vector<2x64xf32>
    %63 = arith.addf %55, %62 : vector<2x64xf32>
    %64 = vector.extract_strided_slice %10 {offsets = [0, 1], sizes = [2, 63], strides = [1, 1]} : vector<2x64xf32> to vector<2x63xf32>
    %65 = vector.extract_strided_slice %10 {offsets = [0, 0], sizes = [2, 1], strides = [1, 1]} : vector<2x64xf32> to vector<2x1xf32>
    %66 = tpu.concatenate %64, %65 in 1 : vector<2x63xf32>, vector<2x1xf32> -> vector<2x64xf32>
    %67 = vector.extract_strided_slice %2 {offsets = [5, 0], sizes = [1, 64], strides = [1, 1]} : vector<9x64xf32> to vector<1x64xf32>
    %68 = vector.broadcast %67 : vector<1x64xf32> to vector<2x64xf32>
    %69 = arith.mulf %66, %68 : vector<2x64xf32>
    %c5 = arith.constant 5 : index
    %c0_26 = arith.constant 0 : index
    %c0_27 = arith.constant 0 : index
    %70 = vector.load %arg5[%c5, %c0_26, %c0_27] : memref<9x2x2xbf16, #tpu.memory_space<vmem>>, vector<1x2x2xbf16>
    %71 = vector.shape_cast %70 : vector<1x2x2xbf16> to vector<2x2xbf16>
    %72 = arith.truncf %69 : vector<2x64xf32> to vector<2x64xbf16>
    %cst_28 = arith.constant dense<0.000000e+00> : vector<2x64xf32>
    %73 = tpu.matmul %71, %72, %cst_28 {dimension_numbers = #tpu.dot_dimension_numbers<[1], [0], [0], [1], [0, 0, 1, 1], [], []>} : vector<2x2xbf16>, vector<2x64xbf16>, vector<2x64xf32> -> vector<2x64xf32>
    %74 = arith.addf %63, %73 : vector<2x64xf32>
    %75 = vector.extract_strided_slice %10 {offsets = [0, 7], sizes = [2, 57], strides = [1, 1]} : vector<2x64xf32> to vector<2x57xf32>
    %76 = vector.extract_strided_slice %10 {offsets = [0, 0], sizes = [2, 7], strides = [1, 1]} : vector<2x64xf32> to vector<2x7xf32>
    %77 = tpu.concatenate %75, %76 in 1 : vector<2x57xf32>, vector<2x7xf32> -> vector<2x64xf32>
    %78 = vector.extract_strided_slice %2 {offsets = [6, 0], sizes = [1, 64], strides = [1, 1]} : vector<9x64xf32> to vector<1x64xf32>
    %79 = vector.broadcast %78 : vector<1x64xf32> to vector<2x64xf32>
    %80 = arith.mulf %77, %79 : vector<2x64xf32>
    %c6 = arith.constant 6 : index
    %c0_29 = arith.constant 0 : index
    %c0_30 = arith.constant 0 : index
    %81 = vector.load %arg5[%c6, %c0_29, %c0_30] : memref<9x2x2xbf16, #tpu.memory_space<vmem>>, vector<1x2x2xbf16>
    %82 = vector.shape_cast %81 : vector<1x2x2xbf16> to vector<2x2xbf16>
    %83 = arith.truncf %80 : vector<2x64xf32> to vector<2x64xbf16>
    %cst_31 = arith.constant dense<0.000000e+00> : vector<2x64xf32>
    %84 = tpu.matmul %82, %83, %cst_31 {dimension_numbers = #tpu.dot_dimension_numbers<[1], [0], [0], [1], [0, 0, 1, 1], [], []>} : vector<2x2xbf16>, vector<2x64xbf16>, vector<2x64xf32> -> vector<2x64xf32>
    %85 = arith.addf %74, %84 : vector<2x64xf32>
    %86 = vector.extract_strided_slice %10 {offsets = [0, 8], sizes = [2, 56], strides = [1, 1]} : vector<2x64xf32> to vector<2x56xf32>
    %87 = vector.extract_strided_slice %10 {offsets = [0, 0], sizes = [2, 8], strides = [1, 1]} : vector<2x64xf32> to vector<2x8xf32>
    %88 = tpu.concatenate %86, %87 in 1 : vector<2x56xf32>, vector<2x8xf32> -> vector<2x64xf32>
    %89 = vector.extract_strided_slice %2 {offsets = [7, 0], sizes = [1, 64], strides = [1, 1]} : vector<9x64xf32> to vector<1x64xf32>
    %90 = vector.broadcast %89 : vector<1x64xf32> to vector<2x64xf32>
    %91 = arith.mulf %88, %90 : vector<2x64xf32>
    %c7 = arith.constant 7 : index
    %c0_32 = arith.constant 0 : index
    %c0_33 = arith.constant 0 : index
    %92 = vector.load %arg5[%c7, %c0_32, %c0_33] : memref<9x2x2xbf16, #tpu.memory_space<vmem>>, vector<1x2x2xbf16>
    %93 = vector.shape_cast %92 : vector<1x2x2xbf16> to vector<2x2xbf16>
    %94 = arith.truncf %91 : vector<2x64xf32> to vector<2x64xbf16>
    %cst_34 = arith.constant dense<0.000000e+00> : vector<2x64xf32>
    %95 = tpu.matmul %93, %94, %cst_34 {dimension_numbers = #tpu.dot_dimension_numbers<[1], [0], [0], [1], [0, 0, 1, 1], [], []>} : vector<2x2xbf16>, vector<2x64xbf16>, vector<2x64xf32> -> vector<2x64xf32>
    %96 = arith.addf %85, %95 : vector<2x64xf32>
    %97 = vector.extract_strided_slice %10 {offsets = [0, 9], sizes = [2, 55], strides = [1, 1]} : vector<2x64xf32> to vector<2x55xf32>
    %98 = vector.extract_strided_slice %10 {offsets = [0, 0], sizes = [2, 9], strides = [1, 1]} : vector<2x64xf32> to vector<2x9xf32>
    %99 = tpu.concatenate %97, %98 in 1 : vector<2x55xf32>, vector<2x9xf32> -> vector<2x64xf32>
    %100 = vector.extract_strided_slice %2 {offsets = [8, 0], sizes = [1, 64], strides = [1, 1]} : vector<9x64xf32> to vector<1x64xf32>
    %101 = vector.broadcast %100 : vector<1x64xf32> to vector<2x64xf32>
    %102 = arith.mulf %99, %101 : vector<2x64xf32>
    %c8 = arith.constant 8 : index
    %c0_35 = arith.constant 0 : index
    %c0_36 = arith.constant 0 : index
    %103 = vector.load %arg5[%c8, %c0_35, %c0_36] : memref<9x2x2xbf16, #tpu.memory_space<vmem>>, vector<1x2x2xbf16>
    %104 = vector.shape_cast %103 : vector<1x2x2xbf16> to vector<2x2xbf16>
    %105 = arith.truncf %102 : vector<2x64xf32> to vector<2x64xbf16>
    %cst_37 = arith.constant dense<0.000000e+00> : vector<2x64xf32>
    %106 = tpu.matmul %104, %105, %cst_37 {dimension_numbers = #tpu.dot_dimension_numbers<[1], [0], [0], [1], [0, 0, 1, 1], [], []>} : vector<2x2xbf16>, vector<2x64xbf16>, vector<2x64xf32> -> vector<2x64xf32>
    %107 = arith.addf %96, %106 : vector<2x64xf32>
    %c0_38 = arith.constant 0 : index
    %c0_39 = arith.constant 0 : index
    %108 = vector.load %arg6[%c0_38, %c0_39] : memref<2x1xf32, #tpu.memory_space<vmem>>, vector<2x1xf32>
    %109 = vector.broadcast %108 : vector<2x1xf32> to vector<2x64xf32>
    %110 = arith.addf %107, %109 : vector<2x64xf32>
    %cst_40 = arith.constant 0.000000e+00 : f32
    %111 = vector.broadcast %cst_40 : f32 to vector<2x64xf32>
    %112 = arith.maximumf %110, %111 : vector<2x64xf32>
    %c0_41 = arith.constant 0 : index
    %c0_42 = arith.constant 0 : index
    %113 = vector.load %arg7[%c0_41, %c0_42] : memref<4x2xbf16, #tpu.memory_space<vmem>>, vector<4x2xbf16>
    %114 = arith.truncf %112 : vector<2x64xf32> to vector<2x64xbf16>
    %cst_43 = arith.constant dense<0.000000e+00> : vector<4x64xf32>
    %115 = tpu.matmul %113, %114, %cst_43 {dimension_numbers = #tpu.dot_dimension_numbers<[1], [0], [0], [1], [0, 0, 1, 1], [], []>} : vector<4x2xbf16>, vector<2x64xbf16>, vector<4x64xf32> -> vector<4x64xf32>
    %116 = arith.addf %1, %115 : vector<4x64xf32>
    %c0_44 = arith.constant 0 : index
    %c0_45 = arith.constant 0 : index
    %117 = vector.load %arg8[%c0_44, %c0_45] : memref<4x1xf32, #tpu.memory_space<vmem>>, vector<4x1xf32>
    %118 = vector.broadcast %117 : vector<4x1xf32> to vector<4x64xf32>
    %119 = arith.addf %116, %118 : vector<4x64xf32>
    %c0_46 = arith.constant 0 : index
    %c0_47 = arith.constant 0 : index
    %c0_48 = arith.constant 0 : index
    %120 = vector.load %arg9[%c0_46, %c0_47, %c0_48] : memref<1x4x64xf32, #tpu.memory_space<vmem>>, vector<1x4x64xf32>
    %121 = vector.shape_cast %120 : vector<1x4x64xf32> to vector<4x64xf32>
    %122 = vector.shape_cast %119 : vector<4x64xf32> to vector<1x4x64xf32>
    tpu.vector_store %arg9[%c0_46, %c0_47, %c0_48], %122 {strides = array<i32>} : memref<1x4x64xf32, #tpu.memory_space<vmem>>, vector<1x4x64xf32>,
    return
  }
  func.func @transform_0(%arg0: i32) -> (i32, i32, i32) {
    %c0_i32 = arith.constant 0 : i32
    %c0_i32_0 = arith.constant 0 : i32
    %c0_i32_1 = arith.constant 0 : i32
    return %arg0, %c0_i32, %c0_i32_0 : i32, i32, i32
  }
  func.func @transform_1(%arg0: i32) -> (i32, i32) {
    %c0_i32 = arith.constant 0 : i32
    %c0_i32_0 = arith.constant 0 : i32
    %c0_i32_1 = arith.constant 0 : i32
    return %c0_i32, %c0_i32_0 : i32, i32
  }
  func.func @transform_2(%arg0: i32) -> (i32, i32) {
    %c0_i32 = arith.constant 0 : i32
    %c0_i32_0 = arith.constant 0 : i32
    %c0_i32_1 = arith.constant 0 : i32
    return %c0_i32, %c0_i32_0 : i32, i32
  }
  func.func @transform_3(%arg0: i32) -> (i32, i32) {
    %c0_i32 = arith.constant 0 : i32
    %c0_i32_0 = arith.constant 0 : i32
    %c0_i32_1 = arith.constant 0 : i32
    return %c0_i32, %c0_i32_0 : i32, i32
  }
  func.func @transform_4(%arg0: i32) -> (i32, i32, i32) {
    %c0_i32 = arith.constant 0 : i32
    %c0_i32_0 = arith.constant 0 : i32
    %c0_i32_1 = arith.constant 0 : i32
    %c0_i32_2 = arith.constant 0 : i32
    return %c0_i32, %c0_i32_0, %c0_i32_1 : i32, i32, i32
  }
  func.func @transform_5(%arg0: i32) -> (i32, i32) {
    %c0_i32 = arith.constant 0 : i32
    %c0_i32_0 = arith.constant 0 : i32
    %c0_i32_1 = arith.constant 0 : i32
    return %c0_i32, %c0_i32_0 : i32, i32
  }
  func.func @transform_6(%arg0: i32) -> (i32, i32) {
    %c0_i32 = arith.constant 0 : i32
    %c0_i32_0 = arith.constant 0 : i32
    %c0_i32_1 = arith.constant 0 : i32
    return %c0_i32, %c0_i32_0 : i32, i32
  }
  func.func @transform_7(%arg0: i32) -> (i32, i32) {
    %c0_i32 = arith.constant 0 : i32
    %c0_i32_0 = arith.constant 0 : i32
    %c0_i32_1 = arith.constant 0 : i32
    return %c0_i32, %c0_i32_0 : i32, i32
  }
  func.func @transform_8(%arg0: i32) -> (i32, i32, i32) {
    %c0_i32 = arith.constant 0 : i32
    %c0_i32_0 = arith.constant 0 : i32
    %c0_i32_1 = arith.constant 0 : i32
    return %arg0, %c0_i32, %c0_i32_0 : i32, i32, i32
  }
}

module attributes {stable_mosaic.version = 11 : i64} {
  func.func @_fused_block_kernel(%arg0: i32, %arg1: memref<1x4x64xf32, #tpu.memory_space<vmem>>, %arg2: memref<64x16xf32, #tpu.memory_space<vmem>>, %arg3: memref<9x16xf32, #tpu.memory_space<vmem>>, %arg4: memref<2x4xbf16, #tpu.memory_space<vmem>>, %arg5: memref<2x1xf32, #tpu.memory_space<vmem>>, %arg6: memref<9x2x2xbf16, #tpu.memory_space<vmem>>, %arg7: memref<2x1xf32, #tpu.memory_space<vmem>>, %arg8: memref<4x2xbf16, #tpu.memory_space<vmem>>, %arg9: memref<4x1xf32, #tpu.memory_space<vmem>>, %arg10: memref<1x4x16xf32, #tpu.memory_space<vmem>>) attributes {dimension_semantics = [#tpu.dimension_semantics<parallel>], iteration_bounds = array<i64: 2>, scalar_prefetch = 0 : i64, scratch_operands = 0 : i64, tpu.core_type = #tpu.core_type<tc>, window_params = [{transform_indices = @transform_0, window_bounds = array<i64: 1, 4, 64>}, {pipeline_mode = #tpu.pipeline_mode<synchronous>, transform_indices = @transform_1, window_bounds = array<i64: 64, 16>}, {pipeline_mode = #tpu.pipeline_mode<synchronous>, transform_indices = @transform_2, window_bounds = array<i64: 9, 16>}, {pipeline_mode = #tpu.pipeline_mode<synchronous>, transform_indices = @transform_3, window_bounds = array<i64: 2, 4>}, {pipeline_mode = #tpu.pipeline_mode<synchronous>, transform_indices = @transform_4, window_bounds = array<i64: 2, 1>}, {pipeline_mode = #tpu.pipeline_mode<synchronous>, transform_indices = @transform_5, window_bounds = array<i64: 9, 2, 2>}, {pipeline_mode = #tpu.pipeline_mode<synchronous>, transform_indices = @transform_6, window_bounds = array<i64: 2, 1>}, {pipeline_mode = #tpu.pipeline_mode<synchronous>, transform_indices = @transform_7, window_bounds = array<i64: 4, 2>}, {pipeline_mode = #tpu.pipeline_mode<synchronous>, transform_indices = @transform_8, window_bounds = array<i64: 4, 1>}, {transform_indices = @transform_9, window_bounds = array<i64: 1, 4, 16>}]} {
    %c0 = arith.constant 0 : index
    %c0_0 = arith.constant 0 : index
    %c0_1 = arith.constant 0 : index
    %0 = vector.load %arg1[%c0, %c0_0, %c0_1] : memref<1x4x64xf32, #tpu.memory_space<vmem>>, vector<1x4x64xf32>
    %1 = vector.shape_cast %0 : vector<1x4x64xf32> to vector<4x64xf32>
    %2 = vector.extract_strided_slice %1 {offsets = [0, 1], sizes = [4, 63], strides = [1, 1]} : vector<4x64xf32> to vector<4x63xf32>
    %3 = vector.extract_strided_slice %1 {offsets = [0, 0], sizes = [4, 1], strides = [1, 1]} : vector<4x64xf32> to vector<4x1xf32>
    %4 = tpu.concatenate %2, %3 in 1 : vector<4x63xf32>, vector<4x1xf32> -> vector<4x64xf32>
    %5 = arith.maximumf %1, %4 : vector<4x64xf32>
    %6 = vector.extract_strided_slice %1 {offsets = [0, 8], sizes = [4, 56], strides = [1, 1]} : vector<4x64xf32> to vector<4x56xf32>
    %7 = vector.extract_strided_slice %1 {offsets = [0, 0], sizes = [4, 8], strides = [1, 1]} : vector<4x64xf32> to vector<4x8xf32>
    %8 = tpu.concatenate %6, %7 in 1 : vector<4x56xf32>, vector<4x8xf32> -> vector<4x64xf32>
    %9 = arith.maximumf %5, %8 : vector<4x64xf32>
    %10 = vector.extract_strided_slice %1 {offsets = [0, 9], sizes = [4, 55], strides = [1, 1]} : vector<4x64xf32> to vector<4x55xf32>
    %11 = vector.extract_strided_slice %1 {offsets = [0, 0], sizes = [4, 9], strides = [1, 1]} : vector<4x64xf32> to vector<4x9xf32>
    %12 = tpu.concatenate %10, %11 in 1 : vector<4x55xf32>, vector<4x9xf32> -> vector<4x64xf32>
    %13 = arith.maximumf %9, %12 : vector<4x64xf32>
    %c0_2 = arith.constant 0 : index
    %c0_3 = arith.constant 0 : index
    %14 = vector.load %arg2[%c0_2, %c0_3] : memref<64x16xf32, #tpu.memory_space<vmem>>, vector<64x16xf32>
    %cst = arith.constant dense<0.000000e+00> : vector<4x16xf32>
    %15 = tpu.matmul %13, %14, %cst {dimension_numbers = #tpu.dot_dimension_numbers<[1], [0], [0], [1], [0, 0, 1, 1], [], []>} : vector<4x64xf32>, vector<64x16xf32>, vector<4x16xf32> -> vector<4x16xf32>
    %c0_4 = arith.constant 0 : index
    %c0_5 = arith.constant 0 : index
    %16 = vector.load %arg3[%c0_4, %c0_5] : memref<9x16xf32, #tpu.memory_space<vmem>>, vector<9x16xf32>
    %c0_6 = arith.constant 0 : index
    %c0_7 = arith.constant 0 : index
    %17 = vector.load %arg4[%c0_6, %c0_7] : memref<2x4xbf16, #tpu.memory_space<vmem>>, vector<2x4xbf16>
    %18 = arith.truncf %15 : vector<4x16xf32> to vector<4x16xbf16>
    %cst_8 = arith.constant dense<0.000000e+00> : vector<2x16xf32>
    %19 = tpu.matmul %17, %18, %cst_8 {dimension_numbers = #tpu.dot_dimension_numbers<[1], [0], [0], [1], [0, 0, 1, 1], [], []>} : vector<2x4xbf16>, vector<4x16xbf16>, vector<2x16xf32> -> vector<2x16xf32>
    %c0_9 = arith.constant 0 : index
    %c0_10 = arith.constant 0 : index
    %20 = vector.load %arg5[%c0_9, %c0_10] : memref<2x1xf32, #tpu.memory_space<vmem>>, vector<2x1xf32>
    %21 = vector.broadcast %20 : vector<2x1xf32> to vector<2x16xf32>
    %22 = arith.addf %19, %21 : vector<2x16xf32>
    %cst_11 = arith.constant 0.000000e+00 : f32
    %23 = vector.broadcast %cst_11 : f32 to vector<2x16xf32>
    %24 = arith.maximumf %22, %23 : vector<2x16xf32>
    %cst_12 = arith.constant 0.000000e+00 : f32
    %25 = vector.broadcast %cst_12 : f32 to vector<2x16xf32>
    %26 = vector.extract_strided_slice %24 {offsets = [0, 11], sizes = [2, 5], strides = [1, 1]} : vector<2x16xf32> to vector<2x5xf32>
    %27 = vector.extract_strided_slice %24 {offsets = [0, 0], sizes = [2, 11], strides = [1, 1]} : vector<2x16xf32> to vector<2x11xf32>
    %28 = tpu.concatenate %26, %27 in 1 : vector<2x5xf32>, vector<2x11xf32> -> vector<2x16xf32>
    %29 = vector.extract_strided_slice %16 {offsets = [0, 0], sizes = [1, 16], strides = [1, 1]} : vector<9x16xf32> to vector<1x16xf32>
    %30 = vector.broadcast %29 : vector<1x16xf32> to vector<2x16xf32>
    %31 = arith.mulf %28, %30 : vector<2x16xf32>
    %c0_13 = arith.constant 0 : index
    %c0_14 = arith.constant 0 : index
    %c0_15 = arith.constant 0 : index
    %32 = vector.load %arg6[%c0_13, %c0_14, %c0_15] : memref<9x2x2xbf16, #tpu.memory_space<vmem>>, vector<1x2x2xbf16>
    %33 = vector.shape_cast %32 : vector<1x2x2xbf16> to vector<2x2xbf16>
    %34 = arith.truncf %31 : vector<2x16xf32> to vector<2x16xbf16>
    %cst_16 = arith.constant dense<0.000000e+00> : vector<2x16xf32>
    %35 = tpu.matmul %33, %34, %cst_16 {dimension_numbers = #tpu.dot_dimension_numbers<[1], [0], [0], [1], [0, 0, 1, 1], [], []>} : vector<2x2xbf16>, vector<2x16xbf16>, vector<2x16xf32> -> vector<2x16xf32>
    %36 = arith.addf %25, %35 : vector<2x16xf32>
    %37 = vector.extract_strided_slice %24 {offsets = [0, 12], sizes = [2, 4], strides = [1, 1]} : vector<2x16xf32> to vector<2x4xf32>
    %38 = vector.extract_strided_slice %24 {offsets = [0, 0], sizes = [2, 12], strides = [1, 1]} : vector<2x16xf32> to vector<2x12xf32>
    %39 = tpu.concatenate %37, %38 in 1 : vector<2x4xf32>, vector<2x12xf32> -> vector<2x16xf32>
    %40 = vector.extract_strided_slice %16 {offsets = [1, 0], sizes = [1, 16], strides = [1, 1]} : vector<9x16xf32> to vector<1x16xf32>
    %41 = vector.broadcast %40 : vector<1x16xf32> to vector<2x16xf32>
    %42 = arith.mulf %39, %41 : vector<2x16xf32>
    %c1 = arith.constant 1 : index
    %c0_17 = arith.constant 0 : index
    %c0_18 = arith.constant 0 : index
    %43 = vector.load %arg6[%c1, %c0_17, %c0_18] : memref<9x2x2xbf16, #tpu.memory_space<vmem>>, vector<1x2x2xbf16>
    %44 = vector.shape_cast %43 : vector<1x2x2xbf16> to vector<2x2xbf16>
    %45 = arith.truncf %42 : vector<2x16xf32> to vector<2x16xbf16>
    %cst_19 = arith.constant dense<0.000000e+00> : vector<2x16xf32>
    %46 = tpu.matmul %44, %45, %cst_19 {dimension_numbers = #tpu.dot_dimension_numbers<[1], [0], [0], [1], [0, 0, 1, 1], [], []>} : vector<2x2xbf16>, vector<2x16xbf16>, vector<2x16xf32> -> vector<2x16xf32>
    %47 = arith.addf %36, %46 : vector<2x16xf32>
    %48 = vector.extract_strided_slice %24 {offsets = [0, 13], sizes = [2, 3], strides = [1, 1]} : vector<2x16xf32> to vector<2x3xf32>
    %49 = vector.extract_strided_slice %24 {offsets = [0, 0], sizes = [2, 13], strides = [1, 1]} : vector<2x16xf32> to vector<2x13xf32>
    %50 = tpu.concatenate %48, %49 in 1 : vector<2x3xf32>, vector<2x13xf32> -> vector<2x16xf32>
    %51 = vector.extract_strided_slice %16 {offsets = [2, 0], sizes = [1, 16], strides = [1, 1]} : vector<9x16xf32> to vector<1x16xf32>
    %52 = vector.broadcast %51 : vector<1x16xf32> to vector<2x16xf32>
    %53 = arith.mulf %50, %52 : vector<2x16xf32>
    %c2 = arith.constant 2 : index
    %c0_20 = arith.constant 0 : index
    %c0_21 = arith.constant 0 : index
    %54 = vector.load %arg6[%c2, %c0_20, %c0_21] : memref<9x2x2xbf16, #tpu.memory_space<vmem>>, vector<1x2x2xbf16>
    %55 = vector.shape_cast %54 : vector<1x2x2xbf16> to vector<2x2xbf16>
    %56 = arith.truncf %53 : vector<2x16xf32> to vector<2x16xbf16>
    %cst_22 = arith.constant dense<0.000000e+00> : vector<2x16xf32>
    %57 = tpu.matmul %55, %56, %cst_22 {dimension_numbers = #tpu.dot_dimension_numbers<[1], [0], [0], [1], [0, 0, 1, 1], [], []>} : vector<2x2xbf16>, vector<2x16xbf16>, vector<2x16xf32> -> vector<2x16xf32>
    %58 = arith.addf %47, %57 : vector<2x16xf32>
    %59 = vector.extract_strided_slice %24 {offsets = [0, 15], sizes = [2, 1], strides = [1, 1]} : vector<2x16xf32> to vector<2x1xf32>
    %60 = vector.extract_strided_slice %24 {offsets = [0, 0], sizes = [2, 15], strides = [1, 1]} : vector<2x16xf32> to vector<2x15xf32>
    %61 = tpu.concatenate %59, %60 in 1 : vector<2x1xf32>, vector<2x15xf32> -> vector<2x16xf32>
    %62 = vector.extract_strided_slice %16 {offsets = [3, 0], sizes = [1, 16], strides = [1, 1]} : vector<9x16xf32> to vector<1x16xf32>
    %63 = vector.broadcast %62 : vector<1x16xf32> to vector<2x16xf32>
    %64 = arith.mulf %61, %63 : vector<2x16xf32>
    %c3 = arith.constant 3 : index
    %c0_23 = arith.constant 0 : index
    %c0_24 = arith.constant 0 : index
    %65 = vector.load %arg6[%c3, %c0_23, %c0_24] : memref<9x2x2xbf16, #tpu.memory_space<vmem>>, vector<1x2x2xbf16>
    %66 = vector.shape_cast %65 : vector<1x2x2xbf16> to vector<2x2xbf16>
    %67 = arith.truncf %64 : vector<2x16xf32> to vector<2x16xbf16>
    %cst_25 = arith.constant dense<0.000000e+00> : vector<2x16xf32>
    %68 = tpu.matmul %66, %67, %cst_25 {dimension_numbers = #tpu.dot_dimension_numbers<[1], [0], [0], [1], [0, 0, 1, 1], [], []>} : vector<2x2xbf16>, vector<2x16xbf16>, vector<2x16xf32> -> vector<2x16xf32>
    %69 = arith.addf %58, %68 : vector<2x16xf32>
    %70 = vector.extract_strided_slice %16 {offsets = [4, 0], sizes = [1, 16], strides = [1, 1]} : vector<9x16xf32> to vector<1x16xf32>
    %71 = vector.broadcast %70 : vector<1x16xf32> to vector<2x16xf32>
    %72 = arith.mulf %24, %71 : vector<2x16xf32>
    %c4 = arith.constant 4 : index
    %c0_26 = arith.constant 0 : index
    %c0_27 = arith.constant 0 : index
    %73 = vector.load %arg6[%c4, %c0_26, %c0_27] : memref<9x2x2xbf16, #tpu.memory_space<vmem>>, vector<1x2x2xbf16>
    %74 = vector.shape_cast %73 : vector<1x2x2xbf16> to vector<2x2xbf16>
    %75 = arith.truncf %72 : vector<2x16xf32> to vector<2x16xbf16>
    %cst_28 = arith.constant dense<0.000000e+00> : vector<2x16xf32>
    %76 = tpu.matmul %74, %75, %cst_28 {dimension_numbers = #tpu.dot_dimension_numbers<[1], [0], [0], [1], [0, 0, 1, 1], [], []>} : vector<2x2xbf16>, vector<2x16xbf16>, vector<2x16xf32> -> vector<2x16xf32>
    %77 = arith.addf %69, %76 : vector<2x16xf32>
    %78 = vector.extract_strided_slice %24 {offsets = [0, 1], sizes = [2, 15], strides = [1, 1]} : vector<2x16xf32> to vector<2x15xf32>
    %79 = vector.extract_strided_slice %24 {offsets = [0, 0], sizes = [2, 1], strides = [1, 1]} : vector<2x16xf32> to vector<2x1xf32>
    %80 = tpu.concatenate %78, %79 in 1 : vector<2x15xf32>, vector<2x1xf32> -> vector<2x16xf32>
    %81 = vector.extract_strided_slice %16 {offsets = [5, 0], sizes = [1, 16], strides = [1, 1]} : vector<9x16xf32> to vector<1x16xf32>
    %82 = vector.broadcast %81 : vector<1x16xf32> to vector<2x16xf32>
    %83 = arith.mulf %80, %82 : vector<2x16xf32>
    %c5 = arith.constant 5 : index
    %c0_29 = arith.constant 0 : index
    %c0_30 = arith.constant 0 : index
    %84 = vector.load %arg6[%c5, %c0_29, %c0_30] : memref<9x2x2xbf16, #tpu.memory_space<vmem>>, vector<1x2x2xbf16>
    %85 = vector.shape_cast %84 : vector<1x2x2xbf16> to vector<2x2xbf16>
    %86 = arith.truncf %83 : vector<2x16xf32> to vector<2x16xbf16>
    %cst_31 = arith.constant dense<0.000000e+00> : vector<2x16xf32>
    %87 = tpu.matmul %85, %86, %cst_31 {dimension_numbers = #tpu.dot_dimension_numbers<[1], [0], [0], [1], [0, 0, 1, 1], [], []>} : vector<2x2xbf16>, vector<2x16xbf16>, vector<2x16xf32> -> vector<2x16xf32>
    %88 = arith.addf %77, %87 : vector<2x16xf32>
    %89 = vector.extract_strided_slice %24 {offsets = [0, 3], sizes = [2, 13], strides = [1, 1]} : vector<2x16xf32> to vector<2x13xf32>
    %90 = vector.extract_strided_slice %24 {offsets = [0, 0], sizes = [2, 3], strides = [1, 1]} : vector<2x16xf32> to vector<2x3xf32>
    %91 = tpu.concatenate %89, %90 in 1 : vector<2x13xf32>, vector<2x3xf32> -> vector<2x16xf32>
    %92 = vector.extract_strided_slice %16 {offsets = [6, 0], sizes = [1, 16], strides = [1, 1]} : vector<9x16xf32> to vector<1x16xf32>
    %93 = vector.broadcast %92 : vector<1x16xf32> to vector<2x16xf32>
    %94 = arith.mulf %91, %93 : vector<2x16xf32>
    %c6 = arith.constant 6 : index
    %c0_32 = arith.constant 0 : index
    %c0_33 = arith.constant 0 : index
    %95 = vector.load %arg6[%c6, %c0_32, %c0_33] : memref<9x2x2xbf16, #tpu.memory_space<vmem>>, vector<1x2x2xbf16>
    %96 = vector.shape_cast %95 : vector<1x2x2xbf16> to vector<2x2xbf16>
    %97 = arith.truncf %94 : vector<2x16xf32> to vector<2x16xbf16>
    %cst_34 = arith.constant dense<0.000000e+00> : vector<2x16xf32>
    %98 = tpu.matmul %96, %97, %cst_34 {dimension_numbers = #tpu.dot_dimension_numbers<[1], [0], [0], [1], [0, 0, 1, 1], [], []>} : vector<2x2xbf16>, vector<2x16xbf16>, vector<2x16xf32> -> vector<2x16xf32>
    %99 = arith.addf %88, %98 : vector<2x16xf32>
    %100 = vector.extract_strided_slice %24 {offsets = [0, 4], sizes = [2, 12], strides = [1, 1]} : vector<2x16xf32> to vector<2x12xf32>
    %101 = vector.extract_strided_slice %24 {offsets = [0, 0], sizes = [2, 4], strides = [1, 1]} : vector<2x16xf32> to vector<2x4xf32>
    %102 = tpu.concatenate %100, %101 in 1 : vector<2x12xf32>, vector<2x4xf32> -> vector<2x16xf32>
    %103 = vector.extract_strided_slice %16 {offsets = [7, 0], sizes = [1, 16], strides = [1, 1]} : vector<9x16xf32> to vector<1x16xf32>
    %104 = vector.broadcast %103 : vector<1x16xf32> to vector<2x16xf32>
    %105 = arith.mulf %102, %104 : vector<2x16xf32>
    %c7 = arith.constant 7 : index
    %c0_35 = arith.constant 0 : index
    %c0_36 = arith.constant 0 : index
    %106 = vector.load %arg6[%c7, %c0_35, %c0_36] : memref<9x2x2xbf16, #tpu.memory_space<vmem>>, vector<1x2x2xbf16>
    %107 = vector.shape_cast %106 : vector<1x2x2xbf16> to vector<2x2xbf16>
    %108 = arith.truncf %105 : vector<2x16xf32> to vector<2x16xbf16>
    %cst_37 = arith.constant dense<0.000000e+00> : vector<2x16xf32>
    %109 = tpu.matmul %107, %108, %cst_37 {dimension_numbers = #tpu.dot_dimension_numbers<[1], [0], [0], [1], [0, 0, 1, 1], [], []>} : vector<2x2xbf16>, vector<2x16xbf16>, vector<2x16xf32> -> vector<2x16xf32>
    %110 = arith.addf %99, %109 : vector<2x16xf32>
    %111 = vector.extract_strided_slice %24 {offsets = [0, 5], sizes = [2, 11], strides = [1, 1]} : vector<2x16xf32> to vector<2x11xf32>
    %112 = vector.extract_strided_slice %24 {offsets = [0, 0], sizes = [2, 5], strides = [1, 1]} : vector<2x16xf32> to vector<2x5xf32>
    %113 = tpu.concatenate %111, %112 in 1 : vector<2x11xf32>, vector<2x5xf32> -> vector<2x16xf32>
    %114 = vector.extract_strided_slice %16 {offsets = [8, 0], sizes = [1, 16], strides = [1, 1]} : vector<9x16xf32> to vector<1x16xf32>
    %115 = vector.broadcast %114 : vector<1x16xf32> to vector<2x16xf32>
    %116 = arith.mulf %113, %115 : vector<2x16xf32>
    %c8 = arith.constant 8 : index
    %c0_38 = arith.constant 0 : index
    %c0_39 = arith.constant 0 : index
    %117 = vector.load %arg6[%c8, %c0_38, %c0_39] : memref<9x2x2xbf16, #tpu.memory_space<vmem>>, vector<1x2x2xbf16>
    %118 = vector.shape_cast %117 : vector<1x2x2xbf16> to vector<2x2xbf16>
    %119 = arith.truncf %116 : vector<2x16xf32> to vector<2x16xbf16>
    %cst_40 = arith.constant dense<0.000000e+00> : vector<2x16xf32>
    %120 = tpu.matmul %118, %119, %cst_40 {dimension_numbers = #tpu.dot_dimension_numbers<[1], [0], [0], [1], [0, 0, 1, 1], [], []>} : vector<2x2xbf16>, vector<2x16xbf16>, vector<2x16xf32> -> vector<2x16xf32>
    %121 = arith.addf %110, %120 : vector<2x16xf32>
    %c0_41 = arith.constant 0 : index
    %c0_42 = arith.constant 0 : index
    %122 = vector.load %arg7[%c0_41, %c0_42] : memref<2x1xf32, #tpu.memory_space<vmem>>, vector<2x1xf32>
    %123 = vector.broadcast %122 : vector<2x1xf32> to vector<2x16xf32>
    %124 = arith.addf %121, %123 : vector<2x16xf32>
    %cst_43 = arith.constant 0.000000e+00 : f32
    %125 = vector.broadcast %cst_43 : f32 to vector<2x16xf32>
    %126 = arith.maximumf %124, %125 : vector<2x16xf32>
    %c0_44 = arith.constant 0 : index
    %c0_45 = arith.constant 0 : index
    %127 = vector.load %arg8[%c0_44, %c0_45] : memref<4x2xbf16, #tpu.memory_space<vmem>>, vector<4x2xbf16>
    %128 = arith.truncf %126 : vector<2x16xf32> to vector<2x16xbf16>
    %cst_46 = arith.constant dense<0.000000e+00> : vector<4x16xf32>
    %129 = tpu.matmul %127, %128, %cst_46 {dimension_numbers = #tpu.dot_dimension_numbers<[1], [0], [0], [1], [0, 0, 1, 1], [], []>} : vector<4x2xbf16>, vector<2x16xbf16>, vector<4x16xf32> -> vector<4x16xf32>
    %130 = arith.addf %15, %129 : vector<4x16xf32>
    %c0_47 = arith.constant 0 : index
    %c0_48 = arith.constant 0 : index
    %131 = vector.load %arg9[%c0_47, %c0_48] : memref<4x1xf32, #tpu.memory_space<vmem>>, vector<4x1xf32>
    %132 = vector.broadcast %131 : vector<4x1xf32> to vector<4x16xf32>
    %133 = arith.addf %130, %132 : vector<4x16xf32>
    %c0_49 = arith.constant 0 : index
    %c0_50 = arith.constant 0 : index
    %c0_51 = arith.constant 0 : index
    %134 = vector.load %arg10[%c0_49, %c0_50, %c0_51] : memref<1x4x16xf32, #tpu.memory_space<vmem>>, vector<1x4x16xf32>
    %135 = vector.shape_cast %134 : vector<1x4x16xf32> to vector<4x16xf32>
    %136 = vector.shape_cast %133 : vector<4x16xf32> to vector<1x4x16xf32>
    tpu.vector_store %arg10[%c0_49, %c0_50, %c0_51], %136 {strides = array<i32>} : memref<1x4x16xf32, #tpu.memory_space<vmem>>, vector<1x4x16xf32>,
    return
  }
  func.func @transform_0(%arg0: i32) -> (i32, i32, i32) {
    %c0_i32 = arith.constant 0 : i32
    %c0_i32_0 = arith.constant 0 : i32
    %c0_i32_1 = arith.constant 0 : i32
    return %arg0, %c0_i32, %c0_i32_0 : i32, i32, i32
  }
  func.func @transform_1(%arg0: i32) -> (i32, i32) {
    %c0_i32 = arith.constant 0 : i32
    %c0_i32_0 = arith.constant 0 : i32
    %c0_i32_1 = arith.constant 0 : i32
    return %c0_i32, %c0_i32_0 : i32, i32
  }
  func.func @transform_2(%arg0: i32) -> (i32, i32) {
    %c0_i32 = arith.constant 0 : i32
    %c0_i32_0 = arith.constant 0 : i32
    %c0_i32_1 = arith.constant 0 : i32
    return %c0_i32, %c0_i32_0 : i32, i32
  }
  func.func @transform_3(%arg0: i32) -> (i32, i32) {
    %c0_i32 = arith.constant 0 : i32
    %c0_i32_0 = arith.constant 0 : i32
    %c0_i32_1 = arith.constant 0 : i32
    return %c0_i32, %c0_i32_0 : i32, i32
  }
  func.func @transform_4(%arg0: i32) -> (i32, i32) {
    %c0_i32 = arith.constant 0 : i32
    %c0_i32_0 = arith.constant 0 : i32
    %c0_i32_1 = arith.constant 0 : i32
    return %c0_i32, %c0_i32_0 : i32, i32
  }
  func.func @transform_5(%arg0: i32) -> (i32, i32, i32) {
    %c0_i32 = arith.constant 0 : i32
    %c0_i32_0 = arith.constant 0 : i32
    %c0_i32_1 = arith.constant 0 : i32
    %c0_i32_2 = arith.constant 0 : i32
    return %c0_i32, %c0_i32_0, %c0_i32_1 : i32, i32, i32
  }
  func.func @transform_6(%arg0: i32) -> (i32, i32) {
    %c0_i32 = arith.constant 0 : i32
    %c0_i32_0 = arith.constant 0 : i32
    %c0_i32_1 = arith.constant 0 : i32
    return %c0_i32, %c0_i32_0 : i32, i32
  }
  func.func @transform_7(%arg0: i32) -> (i32, i32) {
    %c0_i32 = arith.constant 0 : i32
    %c0_i32_0 = arith.constant 0 : i32
    %c0_i32_1 = arith.constant 0 : i32
    return %c0_i32, %c0_i32_0 : i32, i32
  }
  func.func @transform_8(%arg0: i32) -> (i32, i32) {
    %c0_i32 = arith.constant 0 : i32
    %c0_i32_0 = arith.constant 0 : i32
    %c0_i32_1 = arith.constant 0 : i32
    return %c0_i32, %c0_i32_0 : i32, i32
  }
  func.func @transform_9(%arg0: i32) -> (i32, i32, i32) {
    %c0_i32 = arith.constant 0 : i32
    %c0_i32_0 = arith.constant 0 : i32
    %c0_i32_1 = arith.constant 0 : i32
    return %arg0, %c0_i32, %c0_i32_0 : i32, i32, i32
  }
}

module attributes {stable_mosaic.version = 11 : i64} {
  func.func @_fused_block_kernel(%arg0: i32, %arg1: memref<1x4x256xf32, #tpu.memory_space<vmem>>, %arg2: memref<9x256xf32, #tpu.memory_space<vmem>>, %arg3: memref<2x4xbf16, #tpu.memory_space<vmem>>, %arg4: memref<2x1xf32, #tpu.memory_space<vmem>>, %arg5: memref<9x2x2xbf16, #tpu.memory_space<vmem>>, %arg6: memref<2x1xf32, #tpu.memory_space<vmem>>, %arg7: memref<4x2xbf16, #tpu.memory_space<vmem>>, %arg8: memref<4x1xf32, #tpu.memory_space<vmem>>, %arg9: memref<1x4x256xf32, #tpu.memory_space<vmem>>) attributes {dimension_semantics = [#tpu.dimension_semantics<parallel>], iteration_bounds = array<i64: 2>, scalar_prefetch = 0 : i64, scratch_operands = 0 : i64, tpu.core_type = #tpu.core_type<tc>, window_params = [{transform_indices = @transform_0, window_bounds = array<i64: 1, 4, 256>}, {pipeline_mode = #tpu.pipeline_mode<synchronous>, transform_indices = @transform_1, window_bounds = array<i64: 9, 256>}, {pipeline_mode = #tpu.pipeline_mode<synchronous>, transform_indices = @transform_2, window_bounds = array<i64: 2, 4>}, {pipeline_mode = #tpu.pipeline_mode<synchronous>, transform_indices = @transform_3, window_bounds = array<i64: 2, 1>}, {pipeline_mode = #tpu.pipeline_mode<synchronous>, transform_indices = @transform_4, window_bounds = array<i64: 9, 2, 2>}, {pipeline_mode = #tpu.pipeline_mode<synchronous>, transform_indices = @transform_5, window_bounds = array<i64: 2, 1>}, {pipeline_mode = #tpu.pipeline_mode<synchronous>, transform_indices = @transform_6, window_bounds = array<i64: 4, 2>}, {pipeline_mode = #tpu.pipeline_mode<synchronous>, transform_indices = @transform_7, window_bounds = array<i64: 4, 1>}, {transform_indices = @transform_8, window_bounds = array<i64: 1, 4, 256>}]} {
    %c0 = arith.constant 0 : index
    %c0_0 = arith.constant 0 : index
    %c0_1 = arith.constant 0 : index
    %0 = vector.load %arg1[%c0, %c0_0, %c0_1] : memref<1x4x256xf32, #tpu.memory_space<vmem>>, vector<1x4x256xf32>
    %1 = vector.shape_cast %0 : vector<1x4x256xf32> to vector<4x256xf32>
    %c0_2 = arith.constant 0 : index
    %c0_3 = arith.constant 0 : index
    %2 = vector.load %arg2[%c0_2, %c0_3] : memref<9x256xf32, #tpu.memory_space<vmem>>, vector<9x256xf32>
    %c0_4 = arith.constant 0 : index
    %c0_5 = arith.constant 0 : index
    %3 = vector.load %arg3[%c0_4, %c0_5] : memref<2x4xbf16, #tpu.memory_space<vmem>>, vector<2x4xbf16>
    %4 = arith.truncf %1 : vector<4x256xf32> to vector<4x256xbf16>
    %cst = arith.constant dense<0.000000e+00> : vector<2x256xf32>
    %5 = tpu.matmul %3, %4, %cst {dimension_numbers = #tpu.dot_dimension_numbers<[1], [0], [0], [1], [0, 0, 1, 1], [], []>} : vector<2x4xbf16>, vector<4x256xbf16>, vector<2x256xf32> -> vector<2x256xf32>
    %c0_6 = arith.constant 0 : index
    %c0_7 = arith.constant 0 : index
    %6 = vector.load %arg4[%c0_6, %c0_7] : memref<2x1xf32, #tpu.memory_space<vmem>>, vector<2x1xf32>
    %7 = vector.broadcast %6 : vector<2x1xf32> to vector<2x256xf32>
    %8 = arith.addf %5, %7 : vector<2x256xf32>
    %cst_8 = arith.constant 0.000000e+00 : f32
    %9 = vector.broadcast %cst_8 : f32 to vector<2x256xf32>
    %10 = arith.maximumf %8, %9 : vector<2x256xf32>
    %cst_9 = arith.constant 0.000000e+00 : f32
    %11 = vector.broadcast %cst_9 : f32 to vector<2x256xf32>
    %12 = vector.extract_strided_slice %10 {offsets = [0, 239], sizes = [2, 17], strides = [1, 1]} : vector<2x256xf32> to vector<2x17xf32>
    %13 = vector.extract_strided_slice %10 {offsets = [0, 0], sizes = [2, 239], strides = [1, 1]} : vector<2x256xf32> to vector<2x239xf32>
    %14 = tpu.concatenate %12, %13 in 1 : vector<2x17xf32>, vector<2x239xf32> -> vector<2x256xf32>
    %15 = vector.extract_strided_slice %2 {offsets = [0, 0], sizes = [1, 256], strides = [1, 1]} : vector<9x256xf32> to vector<1x256xf32>
    %16 = vector.broadcast %15 : vector<1x256xf32> to vector<2x256xf32>
    %17 = arith.mulf %14, %16 : vector<2x256xf32>
    %c0_10 = arith.constant 0 : index
    %c0_11 = arith.constant 0 : index
    %c0_12 = arith.constant 0 : index
    %18 = vector.load %arg5[%c0_10, %c0_11, %c0_12] : memref<9x2x2xbf16, #tpu.memory_space<vmem>>, vector<1x2x2xbf16>
    %19 = vector.shape_cast %18 : vector<1x2x2xbf16> to vector<2x2xbf16>
    %20 = arith.truncf %17 : vector<2x256xf32> to vector<2x256xbf16>
    %cst_13 = arith.constant dense<0.000000e+00> : vector<2x256xf32>
    %21 = tpu.matmul %19, %20, %cst_13 {dimension_numbers = #tpu.dot_dimension_numbers<[1], [0], [0], [1], [0, 0, 1, 1], [], []>} : vector<2x2xbf16>, vector<2x256xbf16>, vector<2x256xf32> -> vector<2x256xf32>
    %22 = arith.addf %11, %21 : vector<2x256xf32>
    %23 = vector.extract_strided_slice %10 {offsets = [0, 240], sizes = [2, 16], strides = [1, 1]} : vector<2x256xf32> to vector<2x16xf32>
    %24 = vector.extract_strided_slice %10 {offsets = [0, 0], sizes = [2, 240], strides = [1, 1]} : vector<2x256xf32> to vector<2x240xf32>
    %25 = tpu.concatenate %23, %24 in 1 : vector<2x16xf32>, vector<2x240xf32> -> vector<2x256xf32>
    %26 = vector.extract_strided_slice %2 {offsets = [1, 0], sizes = [1, 256], strides = [1, 1]} : vector<9x256xf32> to vector<1x256xf32>
    %27 = vector.broadcast %26 : vector<1x256xf32> to vector<2x256xf32>
    %28 = arith.mulf %25, %27 : vector<2x256xf32>
    %c1 = arith.constant 1 : index
    %c0_14 = arith.constant 0 : index
    %c0_15 = arith.constant 0 : index
    %29 = vector.load %arg5[%c1, %c0_14, %c0_15] : memref<9x2x2xbf16, #tpu.memory_space<vmem>>, vector<1x2x2xbf16>
    %30 = vector.shape_cast %29 : vector<1x2x2xbf16> to vector<2x2xbf16>
    %31 = arith.truncf %28 : vector<2x256xf32> to vector<2x256xbf16>
    %cst_16 = arith.constant dense<0.000000e+00> : vector<2x256xf32>
    %32 = tpu.matmul %30, %31, %cst_16 {dimension_numbers = #tpu.dot_dimension_numbers<[1], [0], [0], [1], [0, 0, 1, 1], [], []>} : vector<2x2xbf16>, vector<2x256xbf16>, vector<2x256xf32> -> vector<2x256xf32>
    %33 = arith.addf %22, %32 : vector<2x256xf32>
    %34 = vector.extract_strided_slice %10 {offsets = [0, 241], sizes = [2, 15], strides = [1, 1]} : vector<2x256xf32> to vector<2x15xf32>
    %35 = vector.extract_strided_slice %10 {offsets = [0, 0], sizes = [2, 241], strides = [1, 1]} : vector<2x256xf32> to vector<2x241xf32>
    %36 = tpu.concatenate %34, %35 in 1 : vector<2x15xf32>, vector<2x241xf32> -> vector<2x256xf32>
    %37 = vector.extract_strided_slice %2 {offsets = [2, 0], sizes = [1, 256], strides = [1, 1]} : vector<9x256xf32> to vector<1x256xf32>
    %38 = vector.broadcast %37 : vector<1x256xf32> to vector<2x256xf32>
    %39 = arith.mulf %36, %38 : vector<2x256xf32>
    %c2 = arith.constant 2 : index
    %c0_17 = arith.constant 0 : index
    %c0_18 = arith.constant 0 : index
    %40 = vector.load %arg5[%c2, %c0_17, %c0_18] : memref<9x2x2xbf16, #tpu.memory_space<vmem>>, vector<1x2x2xbf16>
    %41 = vector.shape_cast %40 : vector<1x2x2xbf16> to vector<2x2xbf16>
    %42 = arith.truncf %39 : vector<2x256xf32> to vector<2x256xbf16>
    %cst_19 = arith.constant dense<0.000000e+00> : vector<2x256xf32>
    %43 = tpu.matmul %41, %42, %cst_19 {dimension_numbers = #tpu.dot_dimension_numbers<[1], [0], [0], [1], [0, 0, 1, 1], [], []>} : vector<2x2xbf16>, vector<2x256xbf16>, vector<2x256xf32> -> vector<2x256xf32>
    %44 = arith.addf %33, %43 : vector<2x256xf32>
    %45 = vector.extract_strided_slice %10 {offsets = [0, 255], sizes = [2, 1], strides = [1, 1]} : vector<2x256xf32> to vector<2x1xf32>
    %46 = vector.extract_strided_slice %10 {offsets = [0, 0], sizes = [2, 255], strides = [1, 1]} : vector<2x256xf32> to vector<2x255xf32>
    %47 = tpu.concatenate %45, %46 in 1 : vector<2x1xf32>, vector<2x255xf32> -> vector<2x256xf32>
    %48 = vector.extract_strided_slice %2 {offsets = [3, 0], sizes = [1, 256], strides = [1, 1]} : vector<9x256xf32> to vector<1x256xf32>
    %49 = vector.broadcast %48 : vector<1x256xf32> to vector<2x256xf32>
    %50 = arith.mulf %47, %49 : vector<2x256xf32>
    %c3 = arith.constant 3 : index
    %c0_20 = arith.constant 0 : index
    %c0_21 = arith.constant 0 : index
    %51 = vector.load %arg5[%c3, %c0_20, %c0_21] : memref<9x2x2xbf16, #tpu.memory_space<vmem>>, vector<1x2x2xbf16>
    %52 = vector.shape_cast %51 : vector<1x2x2xbf16> to vector<2x2xbf16>
    %53 = arith.truncf %50 : vector<2x256xf32> to vector<2x256xbf16>
    %cst_22 = arith.constant dense<0.000000e+00> : vector<2x256xf32>
    %54 = tpu.matmul %52, %53, %cst_22 {dimension_numbers = #tpu.dot_dimension_numbers<[1], [0], [0], [1], [0, 0, 1, 1], [], []>} : vector<2x2xbf16>, vector<2x256xbf16>, vector<2x256xf32> -> vector<2x256xf32>
    %55 = arith.addf %44, %54 : vector<2x256xf32>
    %56 = vector.extract_strided_slice %2 {offsets = [4, 0], sizes = [1, 256], strides = [1, 1]} : vector<9x256xf32> to vector<1x256xf32>
    %57 = vector.broadcast %56 : vector<1x256xf32> to vector<2x256xf32>
    %58 = arith.mulf %10, %57 : vector<2x256xf32>
    %c4 = arith.constant 4 : index
    %c0_23 = arith.constant 0 : index
    %c0_24 = arith.constant 0 : index
    %59 = vector.load %arg5[%c4, %c0_23, %c0_24] : memref<9x2x2xbf16, #tpu.memory_space<vmem>>, vector<1x2x2xbf16>
    %60 = vector.shape_cast %59 : vector<1x2x2xbf16> to vector<2x2xbf16>
    %61 = arith.truncf %58 : vector<2x256xf32> to vector<2x256xbf16>
    %cst_25 = arith.constant dense<0.000000e+00> : vector<2x256xf32>
    %62 = tpu.matmul %60, %61, %cst_25 {dimension_numbers = #tpu.dot_dimension_numbers<[1], [0], [0], [1], [0, 0, 1, 1], [], []>} : vector<2x2xbf16>, vector<2x256xbf16>, vector<2x256xf32> -> vector<2x256xf32>
    %63 = arith.addf %55, %62 : vector<2x256xf32>
    %64 = vector.extract_strided_slice %10 {offsets = [0, 1], sizes = [2, 255], strides = [1, 1]} : vector<2x256xf32> to vector<2x255xf32>
    %65 = vector.extract_strided_slice %10 {offsets = [0, 0], sizes = [2, 1], strides = [1, 1]} : vector<2x256xf32> to vector<2x1xf32>
    %66 = tpu.concatenate %64, %65 in 1 : vector<2x255xf32>, vector<2x1xf32> -> vector<2x256xf32>
    %67 = vector.extract_strided_slice %2 {offsets = [5, 0], sizes = [1, 256], strides = [1, 1]} : vector<9x256xf32> to vector<1x256xf32>
    %68 = vector.broadcast %67 : vector<1x256xf32> to vector<2x256xf32>
    %69 = arith.mulf %66, %68 : vector<2x256xf32>
    %c5 = arith.constant 5 : index
    %c0_26 = arith.constant 0 : index
    %c0_27 = arith.constant 0 : index
    %70 = vector.load %arg5[%c5, %c0_26, %c0_27] : memref<9x2x2xbf16, #tpu.memory_space<vmem>>, vector<1x2x2xbf16>
    %71 = vector.shape_cast %70 : vector<1x2x2xbf16> to vector<2x2xbf16>
    %72 = arith.truncf %69 : vector<2x256xf32> to vector<2x256xbf16>
    %cst_28 = arith.constant dense<0.000000e+00> : vector<2x256xf32>
    %73 = tpu.matmul %71, %72, %cst_28 {dimension_numbers = #tpu.dot_dimension_numbers<[1], [0], [0], [1], [0, 0, 1, 1], [], []>} : vector<2x2xbf16>, vector<2x256xbf16>, vector<2x256xf32> -> vector<2x256xf32>
    %74 = arith.addf %63, %73 : vector<2x256xf32>
    %75 = vector.extract_strided_slice %10 {offsets = [0, 15], sizes = [2, 241], strides = [1, 1]} : vector<2x256xf32> to vector<2x241xf32>
    %76 = vector.extract_strided_slice %10 {offsets = [0, 0], sizes = [2, 15], strides = [1, 1]} : vector<2x256xf32> to vector<2x15xf32>
    %77 = tpu.concatenate %75, %76 in 1 : vector<2x241xf32>, vector<2x15xf32> -> vector<2x256xf32>
    %78 = vector.extract_strided_slice %2 {offsets = [6, 0], sizes = [1, 256], strides = [1, 1]} : vector<9x256xf32> to vector<1x256xf32>
    %79 = vector.broadcast %78 : vector<1x256xf32> to vector<2x256xf32>
    %80 = arith.mulf %77, %79 : vector<2x256xf32>
    %c6 = arith.constant 6 : index
    %c0_29 = arith.constant 0 : index
    %c0_30 = arith.constant 0 : index
    %81 = vector.load %arg5[%c6, %c0_29, %c0_30] : memref<9x2x2xbf16, #tpu.memory_space<vmem>>, vector<1x2x2xbf16>
    %82 = vector.shape_cast %81 : vector<1x2x2xbf16> to vector<2x2xbf16>
    %83 = arith.truncf %80 : vector<2x256xf32> to vector<2x256xbf16>
    %cst_31 = arith.constant dense<0.000000e+00> : vector<2x256xf32>
    %84 = tpu.matmul %82, %83, %cst_31 {dimension_numbers = #tpu.dot_dimension_numbers<[1], [0], [0], [1], [0, 0, 1, 1], [], []>} : vector<2x2xbf16>, vector<2x256xbf16>, vector<2x256xf32> -> vector<2x256xf32>
    %85 = arith.addf %74, %84 : vector<2x256xf32>
    %86 = vector.extract_strided_slice %10 {offsets = [0, 16], sizes = [2, 240], strides = [1, 1]} : vector<2x256xf32> to vector<2x240xf32>
    %87 = vector.extract_strided_slice %10 {offsets = [0, 0], sizes = [2, 16], strides = [1, 1]} : vector<2x256xf32> to vector<2x16xf32>
    %88 = tpu.concatenate %86, %87 in 1 : vector<2x240xf32>, vector<2x16xf32> -> vector<2x256xf32>
    %89 = vector.extract_strided_slice %2 {offsets = [7, 0], sizes = [1, 256], strides = [1, 1]} : vector<9x256xf32> to vector<1x256xf32>
    %90 = vector.broadcast %89 : vector<1x256xf32> to vector<2x256xf32>
    %91 = arith.mulf %88, %90 : vector<2x256xf32>
    %c7 = arith.constant 7 : index
    %c0_32 = arith.constant 0 : index
    %c0_33 = arith.constant 0 : index
    %92 = vector.load %arg5[%c7, %c0_32, %c0_33] : memref<9x2x2xbf16, #tpu.memory_space<vmem>>, vector<1x2x2xbf16>
    %93 = vector.shape_cast %92 : vector<1x2x2xbf16> to vector<2x2xbf16>
    %94 = arith.truncf %91 : vector<2x256xf32> to vector<2x256xbf16>
    %cst_34 = arith.constant dense<0.000000e+00> : vector<2x256xf32>
    %95 = tpu.matmul %93, %94, %cst_34 {dimension_numbers = #tpu.dot_dimension_numbers<[1], [0], [0], [1], [0, 0, 1, 1], [], []>} : vector<2x2xbf16>, vector<2x256xbf16>, vector<2x256xf32> -> vector<2x256xf32>
    %96 = arith.addf %85, %95 : vector<2x256xf32>
    %97 = vector.extract_strided_slice %10 {offsets = [0, 17], sizes = [2, 239], strides = [1, 1]} : vector<2x256xf32> to vector<2x239xf32>
    %98 = vector.extract_strided_slice %10 {offsets = [0, 0], sizes = [2, 17], strides = [1, 1]} : vector<2x256xf32> to vector<2x17xf32>
    %99 = tpu.concatenate %97, %98 in 1 : vector<2x239xf32>, vector<2x17xf32> -> vector<2x256xf32>
    %100 = vector.extract_strided_slice %2 {offsets = [8, 0], sizes = [1, 256], strides = [1, 1]} : vector<9x256xf32> to vector<1x256xf32>
    %101 = vector.broadcast %100 : vector<1x256xf32> to vector<2x256xf32>
    %102 = arith.mulf %99, %101 : vector<2x256xf32>
    %c8 = arith.constant 8 : index
    %c0_35 = arith.constant 0 : index
    %c0_36 = arith.constant 0 : index
    %103 = vector.load %arg5[%c8, %c0_35, %c0_36] : memref<9x2x2xbf16, #tpu.memory_space<vmem>>, vector<1x2x2xbf16>
    %104 = vector.shape_cast %103 : vector<1x2x2xbf16> to vector<2x2xbf16>
    %105 = arith.truncf %102 : vector<2x256xf32> to vector<2x256xbf16>
    %cst_37 = arith.constant dense<0.000000e+00> : vector<2x256xf32>
    %106 = tpu.matmul %104, %105, %cst_37 {dimension_numbers = #tpu.dot_dimension_numbers<[1], [0], [0], [1], [0, 0, 1, 1], [], []>} : vector<2x2xbf16>, vector<2x256xbf16>, vector<2x256xf32> -> vector<2x256xf32>
    %107 = arith.addf %96, %106 : vector<2x256xf32>
    %c0_38 = arith.constant 0 : index
    %c0_39 = arith.constant 0 : index
    %108 = vector.load %arg6[%c0_38, %c0_39] : memref<2x1xf32, #tpu.memory_space<vmem>>, vector<2x1xf32>
    %109 = vector.broadcast %108 : vector<2x1xf32> to vector<2x256xf32>
    %110 = arith.addf %107, %109 : vector<2x256xf32>
    %cst_40 = arith.constant 0.000000e+00 : f32
    %111 = vector.broadcast %cst_40 : f32 to vector<2x256xf32>
    %112 = arith.maximumf %110, %111 : vector<2x256xf32>
    %c0_41 = arith.constant 0 : index
    %c0_42 = arith.constant 0 : index
    %113 = vector.load %arg7[%c0_41, %c0_42] : memref<4x2xbf16, #tpu.memory_space<vmem>>, vector<4x2xbf16>
    %114 = arith.truncf %112 : vector<2x256xf32> to vector<2x256xbf16>
    %cst_43 = arith.constant dense<0.000000e+00> : vector<4x256xf32>
    %115 = tpu.matmul %113, %114, %cst_43 {dimension_numbers = #tpu.dot_dimension_numbers<[1], [0], [0], [1], [0, 0, 1, 1], [], []>} : vector<4x2xbf16>, vector<2x256xbf16>, vector<4x256xf32> -> vector<4x256xf32>
    %116 = arith.addf %1, %115 : vector<4x256xf32>
    %c0_44 = arith.constant 0 : index
    %c0_45 = arith.constant 0 : index
    %117 = vector.load %arg8[%c0_44, %c0_45] : memref<4x1xf32, #tpu.memory_space<vmem>>, vector<4x1xf32>
    %118 = vector.broadcast %117 : vector<4x1xf32> to vector<4x256xf32>
    %119 = arith.addf %116, %118 : vector<4x256xf32>
    %c0_46 = arith.constant 0 : index
    %c0_47 = arith.constant 0 : index
    %c0_48 = arith.constant 0 : index
    %120 = vector.load %arg9[%c0_46, %c0_47, %c0_48] : memref<1x4x256xf32, #tpu.memory_space<vmem>>, vector<1x4x256xf32>
    %121 = vector.shape_cast %120 : vector<1x4x256xf32> to vector<4x256xf32>
    %122 = vector.shape_cast %119 : vector<4x256xf32> to vector<1x4x256xf32>
    tpu.vector_store %arg9[%c0_46, %c0_47, %c0_48], %122 {strides = array<i32>} : memref<1x4x256xf32, #tpu.memory_space<vmem>>, vector<1x4x256xf32>,
    return
  }
  func.func @transform_0(%arg0: i32) -> (i32, i32, i32) {
    %c0_i32 = arith.constant 0 : i32
    %c0_i32_0 = arith.constant 0 : i32
    %c0_i32_1 = arith.constant 0 : i32
    return %arg0, %c0_i32, %c0_i32_0 : i32, i32, i32
  }
  func.func @transform_1(%arg0: i32) -> (i32, i32) {
    %c0_i32 = arith.constant 0 : i32
    %c0_i32_0 = arith.constant 0 : i32
    %c0_i32_1 = arith.constant 0 : i32
    return %c0_i32, %c0_i32_0 : i32, i32
  }
  func.func @transform_2(%arg0: i32) -> (i32, i32) {
    %c0_i32 = arith.constant 0 : i32
    %c0_i32_0 = arith.constant 0 : i32
    %c0_i32_1 = arith.constant 0 : i32
    return %c0_i32, %c0_i32_0 : i32, i32
  }
  func.func @transform_3(%arg0: i32) -> (i32, i32) {
    %c0_i32 = arith.constant 0 : i32
    %c0_i32_0 = arith.constant 0 : i32
    %c0_i32_1 = arith.constant 0 : i32
    return %c0_i32, %c0_i32_0 : i32, i32
  }
  func.func @transform_4(%arg0: i32) -> (i32, i32, i32) {
    %c0_i32 = arith.constant 0 : i32
    %c0_i32_0 = arith.constant 0 : i32
    %c0_i32_1 = arith.constant 0 : i32
    %c0_i32_2 = arith.constant 0 : i32
    return %c0_i32, %c0_i32_0, %c0_i32_1 : i32, i32, i32
  }
  func.func @transform_5(%arg0: i32) -> (i32, i32) {
    %c0_i32 = arith.constant 0 : i32
    %c0_i32_0 = arith.constant 0 : i32
    %c0_i32_1 = arith.constant 0 : i32
    return %c0_i32, %c0_i32_0 : i32, i32
  }
  func.func @transform_6(%arg0: i32) -> (i32, i32) {
    %c0_i32 = arith.constant 0 : i32
    %c0_i32_0 = arith.constant 0 : i32
    %c0_i32_1 = arith.constant 0 : i32
    return %c0_i32, %c0_i32_0 : i32, i32
  }
  func.func @transform_7(%arg0: i32) -> (i32, i32) {
    %c0_i32 = arith.constant 0 : i32
    %c0_i32_0 = arith.constant 0 : i32
    %c0_i32_1 = arith.constant 0 : i32
    return %c0_i32, %c0_i32_0 : i32, i32
  }
  func.func @transform_8(%arg0: i32) -> (i32, i32, i32) {
    %c0_i32 = arith.constant 0 : i32
    %c0_i32_0 = arith.constant 0 : i32
    %c0_i32_1 = arith.constant 0 : i32
    return %arg0, %c0_i32, %c0_i32_0 : i32, i32, i32
  }
}

module attributes {stable_mosaic.version = 11 : i64} {
  func.func @_fused_block_kernel(%arg0: i32, %arg1: memref<1x4x16xf32, #tpu.memory_space<vmem>>, %arg2: memref<1x4x64xf32, #tpu.memory_space<vmem>>, %arg3: memref<16x64xf32, #tpu.memory_space<vmem>>, %arg4: memref<9x16xf32, #tpu.memory_space<vmem>>, %arg5: memref<2x4xbf16, #tpu.memory_space<vmem>>, %arg6: memref<2x1xf32, #tpu.memory_space<vmem>>, %arg7: memref<9x2x2xbf16, #tpu.memory_space<vmem>>, %arg8: memref<2x1xf32, #tpu.memory_space<vmem>>, %arg9: memref<4x2xbf16, #tpu.memory_space<vmem>>, %arg10: memref<4x1xf32, #tpu.memory_space<vmem>>, %arg11: memref<1x4x64xf32, #tpu.memory_space<vmem>>) attributes {dimension_semantics = [#tpu.dimension_semantics<parallel>], iteration_bounds = array<i64: 2>, scalar_prefetch = 0 : i64, scratch_operands = 0 : i64, tpu.core_type = #tpu.core_type<tc>, window_params = [{transform_indices = @transform_0, window_bounds = array<i64: 1, 4, 16>}, {transform_indices = @transform_1, window_bounds = array<i64: 1, 4, 64>}, {pipeline_mode = #tpu.pipeline_mode<synchronous>, transform_indices = @transform_2, window_bounds = array<i64: 16, 64>}, {pipeline_mode = #tpu.pipeline_mode<synchronous>, transform_indices = @transform_3, window_bounds = array<i64: 9, 16>}, {pipeline_mode = #tpu.pipeline_mode<synchronous>, transform_indices = @transform_4, window_bounds = array<i64: 2, 4>}, {pipeline_mode = #tpu.pipeline_mode<synchronous>, transform_indices = @transform_5, window_bounds = array<i64: 2, 1>}, {pipeline_mode = #tpu.pipeline_mode<synchronous>, transform_indices = @transform_6, window_bounds = array<i64: 9, 2, 2>}, {pipeline_mode = #tpu.pipeline_mode<synchronous>, transform_indices = @transform_7, window_bounds = array<i64: 2, 1>}, {pipeline_mode = #tpu.pipeline_mode<synchronous>, transform_indices = @transform_8, window_bounds = array<i64: 4, 2>}, {pipeline_mode = #tpu.pipeline_mode<synchronous>, transform_indices = @transform_9, window_bounds = array<i64: 4, 1>}, {transform_indices = @transform_10, window_bounds = array<i64: 1, 4, 64>}]} {
    %c0 = arith.constant 0 : index
    %c0_0 = arith.constant 0 : index
    %c0_1 = arith.constant 0 : index
    %0 = vector.load %arg1[%c0, %c0_0, %c0_1] : memref<1x4x16xf32, #tpu.memory_space<vmem>>, vector<1x4x16xf32>
    %1 = vector.shape_cast %0 : vector<1x4x16xf32> to vector<4x16xf32>
    %c0_2 = arith.constant 0 : index
    %c0_3 = arith.constant 0 : index
    %2 = vector.load %arg4[%c0_2, %c0_3] : memref<9x16xf32, #tpu.memory_space<vmem>>, vector<9x16xf32>
    %c0_4 = arith.constant 0 : index
    %c0_5 = arith.constant 0 : index
    %3 = vector.load %arg5[%c0_4, %c0_5] : memref<2x4xbf16, #tpu.memory_space<vmem>>, vector<2x4xbf16>
    %4 = arith.truncf %1 : vector<4x16xf32> to vector<4x16xbf16>
    %cst = arith.constant dense<0.000000e+00> : vector<2x16xf32>
    %5 = tpu.matmul %3, %4, %cst {dimension_numbers = #tpu.dot_dimension_numbers<[1], [0], [0], [1], [0, 0, 1, 1], [], []>} : vector<2x4xbf16>, vector<4x16xbf16>, vector<2x16xf32> -> vector<2x16xf32>
    %c0_6 = arith.constant 0 : index
    %c0_7 = arith.constant 0 : index
    %6 = vector.load %arg6[%c0_6, %c0_7] : memref<2x1xf32, #tpu.memory_space<vmem>>, vector<2x1xf32>
    %7 = vector.broadcast %6 : vector<2x1xf32> to vector<2x16xf32>
    %8 = arith.addf %5, %7 : vector<2x16xf32>
    %cst_8 = arith.constant 0.000000e+00 : f32
    %9 = vector.broadcast %cst_8 : f32 to vector<2x16xf32>
    %10 = arith.maximumf %8, %9 : vector<2x16xf32>
    %cst_9 = arith.constant 0.000000e+00 : f32
    %11 = vector.broadcast %cst_9 : f32 to vector<2x16xf32>
    %12 = vector.extract_strided_slice %10 {offsets = [0, 11], sizes = [2, 5], strides = [1, 1]} : vector<2x16xf32> to vector<2x5xf32>
    %13 = vector.extract_strided_slice %10 {offsets = [0, 0], sizes = [2, 11], strides = [1, 1]} : vector<2x16xf32> to vector<2x11xf32>
    %14 = tpu.concatenate %12, %13 in 1 : vector<2x5xf32>, vector<2x11xf32> -> vector<2x16xf32>
    %15 = vector.extract_strided_slice %2 {offsets = [0, 0], sizes = [1, 16], strides = [1, 1]} : vector<9x16xf32> to vector<1x16xf32>
    %16 = vector.broadcast %15 : vector<1x16xf32> to vector<2x16xf32>
    %17 = arith.mulf %14, %16 : vector<2x16xf32>
    %c0_10 = arith.constant 0 : index
    %c0_11 = arith.constant 0 : index
    %c0_12 = arith.constant 0 : index
    %18 = vector.load %arg7[%c0_10, %c0_11, %c0_12] : memref<9x2x2xbf16, #tpu.memory_space<vmem>>, vector<1x2x2xbf16>
    %19 = vector.shape_cast %18 : vector<1x2x2xbf16> to vector<2x2xbf16>
    %20 = arith.truncf %17 : vector<2x16xf32> to vector<2x16xbf16>
    %cst_13 = arith.constant dense<0.000000e+00> : vector<2x16xf32>
    %21 = tpu.matmul %19, %20, %cst_13 {dimension_numbers = #tpu.dot_dimension_numbers<[1], [0], [0], [1], [0, 0, 1, 1], [], []>} : vector<2x2xbf16>, vector<2x16xbf16>, vector<2x16xf32> -> vector<2x16xf32>
    %22 = arith.addf %11, %21 : vector<2x16xf32>
    %23 = vector.extract_strided_slice %10 {offsets = [0, 12], sizes = [2, 4], strides = [1, 1]} : vector<2x16xf32> to vector<2x4xf32>
    %24 = vector.extract_strided_slice %10 {offsets = [0, 0], sizes = [2, 12], strides = [1, 1]} : vector<2x16xf32> to vector<2x12xf32>
    %25 = tpu.concatenate %23, %24 in 1 : vector<2x4xf32>, vector<2x12xf32> -> vector<2x16xf32>
    %26 = vector.extract_strided_slice %2 {offsets = [1, 0], sizes = [1, 16], strides = [1, 1]} : vector<9x16xf32> to vector<1x16xf32>
    %27 = vector.broadcast %26 : vector<1x16xf32> to vector<2x16xf32>
    %28 = arith.mulf %25, %27 : vector<2x16xf32>
    %c1 = arith.constant 1 : index
    %c0_14 = arith.constant 0 : index
    %c0_15 = arith.constant 0 : index
    %29 = vector.load %arg7[%c1, %c0_14, %c0_15] : memref<9x2x2xbf16, #tpu.memory_space<vmem>>, vector<1x2x2xbf16>
    %30 = vector.shape_cast %29 : vector<1x2x2xbf16> to vector<2x2xbf16>
    %31 = arith.truncf %28 : vector<2x16xf32> to vector<2x16xbf16>
    %cst_16 = arith.constant dense<0.000000e+00> : vector<2x16xf32>
    %32 = tpu.matmul %30, %31, %cst_16 {dimension_numbers = #tpu.dot_dimension_numbers<[1], [0], [0], [1], [0, 0, 1, 1], [], []>} : vector<2x2xbf16>, vector<2x16xbf16>, vector<2x16xf32> -> vector<2x16xf32>
    %33 = arith.addf %22, %32 : vector<2x16xf32>
    %34 = vector.extract_strided_slice %10 {offsets = [0, 13], sizes = [2, 3], strides = [1, 1]} : vector<2x16xf32> to vector<2x3xf32>
    %35 = vector.extract_strided_slice %10 {offsets = [0, 0], sizes = [2, 13], strides = [1, 1]} : vector<2x16xf32> to vector<2x13xf32>
    %36 = tpu.concatenate %34, %35 in 1 : vector<2x3xf32>, vector<2x13xf32> -> vector<2x16xf32>
    %37 = vector.extract_strided_slice %2 {offsets = [2, 0], sizes = [1, 16], strides = [1, 1]} : vector<9x16xf32> to vector<1x16xf32>
    %38 = vector.broadcast %37 : vector<1x16xf32> to vector<2x16xf32>
    %39 = arith.mulf %36, %38 : vector<2x16xf32>
    %c2 = arith.constant 2 : index
    %c0_17 = arith.constant 0 : index
    %c0_18 = arith.constant 0 : index
    %40 = vector.load %arg7[%c2, %c0_17, %c0_18] : memref<9x2x2xbf16, #tpu.memory_space<vmem>>, vector<1x2x2xbf16>
    %41 = vector.shape_cast %40 : vector<1x2x2xbf16> to vector<2x2xbf16>
    %42 = arith.truncf %39 : vector<2x16xf32> to vector<2x16xbf16>
    %cst_19 = arith.constant dense<0.000000e+00> : vector<2x16xf32>
    %43 = tpu.matmul %41, %42, %cst_19 {dimension_numbers = #tpu.dot_dimension_numbers<[1], [0], [0], [1], [0, 0, 1, 1], [], []>} : vector<2x2xbf16>, vector<2x16xbf16>, vector<2x16xf32> -> vector<2x16xf32>
    %44 = arith.addf %33, %43 : vector<2x16xf32>
    %45 = vector.extract_strided_slice %10 {offsets = [0, 15], sizes = [2, 1], strides = [1, 1]} : vector<2x16xf32> to vector<2x1xf32>
    %46 = vector.extract_strided_slice %10 {offsets = [0, 0], sizes = [2, 15], strides = [1, 1]} : vector<2x16xf32> to vector<2x15xf32>
    %47 = tpu.concatenate %45, %46 in 1 : vector<2x1xf32>, vector<2x15xf32> -> vector<2x16xf32>
    %48 = vector.extract_strided_slice %2 {offsets = [3, 0], sizes = [1, 16], strides = [1, 1]} : vector<9x16xf32> to vector<1x16xf32>
    %49 = vector.broadcast %48 : vector<1x16xf32> to vector<2x16xf32>
    %50 = arith.mulf %47, %49 : vector<2x16xf32>
    %c3 = arith.constant 3 : index
    %c0_20 = arith.constant 0 : index
    %c0_21 = arith.constant 0 : index
    %51 = vector.load %arg7[%c3, %c0_20, %c0_21] : memref<9x2x2xbf16, #tpu.memory_space<vmem>>, vector<1x2x2xbf16>
    %52 = vector.shape_cast %51 : vector<1x2x2xbf16> to vector<2x2xbf16>
    %53 = arith.truncf %50 : vector<2x16xf32> to vector<2x16xbf16>
    %cst_22 = arith.constant dense<0.000000e+00> : vector<2x16xf32>
    %54 = tpu.matmul %52, %53, %cst_22 {dimension_numbers = #tpu.dot_dimension_numbers<[1], [0], [0], [1], [0, 0, 1, 1], [], []>} : vector<2x2xbf16>, vector<2x16xbf16>, vector<2x16xf32> -> vector<2x16xf32>
    %55 = arith.addf %44, %54 : vector<2x16xf32>
    %56 = vector.extract_strided_slice %2 {offsets = [4, 0], sizes = [1, 16], strides = [1, 1]} : vector<9x16xf32> to vector<1x16xf32>
    %57 = vector.broadcast %56 : vector<1x16xf32> to vector<2x16xf32>
    %58 = arith.mulf %10, %57 : vector<2x16xf32>
    %c4 = arith.constant 4 : index
    %c0_23 = arith.constant 0 : index
    %c0_24 = arith.constant 0 : index
    %59 = vector.load %arg7[%c4, %c0_23, %c0_24] : memref<9x2x2xbf16, #tpu.memory_space<vmem>>, vector<1x2x2xbf16>
    %60 = vector.shape_cast %59 : vector<1x2x2xbf16> to vector<2x2xbf16>
    %61 = arith.truncf %58 : vector<2x16xf32> to vector<2x16xbf16>
    %cst_25 = arith.constant dense<0.000000e+00> : vector<2x16xf32>
    %62 = tpu.matmul %60, %61, %cst_25 {dimension_numbers = #tpu.dot_dimension_numbers<[1], [0], [0], [1], [0, 0, 1, 1], [], []>} : vector<2x2xbf16>, vector<2x16xbf16>, vector<2x16xf32> -> vector<2x16xf32>
    %63 = arith.addf %55, %62 : vector<2x16xf32>
    %64 = vector.extract_strided_slice %10 {offsets = [0, 1], sizes = [2, 15], strides = [1, 1]} : vector<2x16xf32> to vector<2x15xf32>
    %65 = vector.extract_strided_slice %10 {offsets = [0, 0], sizes = [2, 1], strides = [1, 1]} : vector<2x16xf32> to vector<2x1xf32>
    %66 = tpu.concatenate %64, %65 in 1 : vector<2x15xf32>, vector<2x1xf32> -> vector<2x16xf32>
    %67 = vector.extract_strided_slice %2 {offsets = [5, 0], sizes = [1, 16], strides = [1, 1]} : vector<9x16xf32> to vector<1x16xf32>
    %68 = vector.broadcast %67 : vector<1x16xf32> to vector<2x16xf32>
    %69 = arith.mulf %66, %68 : vector<2x16xf32>
    %c5 = arith.constant 5 : index
    %c0_26 = arith.constant 0 : index
    %c0_27 = arith.constant 0 : index
    %70 = vector.load %arg7[%c5, %c0_26, %c0_27] : memref<9x2x2xbf16, #tpu.memory_space<vmem>>, vector<1x2x2xbf16>
    %71 = vector.shape_cast %70 : vector<1x2x2xbf16> to vector<2x2xbf16>
    %72 = arith.truncf %69 : vector<2x16xf32> to vector<2x16xbf16>
    %cst_28 = arith.constant dense<0.000000e+00> : vector<2x16xf32>
    %73 = tpu.matmul %71, %72, %cst_28 {dimension_numbers = #tpu.dot_dimension_numbers<[1], [0], [0], [1], [0, 0, 1, 1], [], []>} : vector<2x2xbf16>, vector<2x16xbf16>, vector<2x16xf32> -> vector<2x16xf32>
    %74 = arith.addf %63, %73 : vector<2x16xf32>
    %75 = vector.extract_strided_slice %10 {offsets = [0, 3], sizes = [2, 13], strides = [1, 1]} : vector<2x16xf32> to vector<2x13xf32>
    %76 = vector.extract_strided_slice %10 {offsets = [0, 0], sizes = [2, 3], strides = [1, 1]} : vector<2x16xf32> to vector<2x3xf32>
    %77 = tpu.concatenate %75, %76 in 1 : vector<2x13xf32>, vector<2x3xf32> -> vector<2x16xf32>
    %78 = vector.extract_strided_slice %2 {offsets = [6, 0], sizes = [1, 16], strides = [1, 1]} : vector<9x16xf32> to vector<1x16xf32>
    %79 = vector.broadcast %78 : vector<1x16xf32> to vector<2x16xf32>
    %80 = arith.mulf %77, %79 : vector<2x16xf32>
    %c6 = arith.constant 6 : index
    %c0_29 = arith.constant 0 : index
    %c0_30 = arith.constant 0 : index
    %81 = vector.load %arg7[%c6, %c0_29, %c0_30] : memref<9x2x2xbf16, #tpu.memory_space<vmem>>, vector<1x2x2xbf16>
    %82 = vector.shape_cast %81 : vector<1x2x2xbf16> to vector<2x2xbf16>
    %83 = arith.truncf %80 : vector<2x16xf32> to vector<2x16xbf16>
    %cst_31 = arith.constant dense<0.000000e+00> : vector<2x16xf32>
    %84 = tpu.matmul %82, %83, %cst_31 {dimension_numbers = #tpu.dot_dimension_numbers<[1], [0], [0], [1], [0, 0, 1, 1], [], []>} : vector<2x2xbf16>, vector<2x16xbf16>, vector<2x16xf32> -> vector<2x16xf32>
    %85 = arith.addf %74, %84 : vector<2x16xf32>
    %86 = vector.extract_strided_slice %10 {offsets = [0, 4], sizes = [2, 12], strides = [1, 1]} : vector<2x16xf32> to vector<2x12xf32>
    %87 = vector.extract_strided_slice %10 {offsets = [0, 0], sizes = [2, 4], strides = [1, 1]} : vector<2x16xf32> to vector<2x4xf32>
    %88 = tpu.concatenate %86, %87 in 1 : vector<2x12xf32>, vector<2x4xf32> -> vector<2x16xf32>
    %89 = vector.extract_strided_slice %2 {offsets = [7, 0], sizes = [1, 16], strides = [1, 1]} : vector<9x16xf32> to vector<1x16xf32>
    %90 = vector.broadcast %89 : vector<1x16xf32> to vector<2x16xf32>
    %91 = arith.mulf %88, %90 : vector<2x16xf32>
    %c7 = arith.constant 7 : index
    %c0_32 = arith.constant 0 : index
    %c0_33 = arith.constant 0 : index
    %92 = vector.load %arg7[%c7, %c0_32, %c0_33] : memref<9x2x2xbf16, #tpu.memory_space<vmem>>, vector<1x2x2xbf16>
    %93 = vector.shape_cast %92 : vector<1x2x2xbf16> to vector<2x2xbf16>
    %94 = arith.truncf %91 : vector<2x16xf32> to vector<2x16xbf16>
    %cst_34 = arith.constant dense<0.000000e+00> : vector<2x16xf32>
    %95 = tpu.matmul %93, %94, %cst_34 {dimension_numbers = #tpu.dot_dimension_numbers<[1], [0], [0], [1], [0, 0, 1, 1], [], []>} : vector<2x2xbf16>, vector<2x16xbf16>, vector<2x16xf32> -> vector<2x16xf32>
    %96 = arith.addf %85, %95 : vector<2x16xf32>
    %97 = vector.extract_strided_slice %10 {offsets = [0, 5], sizes = [2, 11], strides = [1, 1]} : vector<2x16xf32> to vector<2x11xf32>
    %98 = vector.extract_strided_slice %10 {offsets = [0, 0], sizes = [2, 5], strides = [1, 1]} : vector<2x16xf32> to vector<2x5xf32>
    %99 = tpu.concatenate %97, %98 in 1 : vector<2x11xf32>, vector<2x5xf32> -> vector<2x16xf32>
    %100 = vector.extract_strided_slice %2 {offsets = [8, 0], sizes = [1, 16], strides = [1, 1]} : vector<9x16xf32> to vector<1x16xf32>
    %101 = vector.broadcast %100 : vector<1x16xf32> to vector<2x16xf32>
    %102 = arith.mulf %99, %101 : vector<2x16xf32>
    %c8 = arith.constant 8 : index
    %c0_35 = arith.constant 0 : index
    %c0_36 = arith.constant 0 : index
    %103 = vector.load %arg7[%c8, %c0_35, %c0_36] : memref<9x2x2xbf16, #tpu.memory_space<vmem>>, vector<1x2x2xbf16>
    %104 = vector.shape_cast %103 : vector<1x2x2xbf16> to vector<2x2xbf16>
    %105 = arith.truncf %102 : vector<2x16xf32> to vector<2x16xbf16>
    %cst_37 = arith.constant dense<0.000000e+00> : vector<2x16xf32>
    %106 = tpu.matmul %104, %105, %cst_37 {dimension_numbers = #tpu.dot_dimension_numbers<[1], [0], [0], [1], [0, 0, 1, 1], [], []>} : vector<2x2xbf16>, vector<2x16xbf16>, vector<2x16xf32> -> vector<2x16xf32>
    %107 = arith.addf %96, %106 : vector<2x16xf32>
    %c0_38 = arith.constant 0 : index
    %c0_39 = arith.constant 0 : index
    %108 = vector.load %arg8[%c0_38, %c0_39] : memref<2x1xf32, #tpu.memory_space<vmem>>, vector<2x1xf32>
    %109 = vector.broadcast %108 : vector<2x1xf32> to vector<2x16xf32>
    %110 = arith.addf %107, %109 : vector<2x16xf32>
    %cst_40 = arith.constant 0.000000e+00 : f32
    %111 = vector.broadcast %cst_40 : f32 to vector<2x16xf32>
    %112 = arith.maximumf %110, %111 : vector<2x16xf32>
    %c0_41 = arith.constant 0 : index
    %c0_42 = arith.constant 0 : index
    %113 = vector.load %arg9[%c0_41, %c0_42] : memref<4x2xbf16, #tpu.memory_space<vmem>>, vector<4x2xbf16>
    %114 = arith.truncf %112 : vector<2x16xf32> to vector<2x16xbf16>
    %cst_43 = arith.constant dense<0.000000e+00> : vector<4x16xf32>
    %115 = tpu.matmul %113, %114, %cst_43 {dimension_numbers = #tpu.dot_dimension_numbers<[1], [0], [0], [1], [0, 0, 1, 1], [], []>} : vector<4x2xbf16>, vector<2x16xbf16>, vector<4x16xf32> -> vector<4x16xf32>
    %116 = arith.addf %1, %115 : vector<4x16xf32>
    %c0_44 = arith.constant 0 : index
    %c0_45 = arith.constant 0 : index
    %117 = vector.load %arg10[%c0_44, %c0_45] : memref<4x1xf32, #tpu.memory_space<vmem>>, vector<4x1xf32>
    %118 = vector.broadcast %117 : vector<4x1xf32> to vector<4x16xf32>
    %119 = arith.addf %116, %118 : vector<4x16xf32>
    %c0_46 = arith.constant 0 : index
    %c0_47 = arith.constant 0 : index
    %120 = vector.load %arg3[%c0_46, %c0_47] : memref<16x64xf32, #tpu.memory_space<vmem>>, vector<16x64xf32>
    %cst_48 = arith.constant dense<0.000000e+00> : vector<4x64xf32>
    %121 = tpu.matmul %119, %120, %cst_48 {dimension_numbers = #tpu.dot_dimension_numbers<[1], [0], [0], [1], [0, 0, 1, 1], [], []>} : vector<4x16xf32>, vector<16x64xf32>, vector<4x64xf32> -> vector<4x64xf32>
    %c0_49 = arith.constant 0 : index
    %c0_50 = arith.constant 0 : index
    %c0_51 = arith.constant 0 : index
    %122 = vector.load %arg2[%c0_49, %c0_50, %c0_51] : memref<1x4x64xf32, #tpu.memory_space<vmem>>, vector<1x4x64xf32>
    %123 = vector.shape_cast %122 : vector<1x4x64xf32> to vector<4x64xf32>
    %124 = arith.addf %121, %123 : vector<4x64xf32>
    %c0_52 = arith.constant 0 : index
    %c0_53 = arith.constant 0 : index
    %c0_54 = arith.constant 0 : index
    %125 = vector.load %arg11[%c0_52, %c0_53, %c0_54] : memref<1x4x64xf32, #tpu.memory_space<vmem>>, vector<1x4x64xf32>
    %126 = vector.shape_cast %125 : vector<1x4x64xf32> to vector<4x64xf32>
    %127 = vector.shape_cast %124 : vector<4x64xf32> to vector<1x4x64xf32>
    tpu.vector_store %arg11[%c0_52, %c0_53, %c0_54], %127 {strides = array<i32>} : memref<1x4x64xf32, #tpu.memory_space<vmem>>, vector<1x4x64xf32>,
    return
  }
  func.func @transform_0(%arg0: i32) -> (i32, i32, i32) {
    %c0_i32 = arith.constant 0 : i32
    %c0_i32_0 = arith.constant 0 : i32
    %c0_i32_1 = arith.constant 0 : i32
    return %arg0, %c0_i32, %c0_i32_0 : i32, i32, i32
  }
  func.func @transform_1(%arg0: i32) -> (i32, i32, i32) {
    %c0_i32 = arith.constant 0 : i32
    %c0_i32_0 = arith.constant 0 : i32
    %c0_i32_1 = arith.constant 0 : i32
    return %arg0, %c0_i32, %c0_i32_0 : i32, i32, i32
  }
  func.func @transform_2(%arg0: i32) -> (i32, i32) {
    %c0_i32 = arith.constant 0 : i32
    %c0_i32_0 = arith.constant 0 : i32
    %c0_i32_1 = arith.constant 0 : i32
    return %c0_i32, %c0_i32_0 : i32, i32
  }
  func.func @transform_3(%arg0: i32) -> (i32, i32) {
    %c0_i32 = arith.constant 0 : i32
    %c0_i32_0 = arith.constant 0 : i32
    %c0_i32_1 = arith.constant 0 : i32
    return %c0_i32, %c0_i32_0 : i32, i32
  }
  func.func @transform_4(%arg0: i32) -> (i32, i32) {
    %c0_i32 = arith.constant 0 : i32
    %c0_i32_0 = arith.constant 0 : i32
    %c0_i32_1 = arith.constant 0 : i32
    return %c0_i32, %c0_i32_0 : i32, i32
  }
  func.func @transform_5(%arg0: i32) -> (i32, i32) {
    %c0_i32 = arith.constant 0 : i32
    %c0_i32_0 = arith.constant 0 : i32
    %c0_i32_1 = arith.constant 0 : i32
    return %c0_i32, %c0_i32_0 : i32, i32
  }
  func.func @transform_6(%arg0: i32) -> (i32, i32, i32) {
    %c0_i32 = arith.constant 0 : i32
    %c0_i32_0 = arith.constant 0 : i32
    %c0_i32_1 = arith.constant 0 : i32
    %c0_i32_2 = arith.constant 0 : i32
    return %c0_i32, %c0_i32_0, %c0_i32_1 : i32, i32, i32
  }
  func.func @transform_7(%arg0: i32) -> (i32, i32) {
    %c0_i32 = arith.constant 0 : i32
    %c0_i32_0 = arith.constant 0 : i32
    %c0_i32_1 = arith.constant 0 : i32
    return %c0_i32, %c0_i32_0 : i32, i32
  }
  func.func @transform_8(%arg0: i32) -> (i32, i32) {
    %c0_i32 = arith.constant 0 : i32
    %c0_i32_0 = arith.constant 0 : i32
    %c0_i32_1 = arith.constant 0 : i32
    return %c0_i32, %c0_i32_0 : i32, i32
  }
  func.func @transform_9(%arg0: i32) -> (i32, i32) {
    %c0_i32 = arith.constant 0 : i32
    %c0_i32_0 = arith.constant 0 : i32
    %c0_i32_1 = arith.constant 0 : i32
    return %c0_i32, %c0_i32_0 : i32, i32
  }
  func.func @transform_10(%arg0: i32) -> (i32, i32, i32) {
    %c0_i32 = arith.constant 0 : i32
    %c0_i32_0 = arith.constant 0 : i32
    %c0_i32_1 = arith.constant 0 : i32
    return %arg0, %c0_i32, %c0_i32_0 : i32, i32, i32
  }
}

module attributes {stable_mosaic.version = 11 : i64} {
  func.func @_fused_block_kernel(%arg0: i32, %arg1: memref<1x4x64xf32, #tpu.memory_space<vmem>>, %arg2: memref<1x4x256xf32, #tpu.memory_space<vmem>>, %arg3: memref<64x256xf32, #tpu.memory_space<vmem>>, %arg4: memref<9x64xf32, #tpu.memory_space<vmem>>, %arg5: memref<2x4xbf16, #tpu.memory_space<vmem>>, %arg6: memref<2x1xf32, #tpu.memory_space<vmem>>, %arg7: memref<9x2x2xbf16, #tpu.memory_space<vmem>>, %arg8: memref<2x1xf32, #tpu.memory_space<vmem>>, %arg9: memref<4x2xbf16, #tpu.memory_space<vmem>>, %arg10: memref<4x1xf32, #tpu.memory_space<vmem>>, %arg11: memref<1x4x256xf32, #tpu.memory_space<vmem>>) attributes {dimension_semantics = [#tpu.dimension_semantics<parallel>], iteration_bounds = array<i64: 2>, scalar_prefetch = 0 : i64, scratch_operands = 0 : i64, tpu.core_type = #tpu.core_type<tc>, window_params = [{transform_indices = @transform_0, window_bounds = array<i64: 1, 4, 64>}, {transform_indices = @transform_1, window_bounds = array<i64: 1, 4, 256>}, {pipeline_mode = #tpu.pipeline_mode<synchronous>, transform_indices = @transform_2, window_bounds = array<i64: 64, 256>}, {pipeline_mode = #tpu.pipeline_mode<synchronous>, transform_indices = @transform_3, window_bounds = array<i64: 9, 64>}, {pipeline_mode = #tpu.pipeline_mode<synchronous>, transform_indices = @transform_4, window_bounds = array<i64: 2, 4>}, {pipeline_mode = #tpu.pipeline_mode<synchronous>, transform_indices = @transform_5, window_bounds = array<i64: 2, 1>}, {pipeline_mode = #tpu.pipeline_mode<synchronous>, transform_indices = @transform_6, window_bounds = array<i64: 9, 2, 2>}, {pipeline_mode = #tpu.pipeline_mode<synchronous>, transform_indices = @transform_7, window_bounds = array<i64: 2, 1>}, {pipeline_mode = #tpu.pipeline_mode<synchronous>, transform_indices = @transform_8, window_bounds = array<i64: 4, 2>}, {pipeline_mode = #tpu.pipeline_mode<synchronous>, transform_indices = @transform_9, window_bounds = array<i64: 4, 1>}, {transform_indices = @transform_10, window_bounds = array<i64: 1, 4, 256>}]} {
    %c0 = arith.constant 0 : index
    %c0_0 = arith.constant 0 : index
    %c0_1 = arith.constant 0 : index
    %0 = vector.load %arg1[%c0, %c0_0, %c0_1] : memref<1x4x64xf32, #tpu.memory_space<vmem>>, vector<1x4x64xf32>
    %1 = vector.shape_cast %0 : vector<1x4x64xf32> to vector<4x64xf32>
    %c0_2 = arith.constant 0 : index
    %c0_3 = arith.constant 0 : index
    %2 = vector.load %arg4[%c0_2, %c0_3] : memref<9x64xf32, #tpu.memory_space<vmem>>, vector<9x64xf32>
    %c0_4 = arith.constant 0 : index
    %c0_5 = arith.constant 0 : index
    %3 = vector.load %arg5[%c0_4, %c0_5] : memref<2x4xbf16, #tpu.memory_space<vmem>>, vector<2x4xbf16>
    %4 = arith.truncf %1 : vector<4x64xf32> to vector<4x64xbf16>
    %cst = arith.constant dense<0.000000e+00> : vector<2x64xf32>
    %5 = tpu.matmul %3, %4, %cst {dimension_numbers = #tpu.dot_dimension_numbers<[1], [0], [0], [1], [0, 0, 1, 1], [], []>} : vector<2x4xbf16>, vector<4x64xbf16>, vector<2x64xf32> -> vector<2x64xf32>
    %c0_6 = arith.constant 0 : index
    %c0_7 = arith.constant 0 : index
    %6 = vector.load %arg6[%c0_6, %c0_7] : memref<2x1xf32, #tpu.memory_space<vmem>>, vector<2x1xf32>
    %7 = vector.broadcast %6 : vector<2x1xf32> to vector<2x64xf32>
    %8 = arith.addf %5, %7 : vector<2x64xf32>
    %cst_8 = arith.constant 0.000000e+00 : f32
    %9 = vector.broadcast %cst_8 : f32 to vector<2x64xf32>
    %10 = arith.maximumf %8, %9 : vector<2x64xf32>
    %cst_9 = arith.constant 0.000000e+00 : f32
    %11 = vector.broadcast %cst_9 : f32 to vector<2x64xf32>
    %12 = vector.extract_strided_slice %10 {offsets = [0, 55], sizes = [2, 9], strides = [1, 1]} : vector<2x64xf32> to vector<2x9xf32>
    %13 = vector.extract_strided_slice %10 {offsets = [0, 0], sizes = [2, 55], strides = [1, 1]} : vector<2x64xf32> to vector<2x55xf32>
    %14 = tpu.concatenate %12, %13 in 1 : vector<2x9xf32>, vector<2x55xf32> -> vector<2x64xf32>
    %15 = vector.extract_strided_slice %2 {offsets = [0, 0], sizes = [1, 64], strides = [1, 1]} : vector<9x64xf32> to vector<1x64xf32>
    %16 = vector.broadcast %15 : vector<1x64xf32> to vector<2x64xf32>
    %17 = arith.mulf %14, %16 : vector<2x64xf32>
    %c0_10 = arith.constant 0 : index
    %c0_11 = arith.constant 0 : index
    %c0_12 = arith.constant 0 : index
    %18 = vector.load %arg7[%c0_10, %c0_11, %c0_12] : memref<9x2x2xbf16, #tpu.memory_space<vmem>>, vector<1x2x2xbf16>
    %19 = vector.shape_cast %18 : vector<1x2x2xbf16> to vector<2x2xbf16>
    %20 = arith.truncf %17 : vector<2x64xf32> to vector<2x64xbf16>
    %cst_13 = arith.constant dense<0.000000e+00> : vector<2x64xf32>
    %21 = tpu.matmul %19, %20, %cst_13 {dimension_numbers = #tpu.dot_dimension_numbers<[1], [0], [0], [1], [0, 0, 1, 1], [], []>} : vector<2x2xbf16>, vector<2x64xbf16>, vector<2x64xf32> -> vector<2x64xf32>
    %22 = arith.addf %11, %21 : vector<2x64xf32>
    %23 = vector.extract_strided_slice %10 {offsets = [0, 56], sizes = [2, 8], strides = [1, 1]} : vector<2x64xf32> to vector<2x8xf32>
    %24 = vector.extract_strided_slice %10 {offsets = [0, 0], sizes = [2, 56], strides = [1, 1]} : vector<2x64xf32> to vector<2x56xf32>
    %25 = tpu.concatenate %23, %24 in 1 : vector<2x8xf32>, vector<2x56xf32> -> vector<2x64xf32>
    %26 = vector.extract_strided_slice %2 {offsets = [1, 0], sizes = [1, 64], strides = [1, 1]} : vector<9x64xf32> to vector<1x64xf32>
    %27 = vector.broadcast %26 : vector<1x64xf32> to vector<2x64xf32>
    %28 = arith.mulf %25, %27 : vector<2x64xf32>
    %c1 = arith.constant 1 : index
    %c0_14 = arith.constant 0 : index
    %c0_15 = arith.constant 0 : index
    %29 = vector.load %arg7[%c1, %c0_14, %c0_15] : memref<9x2x2xbf16, #tpu.memory_space<vmem>>, vector<1x2x2xbf16>
    %30 = vector.shape_cast %29 : vector<1x2x2xbf16> to vector<2x2xbf16>
    %31 = arith.truncf %28 : vector<2x64xf32> to vector<2x64xbf16>
    %cst_16 = arith.constant dense<0.000000e+00> : vector<2x64xf32>
    %32 = tpu.matmul %30, %31, %cst_16 {dimension_numbers = #tpu.dot_dimension_numbers<[1], [0], [0], [1], [0, 0, 1, 1], [], []>} : vector<2x2xbf16>, vector<2x64xbf16>, vector<2x64xf32> -> vector<2x64xf32>
    %33 = arith.addf %22, %32 : vector<2x64xf32>
    %34 = vector.extract_strided_slice %10 {offsets = [0, 57], sizes = [2, 7], strides = [1, 1]} : vector<2x64xf32> to vector<2x7xf32>
    %35 = vector.extract_strided_slice %10 {offsets = [0, 0], sizes = [2, 57], strides = [1, 1]} : vector<2x64xf32> to vector<2x57xf32>
    %36 = tpu.concatenate %34, %35 in 1 : vector<2x7xf32>, vector<2x57xf32> -> vector<2x64xf32>
    %37 = vector.extract_strided_slice %2 {offsets = [2, 0], sizes = [1, 64], strides = [1, 1]} : vector<9x64xf32> to vector<1x64xf32>
    %38 = vector.broadcast %37 : vector<1x64xf32> to vector<2x64xf32>
    %39 = arith.mulf %36, %38 : vector<2x64xf32>
    %c2 = arith.constant 2 : index
    %c0_17 = arith.constant 0 : index
    %c0_18 = arith.constant 0 : index
    %40 = vector.load %arg7[%c2, %c0_17, %c0_18] : memref<9x2x2xbf16, #tpu.memory_space<vmem>>, vector<1x2x2xbf16>
    %41 = vector.shape_cast %40 : vector<1x2x2xbf16> to vector<2x2xbf16>
    %42 = arith.truncf %39 : vector<2x64xf32> to vector<2x64xbf16>
    %cst_19 = arith.constant dense<0.000000e+00> : vector<2x64xf32>
    %43 = tpu.matmul %41, %42, %cst_19 {dimension_numbers = #tpu.dot_dimension_numbers<[1], [0], [0], [1], [0, 0, 1, 1], [], []>} : vector<2x2xbf16>, vector<2x64xbf16>, vector<2x64xf32> -> vector<2x64xf32>
    %44 = arith.addf %33, %43 : vector<2x64xf32>
    %45 = vector.extract_strided_slice %10 {offsets = [0, 63], sizes = [2, 1], strides = [1, 1]} : vector<2x64xf32> to vector<2x1xf32>
    %46 = vector.extract_strided_slice %10 {offsets = [0, 0], sizes = [2, 63], strides = [1, 1]} : vector<2x64xf32> to vector<2x63xf32>
    %47 = tpu.concatenate %45, %46 in 1 : vector<2x1xf32>, vector<2x63xf32> -> vector<2x64xf32>
    %48 = vector.extract_strided_slice %2 {offsets = [3, 0], sizes = [1, 64], strides = [1, 1]} : vector<9x64xf32> to vector<1x64xf32>
    %49 = vector.broadcast %48 : vector<1x64xf32> to vector<2x64xf32>
    %50 = arith.mulf %47, %49 : vector<2x64xf32>
    %c3 = arith.constant 3 : index
    %c0_20 = arith.constant 0 : index
    %c0_21 = arith.constant 0 : index
    %51 = vector.load %arg7[%c3, %c0_20, %c0_21] : memref<9x2x2xbf16, #tpu.memory_space<vmem>>, vector<1x2x2xbf16>
    %52 = vector.shape_cast %51 : vector<1x2x2xbf16> to vector<2x2xbf16>
    %53 = arith.truncf %50 : vector<2x64xf32> to vector<2x64xbf16>
    %cst_22 = arith.constant dense<0.000000e+00> : vector<2x64xf32>
    %54 = tpu.matmul %52, %53, %cst_22 {dimension_numbers = #tpu.dot_dimension_numbers<[1], [0], [0], [1], [0, 0, 1, 1], [], []>} : vector<2x2xbf16>, vector<2x64xbf16>, vector<2x64xf32> -> vector<2x64xf32>
    %55 = arith.addf %44, %54 : vector<2x64xf32>
    %56 = vector.extract_strided_slice %2 {offsets = [4, 0], sizes = [1, 64], strides = [1, 1]} : vector<9x64xf32> to vector<1x64xf32>
    %57 = vector.broadcast %56 : vector<1x64xf32> to vector<2x64xf32>
    %58 = arith.mulf %10, %57 : vector<2x64xf32>
    %c4 = arith.constant 4 : index
    %c0_23 = arith.constant 0 : index
    %c0_24 = arith.constant 0 : index
    %59 = vector.load %arg7[%c4, %c0_23, %c0_24] : memref<9x2x2xbf16, #tpu.memory_space<vmem>>, vector<1x2x2xbf16>
    %60 = vector.shape_cast %59 : vector<1x2x2xbf16> to vector<2x2xbf16>
    %61 = arith.truncf %58 : vector<2x64xf32> to vector<2x64xbf16>
    %cst_25 = arith.constant dense<0.000000e+00> : vector<2x64xf32>
    %62 = tpu.matmul %60, %61, %cst_25 {dimension_numbers = #tpu.dot_dimension_numbers<[1], [0], [0], [1], [0, 0, 1, 1], [], []>} : vector<2x2xbf16>, vector<2x64xbf16>, vector<2x64xf32> -> vector<2x64xf32>
    %63 = arith.addf %55, %62 : vector<2x64xf32>
    %64 = vector.extract_strided_slice %10 {offsets = [0, 1], sizes = [2, 63], strides = [1, 1]} : vector<2x64xf32> to vector<2x63xf32>
    %65 = vector.extract_strided_slice %10 {offsets = [0, 0], sizes = [2, 1], strides = [1, 1]} : vector<2x64xf32> to vector<2x1xf32>
    %66 = tpu.concatenate %64, %65 in 1 : vector<2x63xf32>, vector<2x1xf32> -> vector<2x64xf32>
    %67 = vector.extract_strided_slice %2 {offsets = [5, 0], sizes = [1, 64], strides = [1, 1]} : vector<9x64xf32> to vector<1x64xf32>
    %68 = vector.broadcast %67 : vector<1x64xf32> to vector<2x64xf32>
    %69 = arith.mulf %66, %68 : vector<2x64xf32>
    %c5 = arith.constant 5 : index
    %c0_26 = arith.constant 0 : index
    %c0_27 = arith.constant 0 : index
    %70 = vector.load %arg7[%c5, %c0_26, %c0_27] : memref<9x2x2xbf16, #tpu.memory_space<vmem>>, vector<1x2x2xbf16>
    %71 = vector.shape_cast %70 : vector<1x2x2xbf16> to vector<2x2xbf16>
    %72 = arith.truncf %69 : vector<2x64xf32> to vector<2x64xbf16>
    %cst_28 = arith.constant dense<0.000000e+00> : vector<2x64xf32>
    %73 = tpu.matmul %71, %72, %cst_28 {dimension_numbers = #tpu.dot_dimension_numbers<[1], [0], [0], [1], [0, 0, 1, 1], [], []>} : vector<2x2xbf16>, vector<2x64xbf16>, vector<2x64xf32> -> vector<2x64xf32>
    %74 = arith.addf %63, %73 : vector<2x64xf32>
    %75 = vector.extract_strided_slice %10 {offsets = [0, 7], sizes = [2, 57], strides = [1, 1]} : vector<2x64xf32> to vector<2x57xf32>
    %76 = vector.extract_strided_slice %10 {offsets = [0, 0], sizes = [2, 7], strides = [1, 1]} : vector<2x64xf32> to vector<2x7xf32>
    %77 = tpu.concatenate %75, %76 in 1 : vector<2x57xf32>, vector<2x7xf32> -> vector<2x64xf32>
    %78 = vector.extract_strided_slice %2 {offsets = [6, 0], sizes = [1, 64], strides = [1, 1]} : vector<9x64xf32> to vector<1x64xf32>
    %79 = vector.broadcast %78 : vector<1x64xf32> to vector<2x64xf32>
    %80 = arith.mulf %77, %79 : vector<2x64xf32>
    %c6 = arith.constant 6 : index
    %c0_29 = arith.constant 0 : index
    %c0_30 = arith.constant 0 : index
    %81 = vector.load %arg7[%c6, %c0_29, %c0_30] : memref<9x2x2xbf16, #tpu.memory_space<vmem>>, vector<1x2x2xbf16>
    %82 = vector.shape_cast %81 : vector<1x2x2xbf16> to vector<2x2xbf16>
    %83 = arith.truncf %80 : vector<2x64xf32> to vector<2x64xbf16>
    %cst_31 = arith.constant dense<0.000000e+00> : vector<2x64xf32>
    %84 = tpu.matmul %82, %83, %cst_31 {dimension_numbers = #tpu.dot_dimension_numbers<[1], [0], [0], [1], [0, 0, 1, 1], [], []>} : vector<2x2xbf16>, vector<2x64xbf16>, vector<2x64xf32> -> vector<2x64xf32>
    %85 = arith.addf %74, %84 : vector<2x64xf32>
    %86 = vector.extract_strided_slice %10 {offsets = [0, 8], sizes = [2, 56], strides = [1, 1]} : vector<2x64xf32> to vector<2x56xf32>
    %87 = vector.extract_strided_slice %10 {offsets = [0, 0], sizes = [2, 8], strides = [1, 1]} : vector<2x64xf32> to vector<2x8xf32>
    %88 = tpu.concatenate %86, %87 in 1 : vector<2x56xf32>, vector<2x8xf32> -> vector<2x64xf32>
    %89 = vector.extract_strided_slice %2 {offsets = [7, 0], sizes = [1, 64], strides = [1, 1]} : vector<9x64xf32> to vector<1x64xf32>
    %90 = vector.broadcast %89 : vector<1x64xf32> to vector<2x64xf32>
    %91 = arith.mulf %88, %90 : vector<2x64xf32>
    %c7 = arith.constant 7 : index
    %c0_32 = arith.constant 0 : index
    %c0_33 = arith.constant 0 : index
    %92 = vector.load %arg7[%c7, %c0_32, %c0_33] : memref<9x2x2xbf16, #tpu.memory_space<vmem>>, vector<1x2x2xbf16>
    %93 = vector.shape_cast %92 : vector<1x2x2xbf16> to vector<2x2xbf16>
    %94 = arith.truncf %91 : vector<2x64xf32> to vector<2x64xbf16>
    %cst_34 = arith.constant dense<0.000000e+00> : vector<2x64xf32>
    %95 = tpu.matmul %93, %94, %cst_34 {dimension_numbers = #tpu.dot_dimension_numbers<[1], [0], [0], [1], [0, 0, 1, 1], [], []>} : vector<2x2xbf16>, vector<2x64xbf16>, vector<2x64xf32> -> vector<2x64xf32>
    %96 = arith.addf %85, %95 : vector<2x64xf32>
    %97 = vector.extract_strided_slice %10 {offsets = [0, 9], sizes = [2, 55], strides = [1, 1]} : vector<2x64xf32> to vector<2x55xf32>
    %98 = vector.extract_strided_slice %10 {offsets = [0, 0], sizes = [2, 9], strides = [1, 1]} : vector<2x64xf32> to vector<2x9xf32>
    %99 = tpu.concatenate %97, %98 in 1 : vector<2x55xf32>, vector<2x9xf32> -> vector<2x64xf32>
    %100 = vector.extract_strided_slice %2 {offsets = [8, 0], sizes = [1, 64], strides = [1, 1]} : vector<9x64xf32> to vector<1x64xf32>
    %101 = vector.broadcast %100 : vector<1x64xf32> to vector<2x64xf32>
    %102 = arith.mulf %99, %101 : vector<2x64xf32>
    %c8 = arith.constant 8 : index
    %c0_35 = arith.constant 0 : index
    %c0_36 = arith.constant 0 : index
    %103 = vector.load %arg7[%c8, %c0_35, %c0_36] : memref<9x2x2xbf16, #tpu.memory_space<vmem>>, vector<1x2x2xbf16>
    %104 = vector.shape_cast %103 : vector<1x2x2xbf16> to vector<2x2xbf16>
    %105 = arith.truncf %102 : vector<2x64xf32> to vector<2x64xbf16>
    %cst_37 = arith.constant dense<0.000000e+00> : vector<2x64xf32>
    %106 = tpu.matmul %104, %105, %cst_37 {dimension_numbers = #tpu.dot_dimension_numbers<[1], [0], [0], [1], [0, 0, 1, 1], [], []>} : vector<2x2xbf16>, vector<2x64xbf16>, vector<2x64xf32> -> vector<2x64xf32>
    %107 = arith.addf %96, %106 : vector<2x64xf32>
    %c0_38 = arith.constant 0 : index
    %c0_39 = arith.constant 0 : index
    %108 = vector.load %arg8[%c0_38, %c0_39] : memref<2x1xf32, #tpu.memory_space<vmem>>, vector<2x1xf32>
    %109 = vector.broadcast %108 : vector<2x1xf32> to vector<2x64xf32>
    %110 = arith.addf %107, %109 : vector<2x64xf32>
    %cst_40 = arith.constant 0.000000e+00 : f32
    %111 = vector.broadcast %cst_40 : f32 to vector<2x64xf32>
    %112 = arith.maximumf %110, %111 : vector<2x64xf32>
    %c0_41 = arith.constant 0 : index
    %c0_42 = arith.constant 0 : index
    %113 = vector.load %arg9[%c0_41, %c0_42] : memref<4x2xbf16, #tpu.memory_space<vmem>>, vector<4x2xbf16>
    %114 = arith.truncf %112 : vector<2x64xf32> to vector<2x64xbf16>
    %cst_43 = arith.constant dense<0.000000e+00> : vector<4x64xf32>
    %115 = tpu.matmul %113, %114, %cst_43 {dimension_numbers = #tpu.dot_dimension_numbers<[1], [0], [0], [1], [0, 0, 1, 1], [], []>} : vector<4x2xbf16>, vector<2x64xbf16>, vector<4x64xf32> -> vector<4x64xf32>
    %116 = arith.addf %1, %115 : vector<4x64xf32>
    %c0_44 = arith.constant 0 : index
    %c0_45 = arith.constant 0 : index
    %117 = vector.load %arg10[%c0_44, %c0_45] : memref<4x1xf32, #tpu.memory_space<vmem>>, vector<4x1xf32>
    %118 = vector.broadcast %117 : vector<4x1xf32> to vector<4x64xf32>
    %119 = arith.addf %116, %118 : vector<4x64xf32>
    %c0_46 = arith.constant 0 : index
    %c0_47 = arith.constant 0 : index
    %120 = vector.load %arg3[%c0_46, %c0_47] : memref<64x256xf32, #tpu.memory_space<vmem>>, vector<64x256xf32>
    %cst_48 = arith.constant dense<0.000000e+00> : vector<4x256xf32>
    %121 = tpu.matmul %119, %120, %cst_48 {dimension_numbers = #tpu.dot_dimension_numbers<[1], [0], [0], [1], [0, 0, 1, 1], [], []>} : vector<4x64xf32>, vector<64x256xf32>, vector<4x256xf32> -> vector<4x256xf32>
    %c0_49 = arith.constant 0 : index
    %c0_50 = arith.constant 0 : index
    %c0_51 = arith.constant 0 : index
    %122 = vector.load %arg2[%c0_49, %c0_50, %c0_51] : memref<1x4x256xf32, #tpu.memory_space<vmem>>, vector<1x4x256xf32>
    %123 = vector.shape_cast %122 : vector<1x4x256xf32> to vector<4x256xf32>
    %124 = arith.addf %121, %123 : vector<4x256xf32>
    %c0_52 = arith.constant 0 : index
    %c0_53 = arith.constant 0 : index
    %c0_54 = arith.constant 0 : index
    %125 = vector.load %arg11[%c0_52, %c0_53, %c0_54] : memref<1x4x256xf32, #tpu.memory_space<vmem>>, vector<1x4x256xf32>
    %126 = vector.shape_cast %125 : vector<1x4x256xf32> to vector<4x256xf32>
    %127 = vector.shape_cast %124 : vector<4x256xf32> to vector<1x4x256xf32>
    tpu.vector_store %arg11[%c0_52, %c0_53, %c0_54], %127 {strides = array<i32>} : memref<1x4x256xf32, #tpu.memory_space<vmem>>, vector<1x4x256xf32>,
    return
  }
  func.func @transform_0(%arg0: i32) -> (i32, i32, i32) {
    %c0_i32 = arith.constant 0 : i32
    %c0_i32_0 = arith.constant 0 : i32
    %c0_i32_1 = arith.constant 0 : i32
    return %arg0, %c0_i32, %c0_i32_0 : i32, i32, i32
  }
  func.func @transform_1(%arg0: i32) -> (i32, i32, i32) {
    %c0_i32 = arith.constant 0 : i32
    %c0_i32_0 = arith.constant 0 : i32
    %c0_i32_1 = arith.constant 0 : i32
    return %arg0, %c0_i32, %c0_i32_0 : i32, i32, i32
  }
  func.func @transform_2(%arg0: i32) -> (i32, i32) {
    %c0_i32 = arith.constant 0 : i32
    %c0_i32_0 = arith.constant 0 : i32
    %c0_i32_1 = arith.constant 0 : i32
    return %c0_i32, %c0_i32_0 : i32, i32
  }
  func.func @transform_3(%arg0: i32) -> (i32, i32) {
    %c0_i32 = arith.constant 0 : i32
    %c0_i32_0 = arith.constant 0 : i32
    %c0_i32_1 = arith.constant 0 : i32
    return %c0_i32, %c0_i32_0 : i32, i32
  }
  func.func @transform_4(%arg0: i32) -> (i32, i32) {
    %c0_i32 = arith.constant 0 : i32
    %c0_i32_0 = arith.constant 0 : i32
    %c0_i32_1 = arith.constant 0 : i32
    return %c0_i32, %c0_i32_0 : i32, i32
  }
  func.func @transform_5(%arg0: i32) -> (i32, i32) {
    %c0_i32 = arith.constant 0 : i32
    %c0_i32_0 = arith.constant 0 : i32
    %c0_i32_1 = arith.constant 0 : i32
    return %c0_i32, %c0_i32_0 : i32, i32
  }
  func.func @transform_6(%arg0: i32) -> (i32, i32, i32) {
    %c0_i32 = arith.constant 0 : i32
    %c0_i32_0 = arith.constant 0 : i32
    %c0_i32_1 = arith.constant 0 : i32
    %c0_i32_2 = arith.constant 0 : i32
    return %c0_i32, %c0_i32_0, %c0_i32_1 : i32, i32, i32
  }
  func.func @transform_7(%arg0: i32) -> (i32, i32) {
    %c0_i32 = arith.constant 0 : i32
    %c0_i32_0 = arith.constant 0 : i32
    %c0_i32_1 = arith.constant 0 : i32
    return %c0_i32, %c0_i32_0 : i32, i32
  }
  func.func @transform_8(%arg0: i32) -> (i32, i32) {
    %c0_i32 = arith.constant 0 : i32
    %c0_i32_0 = arith.constant 0 : i32
    %c0_i32_1 = arith.constant 0 : i32
    return %c0_i32, %c0_i32_0 : i32, i32
  }
  func.func @transform_9(%arg0: i32) -> (i32, i32) {
    %c0_i32 = arith.constant 0 : i32
    %c0_i32_0 = arith.constant 0 : i32
    %c0_i32_1 = arith.constant 0 : i32
    return %c0_i32, %c0_i32_0 : i32, i32
  }
  func.func @transform_10(%arg0: i32) -> (i32, i32, i32) {
    %c0_i32 = arith.constant 0 : i32
    %c0_i32_0 = arith.constant 0 : i32
    %c0_i32_1 = arith.constant 0 : i32
    return %arg0, %c0_i32, %c0_i32_0 : i32, i32, i32
  }
}

</mosaic_0001>

<bundles_post_ra>
// kernel: hourglass_forward.8
= control target key start
LH: loop header
LB: loop body
LE: loop exit
PB: predicated region body
PF: predicated region fallthrough
CT: control target
= control target key end

     0   :  { %14 = vsyncpa [#allocation3], 0  ;;  %s1556_s30 = smov 0   ;;  %s1837_s0 = inlined_call_operand.vmem [shape: f32[2,4,256], index: 0, kind: input, shape index: {}]   ;;  %s1838_s1 = inlined_call_operand.vmem [shape: f32[256,64], index: 1, kind: input, shape index: {}]   ;;  %s1839_s2 = inlined_call_operand.hbm [shape: f32[9,64], index: 2, kind: input, shape index: {}]   ;;  %s1840_s3 = inlined_call_operand.vmem [shape: bf16[2,4], index: 3, kind: input, shape index: {}]   ;;  %s1841_s4 = inlined_call_operand.vmem [shape: f32[2,1], index: 4, kind: input, shape index: {}]   ;;  %s1842_s5 = inlined_call_operand.vmem [shape: bf16[9,2,2], index: 5, kind: input, shape index: {}]   ;;  %s1843_s6 = inlined_call_operand.vmem [shape: f32[2,1], index: 6, kind: input, shape index: {}]   ;;  %s1844_s7 = inlined_call_operand.vmem [shape: bf16[4,2], index: 7, kind: input, shape index: {}]   ;;  %s1845_s8 = inlined_call_operand.vmem [shape: f32[4,1], index: 8, kind: input, shape index: {}]   ;;  %s1846_s9 = inlined_call_operand.vmem [shape: f32[2,4,64], index: 9, kind: output, shape index: {}]  }
   0x1 LB: > { %s1243_s10 = sadd.s32 4294967295, %s1480_s30   ;;  %p1245_p0 = scmp.ge.s32.totalorder %s1480_s30, 1  ;;  %s1480_s30 = sphi %s1556_s30, %s20_s30  }
   0x2   : > { %p245_p1 = scmp.lt.s32.totalorder %s1480_s30, 3  ;;  %s1482_s11 = smov [#allocation2]  }
   0x3   : > { %s260_s12 = sshll.u32 %s1482_s11, 4  ;;  %p1407_p3 = scmp.eq.s32.totalorder %s1243_s10, 0  ;;  %s261_s12 = int_to_ptr.vmem [resolvable:$true] %s260_s12 }
   0x4   : > { %p1564_p2 = pnand %p1245_p0, %p245_p1  ;;  %s1455_s14 = scalar_lea.vmem %s261_s12, 256 }
   0x5   : > { %p1456_p7 = scmp.ne.s32.totalorder %s261_s12, %s1455_s14  ;;  %p1463_p10 = scmp.lt.s32.totalorder %s261_s12, %s261_s12 }
   0x6   : > { %p1403_p4 = pneg %p1564_p2  ;;  %p1464_p11 = scmp.lt.s32.totalorder %s1455_s14, %s1455_s14 }
   0x8   : > { %p1404_p5 = pnand %p1407_p3, %p1403_p4  ;;  %p1465_p12 = por %p1464_p11, %p1463_p10 }
   0xa   : > { %p1446_p6 = pneg %p1404_p5 }
   0xc   : > { %p1458_p8 = pnand %p1456_p7, %p1446_p6 }
   0xe   : > { %p1459_p9 = pneg %p1458_p8 }
  0x10   : > { %p1466_p13 = pnand %p1465_p12, %p1459_p9 }
  0x12   : > { %1469 = shalt.err (!%p1466_p13)
}
  0x13   : > { %s1483_s15 = smov 128   ;;  %s1484_s16 = smov 8  }
  0x14   : > { %1406 = dma.hbm_to_vmem [thread:$0]  (!%p1404_p5), %s1839_s2, 256, %s261_s12, [#allocation3], %s1483_s15, %s1483_s15, %s1484_s16  }
  0x15   : > { %302 = sbr.rel (%p1564_p2) target bundleno = 1136 (0x470), region = 56 }
  0x1a   : > { %1475 = dma.done.wait (%p1407_p3), [#allocation3], 256  }
  0x1b   : > { %1477 = vsyncadd (%p1407_p3), [#allocation3], 4294967040  ;;  %p337_p0 = scmp.lt.s32.totalorder %s1243_s10, 1  ;;  %v420_v1 = vld [vmem:[%s1838_s1 + $0xf8] sm:$0xff]  ;;  %s1485_s27 = smov 112   ;;  %v419_v4 = vld [vmem:[%s1838_s1 + $0xf0] sm:$0xff] }
  0x1c   : > { %v404_v2 = vld [vmem:[%s1838_s1 + $0x78] sm:$0xff]  ;;  %s1486_s28 = smov 127   ;;  %1276 = vmatprep.subr.mxu0 %v420_v1  ;;  %v403_v5 = vld [vmem:[%s1838_s1 + $0x70] sm:$0xff]  ;;  %v418_v6 = vld [vmem:[%s1838_s1 + $0xe8] sm:$0xff]  ;;  %vm367_vm0 = vcmask 916480   ;;  %vm354_vm1 = vcmask 1039360  }
  0x1d   : > { %s1849_s10 = smov (!%p337_p0, %s1243_s10), 1  ;;  %1277 = vmatpush3.msra.mxu0 %v404_v2  ;;  %v402_v7 = vld [vmem:[%s1838_s1 + $0x68] sm:$0xff]  ;;  %v417_v8 = vld [vmem:[%s1838_s1 + $0xe0] sm:$0xff]  ;;  %v416_v10 = vld [vmem:[%s1838_s1 + $0xd8] sm:$0xff]  ;;  %vm380_vm2 = vcmask 908288   ;;  %v1488_v53 = vmov 0.0  }
  0x1e   : > { %s1275_s19 = sshll.u32 %s1849_s10, 3  ;;  %1278 = vmatprep.subr.mxu0 %v419_v4  ;;  %v401_v9 = vld [vmem:[%s1838_s1 + $0x60] sm:$0xff]  ;;  %v400_v11 = vld [vmem:[%s1838_s1 + $0x58] sm:$0xff]  ;;  %v415_v12 = vld [vmem:[%s1838_s1 + $0xd0] sm:$0xff]  ;;  %1333 = vmatprep.subr.bf16.mxu1 %v1488_v53  ;;  %vm1489_vm3 = vmmov 0   ;;  %v1490_v55 = vmov 0  }
  0x1f   : > { %s341_s22 = scalar_lea.vmem %s1837_s0, %s1275_s19  ;;  %1279 = vmatpush3.msra.mxu0 %v403_v5  ;;  %v399_v13 = vld [vmem:[%s1838_s1 + $0x50] sm:$0xff]  ;;  %v414_v14 = vld [vmem:[%s1838_s1 + $0xc8] sm:$0xff]  ;;  %v413_v16 = vld [vmem:[%s1838_s1 + $0xc0] sm:$0xff]  ;;  %1335 = vmatprep.mubr.msk.bf16.mxu1 %vm1489_vm3, %v1488_v53  ;;  %vm508_vm4 = vcmask 1041408   ;;  %vm504_vm5 = vcmask 31744   ;;  %s1491_s21 = smov 73  }
  0x20   : > { %v1584_v0 = vld [vmem:[%s341_s22] sm:$0xff]  ;;  %1280 = vmatprep.subr.mxu0 %v418_v6  ;;  %s1487_s22 = smov 111   ;;  %v398_v15 = vld [vmem:[%s1838_s1 + $0x48] sm:$0xff]  ;;  %v412_v18 = vld [vmem:[%s1838_s1 + $0xb8] sm:$0xff]  ;;  %1441 = vset.pattern.permute.xlu0 %v1490_v55  ;;  %s1493_s23 = smov 71   ;;  %v562_v6 = vlaneseq  ;;  %vm575_vm6 = vcmask 64512  }
  0x21   : > { %363 = vrot.lane.b32.xlu1 %v1584_v0, %s1485_s27  ;;  %350 = vrot.lane.b32.xlu0 %v1584_v0, %s1486_s28  ;;  %v349_v3 = vcombine.high %v1584_v0, %v1584_v0  ;;  %v397_v17 = vld [vmem:[%s1838_s1 + $0x40] sm:$0xff]  ;;  %v396_v19 = vld [vmem:[%s1838_s1 + $0x38] sm:$0xff]  ;;  %s1494_s24 = smov 8   ;;  %s1495_s25 = smov 65   ;;  %vm560_vm7 = vcmask 72704   ;;  %vm589_vm8 = vcmask 1040384  }
  0x22   : > { %1281 = vmatpush3.msra.mxu0 %v402_v7  ;;  %v411_v20 = vld [vmem:[%s1838_s1 + $0xb0] sm:$0xff]  ;;  %v410_v22 = vld [vmem:[%s1838_s1 + $0xa8] sm:$0xff]  ;;  %v409_v24 = vld [vmem:[%s1838_s1 + $0xa0] sm:$0xff]  ;;  %1442 = vset.pattern.permute.xlu1 %v1490_v55  ;;  %s1496_s26 = smov 9   ;;  %s1498_s29 = smov 121   ;;  %v1731_v7 = vshrl.u32 %v562_v6, 7 }
  0x23   : > { %1282 = vmatprep.subr.mxu0 %v417_v8  ;;  %v395_v21 = vld [vmem:[%s1838_s1 + $0x30] sm:$0xff]  ;;  %v394_v23 = vld [vmem:[%s1838_s1 + $0x28] sm:$0xff]  ;;  %v393_v25 = vld [vmem:[%s1838_s1 + $0x20] sm:$0xff]  ;;  %s1499_s11 = smov 1   ;;  %s1500_s12 = smov 120   ;;  %vm685_vm9 = vcmask 56320  }
  0x24   : > { %1283 = vmatpush3.msra.mxu0 %v401_v9  ;;  %v408_v26 = vld [vmem:[%s1838_s1 + $0x98] sm:$0xff]  ;;  %v407_v28 = vld [vmem:[%s1838_s1 + $0x90] sm:$0xff]  ;;  %v406_v30 = vld [vmem:[%s1838_s1 + $0x88] sm:$0xff]  ;;  %s1501_s13 = smov 63   ;;  %s1502_s14 = smov 119   ;;  %v579_v8 = vsub.s32 1, %v1731_v7 }
  0x25   : > { %365 = vrot.lane.b32.xlu1 %v349_v3, %s1485_s27  ;;  %352 = vrot.lane.b32.xlu0 %v349_v3, %s1486_s28  ;;  %v392_v27 = vld [vmem:[%s1838_s1 + $0x18] sm:$0xff]  ;;  %v391_v29 = vld [vmem:[%s1838_s1 + $0x10] sm:$0xff]  ;;  %s1497_s27 = smov 7   ;;  %s1503_s15 = smov 57   ;;  %vm585_vm10 = vcmask 15360   ;;  %vm748_vm11 = vcmask 7168  }
  0x26   : > { %1284 = vmatprep.subr.mxu0 %v416_v10  ;;  %v390_v31 = vld [vmem:[%s1838_s1 + $0x8] sm:$0xff]  ;;  %v405_v32 = vld [vmem:[%s1838_s1 + $0x80] sm:$0xff]  ;;  %s1504_s17 = smov 56   ;;  %s1505_s18 = smov 55   ;;  %vm866_vm12 = vcmask 515072   ;;  %v996_v55 = vsub.s32 7, %v1731_v7 }
  0x27   : > { %1285 = vmatpush3.msra.mxu0 %v400_v11  ;;  %v389_v33 = vld [vmem:[%s1838_s1] sm:$0xff]  ;;  %vm929_vm13 = vcmask 465920   ;;  %vm992_vm14 = vcmask 457728   ;;  %vm1055_vm15 = vcmask 449536  }
  0x28   : > { %1286 = vmatprep.subr.mxu0 %v415_v12  ;;  %v498_v54 = vld [vmem:[%s1841_s4] sm:$0x3] }
  0x29   : > { %378 = vrot.lane.b32.xlu1 %v349_v3, %s1487_s22  ;;  %376 = vrot.lane.b32.xlu0 %v1584_v0, %s1487_s22  ;;  %v496_v61 = vld [vmem:[%s1840_s3] sm:$0x1]  ;;  %s1492_s22 = smov 72  }
  0x2a   : > { %1287 = vmatpush3.msra.mxu0 %v399_v13  ;;  %v1112_v5 = vld [vmem:[%s1843_s6] sm:$0x3]  ;;  %v564_v13 = vsub.s32 0, %v1731_v7 }
  0x2b   : > { %1288 = vmatprep.subr.mxu0 %v414_v14  ;;  %v1734_v11 = vld [vmem:[#allocation2] sm:$0xff] }
  0x2c   : > { %1289 = vmatpush3.msra.mxu0 %v398_v15  ;;  %v580_v12 = vrot.slane %v1734_v11, %v579_v8  ;;  %v1263_v8 = vld [vmem:[%s1842_s5 + $0x5] sm:$0x1] }
  0x2d   : > { %1290 = vmatprep.subr.mxu0 %v413_v16  ;;  %501 = vperm.xlu0 %1441, %v498_v54  }
  0x2e   : > { %1291 = vmatpush3.msra.mxu0 %v397_v17 }
  0x2f   : > { %1292 = vmatprep.subr.mxu0 %v412_v18  ;;  %v565_v18 = vrot.slane %v1734_v11, %v564_v13 }
  0x30   : > { %1293 = vmatpush3.msra.mxu0 %v396_v19  ;;  %v689_v19 = vsub.s32 2, %v1731_v7 }
  0x31   : > { %1294 = vmatprep.subr.mxu0 %v411_v20 }
  0x32   : > { %1295 = vmatpush3.msra.mxu0 %v395_v21 }
  0x33   : > { %1296 = vmatprep.subr.mxu0 %v410_v22 }
  0x34   : > { %1297 = vmatpush3.msra.mxu0 %v394_v23 }
  0x35   : > { %1298 = vmatprep.subr.mxu0 %v409_v24 }
  0x36   : > { %1299 = vmatpush3.msra.mxu0 %v393_v25 }
  0x37   : > { %1300 = vmatprep.subr.mxu0 %v408_v26  ;;  %v690_v26 = vrot.slane %v1734_v11, %v689_v19  ;;  %v1267_v19 = vld [vmem:[%s1842_s5 + $0x7] sm:$0x1] }
  0x38   : > { %1301 = vmatpush3.msra.mxu0 %v392_v27  ;;  %v752_v27 = vsub.s32 3, %v1731_v7 }
  0x39   : > { %1302 = vmatprep.subr.mxu0 %v407_v28  ;;  %v1254_v28 = vld [vmem:[%s1842_s5 + $0x1] sm:$0x1] }
  0x3a   : > { %1303 = vmatpush3.msra.mxu0 %v391_v29 }
  0x3b   : > { %1304 = vmatprep.subr.mxu0 %v406_v30 }
  0x3c   : > { %1305 = vmatpush3.msra.mxu0 %v390_v31 }
  0x3d   : > { %1306 = vmatprep.subr.mxu0 %v405_v32  ;;  %v807_v32 = vsub.s32 4, %v1731_v7 }
  0x3e   : > { %1307 = vmatpush3.msra.mxu0 %v389_v33 }
  0x3f   : > { %1357 = vmatprep.subr.bf16.mxu0 %v1488_v53 }
  0x93   : > { %v364_v34 = vpop.permute.xlu1 %363  ;;  %v351_v35 = vpop.permute.xlu0 %350 }
  0x97   : > { %v366_v36 = vpop.permute.xlu1 %365  ;;  %v353_v37 = vpop.permute.xlu0 %352 }
  0x98   : > { %v368_v38 = vsel %vm367_vm0, %v364_v34, %v366_v36  ;;  %v371_v39 = vsel %vm367_vm0, %v366_v36, %v364_v34  ;;  %v355_v40 = vsel %vm354_vm1, %v351_v35, %v353_v37  ;;  %v358_v41 = vsel %vm354_vm1, %v353_v37, %v351_v35 }
  0x99   : > { %v360_v42 = vcombine.low %v355_v40, %v358_v41  ;;  %v373_v43 = vcombine.low %v368_v38, %v371_v39  ;;  %v753_v35 = vrot.slane %v1734_v11, %v752_v27  ;;  %v870_v36 = vsub.s32 5, %v1731_v7 }
  0x9a   : > { %v808_v40 = vrot.slane %v1734_v11, %v807_v32  ;;  %vm1176_vm0 = vcmask 519168  }
  0x9b   : > { %v362_v44 = vmax.f32 %v1584_v0, %v360_v42  ;;  %v379_v45 = vpop.permute.xlu1 %378  ;;  %v377_v46 = vpop.permute.xlu0 %376 }
  0x9c   : > { %v381_v47 = vsel %vm380_vm2, %v377_v46, %v379_v45  ;;  %v384_v48 = vsel %vm380_vm2, %v379_v45, %v377_v46 }
  0x9d   : > { %v386_v49 = vcombine.low %v381_v47, %v384_v48  ;;  %v375_v50 = vmax.f32 %v362_v44, %v373_v43  ;;  %v871_v43 = vrot.slane %v1734_v11, %v870_v36  ;;  %v567_v44 = vld [vmem:[%s1842_s5] sm:$0x1]  ;;  %v933_v48 = vsub.s32 6, %v1731_v7 }
  0x9f   : > { %v388_v51 = vmax.f32 %v375_v50, %v386_v49 }
  0xa1   : > { %v422_v52 = vcombine.high %v388_v51, %v388_v51 }
  0xa3   : > { %488 = vmatprep.mubr.f32.mxu0 %v422_v52 }
  0xa4   : > { %489 = vmatmul.mubr.f32.vlgmr.msra.gmra.mxu0 %v388_v51 }
  0xa5   : > { %1359 = vmatprep.mubr.msk.bf16.mxu0 %vm1489_vm3, %v1488_v53 }
  0xa8   : > { %v502_v62 = vpop.permute.xlu0 %501 }
 0x164   : > { %v1308_v56 = vpop.f32.mrf.mxu0 }
 0x166   : > { %v1309_v57 = vpop.f32.mrf.mxu0 }
 0x167   : > { %v1699_v58 = vadd.f32 %v1309_v57, %v1308_v56  ;;  %v1259_v56 = vld [vmem:[%s1842_s5 + $0x3] sm:$0x1] }
 0x169   : > { %v497_v59 = vpack.c.bf16 %v1699_v58, %v1699_v58 }
 0x16b   : > { %v510_v60 = vsel %vm508_vm4, %v497_v59, 0 }
 0x16c   : > { %1334 = vmatpush3.bf16.msra.mxu1 %v510_v60 }
 0x16d   : > { %1339 = vmatprep.subr.bf16.mxu1 %v1488_v53 }
 0x16f   : > { %1336 = vmatmul.mubr.msk.bf16.vlgmr.msra.gmra.mxu1 %vm504_vm5, %v496_v61  ;;  %v934_v61 = vrot.slane %v1734_v11, %v933_v48 }
 0x170   : > { %1341 = vmatprep.mubr.msk.bf16.mxu1 %vm1489_vm3, %v1488_v53 }
 0x22f   : > { %v546_v63 = vpop.f32.mrf.mxu1 }
 0x230   : > { %v547_v0 = vadd.f32 %v546_v63, %v502_v62  ;;  %v997_v63 = vrot.slane %v1734_v11, %v996_v55 }
 0x231   : > { %v1337_v1 = vpop.f32.mrf.mxu1 }
 0x232   : > { %v1709_v2 = vmax.f32 %v547_v0, 0.0  ;;  %v1257_v1 = vld [vmem:[%s1842_s5 + $0x2] sm:$0x1] }
 0x233   : > { %v549_v3 = vpop.f32.mrf.mxu1 }
 0x234   : > { %554 = vrot.lane.b32.xlu0 %v1709_v2, %s1491_s21  ;;  %569 = vrot.lane.b32.xlu1 %v1709_v2, %s1492_s22  ;;  %v809_v49 = vmul.f32 %v808_v40, %v1709_v2  ;;  %s1252_s22 = sshll.u32 %s1849_s10, 2 }
 0x235   : > { %v1338_v4 = vpop.f32.mrf.mxu1 }
 0x236   : > { %v812_v60 = vpack.c.bf16 %v809_v49, %v809_v49 }
 0x238   : > { %679 = vrot.lane.b32.xlu0 %v1709_v2, %s1493_s23  ;;  %572 = vrot.lane.b32.xlu1 %v1709_v2, %s1494_s24  ;;  %v817_v7 = vsel %vm589_vm8, %v812_v60, 0 }
 0x23c   : > { %742 = vrot.lane.b32.xlu0 %v1709_v2, %s1495_s25  ;;  %557 = vrot.lane.b32.xlu1 %v1709_v2, %s1496_s26  ;;  %s345_s25 = scalar_lea.vmem %s1846_s9, %s1252_s22 }
 0x240   : > { %860 = vrot.lane.b32.xlu0 %v1709_v2, %s1486_s28  ;;  %682 = vrot.lane.b32.xlu1 %v1709_v2, %s1497_s27 }
 0x244   : > { %923 = vrot.lane.b32.xlu0 %v1709_v2, %s1498_s29  ;;  %745 = vrot.lane.b32.xlu1 %v1709_v2, %s1499_s11 }
 0x248   : > { %986 = vrot.lane.b32.xlu0 %v1709_v2, %s1500_s12  ;;  %863 = vrot.lane.b32.xlu1 %v1709_v2, %s1501_s13 }
 0x24c   : > { %1049 = vrot.lane.b32.xlu0 %v1709_v2, %s1502_s14  ;;  %926 = vrot.lane.b32.xlu1 %v1709_v2, %s1503_s15 }
 0x250   : > { %1115 = vperm.xlu0 %1441, %v1112_v5   ;;  %989 = vrot.lane.b32.xlu1 %v1709_v2, %s1504_s17 }
 0x254   : > { %1052 = vrot.lane.b32.xlu1 %v1709_v2, %s1505_s18 }
 0x2a6   : > { %v555_v9 = vpop.permute.xlu0 %554  ;;  %v570_v10 = vpop.permute.xlu1 %569 }
 0x2aa   : > { %v680_v14 = vpop.permute.xlu0 %679  ;;  %v573_v15 = vpop.permute.xlu1 %572 }
 0x2ab   : > { %v576_v16 = vsel %vm575_vm6, %v570_v10, %v573_v15 }
 0x2ac   : > { %v581_v17 = vmul.f32 %v580_v12, %v576_v16  ;;  %v1261_v16 = vld [vmem:[%s1842_s5 + $0x4] sm:$0x1] }
 0x2ae   : > { %v584_v20 = vpack.c.bf16 %v581_v17, %v581_v17  ;;  %v558_v21 = vpop.permute.xlu1 %557  ;;  %v743_v23 = vpop.permute.xlu0 %742 }
 0x2af   : > { %v561_v22 = vsel %vm560_vm7, %v555_v9, %v558_v21  ;;  %v1265_v21 = vld [vmem:[%s1842_s5 + $0x6] sm:$0x1] }
 0x2b0   : > { %v566_v24 = vmul.f32 %v565_v18, %v561_v22  ;;  %v591_v25 = vsel %vm589_vm8, %v584_v20, 0 }
 0x2b1   : > { %1340 = vmatpush3.bf16.msra.mxu1 %v591_v25 }
 0x2b2   : > { %v568_v29 = vpack.c.bf16 %v566_v24, %v566_v24  ;;  %v683_v30 = vpop.permute.xlu1 %682  ;;  %1345 = vmatprep.subr.bf16.mxu1 %v1488_v53  ;;  %v861_v37 = vpop.permute.xlu0 %860  ;;  %v1169_v24 = vld [vmem:[%s1845_s8] sm:$0xf] }
 0x2b3   : > { %v686_v31 = vsel %vm685_vm9, %v680_v14, %v683_v30  ;;  %v1269_v14 = vld [vmem:[#allocation2 + $0x8] ss:$0 sm:$0xff]  ;;  %1172 = vperm.xlu1 %1442, %v1169_v24  }
 0x2b4   : > { %v691_v33 = vmul.f32 %v690_v26, %v686_v31  ;;  %1342 = vmatmul.mubr.msk.bf16.vlgmr.msra.gmra.mxu1 %vm585_vm10, %v1254_v28  ;;  %v637_v34 = vsel %vm589_vm8, %v568_v29, 0 }
 0x2b5   : > { %1346 = vmatpush3.bf16.msra.mxu1 %v637_v34  ;;  %1347 = vmatprep.mubr.msk.bf16.mxu1 %vm1489_vm3, %v1488_v53 }
 0x2b6   : > { %v746_v38 = vpop.permute.xlu1 %745  ;;  %1351 = vmatprep.subr.bf16.mxu1 %v1488_v53  ;;  %v694_v41 = vpack.c.bf16 %v691_v33, %v691_v33  ;;  %v924_v50 = vpop.permute.xlu0 %923 }
 0x2b7   : > { %v749_v39 = vsel %vm748_vm11, %v743_v23, %v746_v38  ;;  %v1270_v23 = vld [vmem:[%s1842_s5 + $0x8] sm:$0x1] }
 0x2b8   : > { %v754_v42 = vmul.f32 %v753_v35, %v749_v39  ;;  %v699_v52 = vsel %vm589_vm8, %v694_v41, 0 }
 0x2ba   : > { %v757_v45 = vpack.c.bf16 %v754_v42, %v754_v42  ;;  %v864_v46 = vpop.permute.xlu1 %863  ;;  %v987_v2 = vpop.permute.xlu0 %986 }
 0x2bb   : > { %v867_v47 = vsel %vm866_vm12, %v861_v37, %v864_v46 }
 0x2bc   : > { %v872_v51 = vmul.f32 %v871_v43, %v867_v47  ;;  %1348 = vmatmul.mubr.msk.bf16.vlgmr.msra.gmra.mxu1 %vm585_vm10, %v567_v44  ;;  %v762_v54 = vsel %vm589_vm8, %v757_v45, 0 }
 0x2bd   : > { %1352 = vmatpush3.bf16.msra.mxu1 %v699_v52  ;;  %1358 = vmatpush3.bf16.msra.mxu0 %v762_v54 }
 0x2be   : > { %v875_v57 = vpack.c.bf16 %v872_v51, %v872_v51  ;;  %v927_v59 = vpop.permute.xlu1 %926  ;;  %1369 = vmatprep.subr.bf16.mxu0 %v1488_v53  ;;  %1353 = vmatprep.mubr.msk.bf16.mxu1 %vm1489_vm3, %v1488_v53  ;;  %v1050_v11 = vpop.permute.xlu0 %1049 }
 0x2bf   : > { %1363 = vmatprep.subr.bf16.mxu1 %v1488_v53  ;;  %v930_v0 = vsel %vm929_vm13, %v924_v50, %v927_v59 }
 0x2c0   : > { %1360 = vmatmul.mubr.msk.bf16.vlgmr.msra.gmra.mxu0 %vm585_vm10, %v1259_v56  ;;  %v880_v62 = vsel %vm589_vm8, %v875_v57, 0  ;;  %v935_v5 = vmul.f32 %v934_v61, %v930_v0 }
 0x2c1   : > { %1370 = vmatpush3.bf16.msra.mxu0 %v880_v62  ;;  %1371 = vmatprep.mubr.msk.bf16.mxu0 %vm1489_vm3, %v1488_v53 }
 0x2c2   : > { %v990_v3 = vpop.permute.xlu1 %989  ;;  %1381 = vmatprep.subr.bf16.mxu0 %v1488_v53  ;;  %v938_v12 = vpack.c.bf16 %v935_v5, %v935_v5 }
 0x2c3   : > { %v993_v4 = vsel %vm992_vm14, %v987_v2, %v990_v3 }
 0x2c4   : > { %v998_v6 = vmul.f32 %v997_v63, %v993_v4  ;;  %1354 = vmatmul.mubr.msk.bf16.vlgmr.msra.gmra.mxu1 %vm585_vm10, %v1257_v1  ;;  %v943_v18 = vsel %vm589_vm8, %v938_v12, 0 }
 0x2c5   : > { %1364 = vmatpush3.bf16.msra.mxu1 %v817_v7  ;;  %1365 = vmatprep.mubr.msk.bf16.mxu1 %vm1489_vm3, %v1488_v53 }
 0x2c6   : > { %v1001_v9 = vpack.c.bf16 %v998_v6, %v998_v6  ;;  %v1053_v10 = vpop.permute.xlu1 %1052  ;;  %1375 = vmatprep.subr.bf16.mxu1 %v1488_v53 }
 0x2c7   : > { %v1056_v15 = vsel %vm1055_vm15, %v1050_v11, %v1053_v10  ;;  %v1120_v11 = vld [vmem:[%s1844_s7] sm:$0x3] }
 0x2c8   : > { %1372 = vmatmul.mubr.msk.bf16.vlgmr.msra.gmra.mxu0 %vm585_vm10, %v1263_v8  ;;  %v1006_v13 = vsel %vm589_vm8, %v1001_v9, 0  ;;  %v1061_v17 = vmul.f32 %v1269_v14, %v1056_v15 }
 0x2c9   : > { %1382 = vmatpush3.bf16.msra.mxu0 %v1006_v13  ;;  %1383 = vmatprep.mubr.msk.bf16.mxu0 %vm1489_vm3, %v1488_v53 }
 0x2ca   : > { %1393 = vmatprep.subr.bf16.mxu0 %v1488_v53  ;;  %v1064_v20 = vpack.c.bf16 %v1061_v17, %v1061_v17 }
 0x2cb   : > { %v1116_v3 = vpop.permute.xlu0 %1115 }
 0x2cc   : > { %1366 = vmatmul.mubr.msk.bf16.vlgmr.msra.gmra.mxu1 %vm585_vm10, %v1261_v16  ;;  %v1069_v22 = vsel %vm589_vm8, %v1064_v20, 0 }
 0x2cd   : > { %1376 = vmatpush3.bf16.msra.mxu1 %v943_v18  ;;  %1377 = vmatprep.mubr.msk.bf16.mxu1 %vm1489_vm3, %v1488_v53 }
 0x2ce   : > { %1387 = vmatprep.subr.bf16.mxu1 %v1488_v53 }
 0x2d0   : > { %1384 = vmatmul.mubr.msk.bf16.vlgmr.msra.gmra.mxu0 %vm585_vm10, %v1267_v19 }
 0x2d1   : > { %1395 = vmatprep.mubr.msk.bf16.mxu0 %vm1489_vm3, %v1488_v53 }
 0x2d4   : > { %1378 = vmatmul.mubr.msk.bf16.vlgmr.msra.gmra.mxu1 %vm585_vm10, %v1265_v21 }
 0x2d5   : > { %1388 = vmatpush3.bf16.msra.mxu1 %v1069_v22  ;;  %1389 = vmatprep.mubr.msk.bf16.mxu1 %vm1489_vm3, %v1488_v53 }
 0x2dc   : > { %1390 = vmatmul.mubr.msk.bf16.vlgmr.msra.gmra.mxu1 %vm585_vm10, %v1270_v23 }
 0x32e   : > { %v1173_v13 = vpop.permute.xlu1 %1172 }
 0x374   : > { %v627_v25 = vpop.f32.mrf.mxu1 }
 0x376   : > { %v1343_v26 = vpop.f32.mrf.mxu1 }
 0x378   : > { %v630_v27 = vpop.f32.mrf.mxu1 }
 0x37a   : > { %v1344_v28 = vpop.f32.mrf.mxu1 }
 0x37c   : > { %v673_v29 = vpop.f32.mrf.mxu1 }
 0x37d   : > { %v674_v40 = vadd.f32 %v673_v29, %v627_v25 }
 0x37e   : > { %v1349_v30 = vpop.f32.mrf.mxu1 }
 0x380   : > { %v676_v31 = vpop.f32.mrf.mxu1  ;;  %v798_v32 = vpop.f32.mrf.mxu0 }
 0x382   : > { %v1350_v53 = vpop.f32.mrf.mxu1  ;;  %v1361_v33 = vpop.f32.mrf.mxu0 }
 0x384   : > { %v735_v34 = vpop.f32.mrf.mxu1  ;;  %v801_v35 = vpop.f32.mrf.mxu0 }
 0x385   : > { %v741_v43 = vadd.f32 %v735_v34, %v674_v40 }
 0x386   : > { %v1355_v36 = vpop.f32.mrf.mxu1  ;;  %v1362_v37 = vpop.f32.mrf.mxu0 }
 0x387   : > { %v804_v48 = vadd.f32 %v798_v32, %v741_v43 }
 0x388   : > { %v738_v38 = vpop.f32.mrf.mxu1  ;;  %v916_v39 = vpop.f32.mrf.mxu0 }
 0x38a   : > { %v1356_v41 = vpop.f32.mrf.mxu1  ;;  %v1373_v42 = vpop.f32.mrf.mxu0 }
 0x38c   : > { %v853_v44 = vpop.f32.mrf.mxu1  ;;  %v919_v45 = vpop.f32.mrf.mxu0 }
 0x38d   : > { %v859_v51 = vadd.f32 %v853_v44, %v804_v48 }
 0x38e   : > { %v1367_v46 = vpop.f32.mrf.mxu1  ;;  %v1374_v47 = vpop.f32.mrf.mxu0 }
 0x38f   : > { %v922_v57 = vadd.f32 %v916_v39, %v859_v51 }
 0x390   : > { %v856_v49 = vpop.f32.mrf.mxu1  ;;  %v1042_v50 = vpop.f32.mrf.mxu0 }
 0x392   : > { %v1368_v52 = vpop.f32.mrf.mxu1  ;;  %v1385_v54 = vpop.f32.mrf.mxu0 }
 0x394   : > { %v979_v55 = vpop.f32.mrf.mxu1  ;;  %v1045_v56 = vpop.f32.mrf.mxu0 }
 0x395   : > { %v985_v61 = vadd.f32 %v979_v55, %v922_v57 }
 0x396   : > { %v1379_v59 = vpop.f32.mrf.mxu1  ;;  %v1386_v60 = vpop.f32.mrf.mxu0 }
 0x397   : > { %v1048_v0 = vadd.f32 %v1042_v50, %v985_v61 }
 0x398   : > { %v982_v62 = vpop.f32.mrf.mxu1 }
 0x39a   : > { %v1380_v63 = vpop.f32.mrf.mxu1 }
 0x39c   : > { %v1105_v1 = vpop.f32.mrf.mxu1 }
 0x39d   : > { %v1111_v2 = vadd.f32 %v1105_v1, %v1048_v0 }
 0x39e   : > { %v1391_v4 = vpop.f32.mrf.mxu1 }
 0x39f   : > { %v1118_v5 = vadd.f32 %v1116_v3, %v1111_v2 }
 0x3a0   : > { %v1108_v6 = vpop.f32.mrf.mxu1 }
 0x3a1   : > { %v1119_v7 = vmax.f32 %v1118_v5, 0.0 }
 0x3a2   : > { %v1392_v8 = vpop.f32.mrf.mxu1 }
 0x3a3   : > { %v1121_v9 = vpack.c.bf16 %v1119_v7, %v1119_v7 }
 0x3a5   : > { %v1126_v10 = vsel %vm589_vm8, %v1121_v9, 0 }
 0x3a6   : > { %1394 = vmatpush3.bf16.msra.mxu0 %v1126_v10 }
 0x3a9   : > { %1396 = vmatmul.mubr.msk.bf16.vlgmr.msra.gmra.mxu0 %vm585_vm10, %v1120_v11 }
 0x469   : > { %v1162_v12 = vpop.f32.mrf.mxu0 }
 0x46a   : > { %v1168_v14 = vadd.f32 %v1699_v58, %v1162_v12 }
 0x46b   : > { %v1397_v15 = vpop.f32.mrf.mxu0 }
 0x46c   : > { %v1175_v16 = vadd.f32 %v1173_v13, %v1168_v14 }
 0x46d   : > { %v1165_v17 = vpop.f32.mrf.mxu0 }
 0x46e   : > { %1177 = vst.msk [vmem:[%s345_s25] sm:$0xf] %vm1176_vm0, %v1175_v16 }
 0x46f   : > { %v1398_v18 = vpop.f32.mrf.mxu0 }
 0x470 PF: > { %s20_s30 = sadd.s32 1, %s1480_s30  }
 0x471   : > { %p17_p1 = scmp.ge.s32.totalorder %s20_s30, 4  }
 0x473   :  { %19 = sbr.rel (!%p17_p1) target bundleno = 1 (0x1), region = 99 }
 0x478   :  { %1197 = vsyncpa [#allocation3], 1 }
 0x479   :  { %1199 = vsyncpa [#allocation3 + $0x1], 1 }

// kernel: hourglass_forward.11
= control target key start
LH: loop header
LB: loop body
LE: loop exit
PB: predicated region body
PF: predicated region fallthrough
CT: control target
= control target key end

     0   :  { %s1257_s27 = smov 0   ;;  %s1428_s0 = inlined_call_operand.vmem [shape: f32[2,4,16], index: 0, kind: input, shape index: {}]   ;;  %s1429_s1 = inlined_call_operand.vmem [shape: f32[9,16], index: 1, kind: input, shape index: {}]   ;;  %s1430_s2 = inlined_call_operand.vmem [shape: bf16[2,4], index: 2, kind: input, shape index: {}]   ;;  %s1431_s3 = inlined_call_operand.vmem [shape: f32[2,1], index: 3, kind: input, shape index: {}]   ;;  %s1432_s4 = inlined_call_operand.vmem [shape: bf16[9,2,2], index: 4, kind: input, shape index: {}]   ;;  %s1433_s5 = inlined_call_operand.vmem [shape: f32[2,1], index: 5, kind: input, shape index: {}]   ;;  %s1434_s6 = inlined_call_operand.vmem [shape: bf16[4,2], index: 6, kind: input, shape index: {}]   ;;  %s1435_s7 = inlined_call_operand.vmem [shape: f32[4,1], index: 7, kind: input, shape index: {}]   ;;  %s1436_s8 = inlined_call_operand.vmem [shape: f32[2,4,16], index: 8, kind: output, shape index: {}]  }
   0x1 LB: > { %s1039_s28 = sadd.s32 4294967295, %s1191_s27   ;;  %p1043_p0 = scmp.ge.s32.totalorder %s1191_s27, 1  ;;  %s1191_s27 = sphi %s1257_s27, %s18_s27  }
   0x2   : > { %p261_p1 = scmp.lt.s32.totalorder %s1191_s27, 3 }
   0x4   : > { %p262_p2 = pnand %p1043_p0, %p261_p1 }
   0x5   : > { %p293_p3 = scmp.lt.s32.totalorder (!%p262_p2), %s1039_s28, 1  ;;  %s1196_s15 = smov (!%p262_p2), 4  }
   0x6   : > { %265 = sbr.rel (%p262_p2) target bundleno = 778 (0x30a), region = 52  ;;  %s1197_s16 = smov (!%p262_p2), 116  }
   0x7   : > { %s1198_s17 = smov (!%p262_p2), 117   ;;  %s1199_s18 = smov (!%p262_p2), 5  }
   0x8   : > { %s1200_s19 = smov (!%p262_p2), 115   ;;  %s1201_s20 = smov (!%p262_p2), 3  }
   0x9   : > { %s1202_s21 = smov (!%p262_p2), 113   ;;  %s1203_s22 = smov (!%p262_p2), 1  }
   0xa   : > { %s1204_s23 = smov (!%p262_p2), 127   ;;  %s1205_s24 = smov (!%p262_p2), 15  }
   0xb   : > { %v1193_v0 = vmov 0.0   ;;  %vm1194_vm0 = vmmov 0   ;;  %v307_v1 = vld [vmem:[%s1431_s3] sm:$0x3]  ;;  %s1438_s28 = smov (!%p293_p3, %s1039_s28), 1  ;;  %v1195_v2 = vmov 0   ;;  %v371_v16 = vlaneseq }
   0xc   : > { %1090 = vmatprep.subr.bf16.mxu0 %v1193_v0  ;;  %1092 = vmatprep.mubr.msk.bf16.mxu0 %vm1194_vm0, %v1193_v0  ;;  %s1044_s9 = sshll.u32 %s1438_s28, 2  ;;  %vm317_vm1 = vcmask 1041408   ;;  %v305_v6 = vld [vmem:[%s1430_s2] sm:$0x1]  ;;  %vm313_vm2 = vcmask 31744   ;;  %s1206_s25 = smov 125  }
   0xd   : > { %1183 = vset.pattern.permute.xlu0 %v1195_v2  ;;  %1096 = vmatprep.subr.bf16.mxu1 %v1193_v0  ;;  %s296_s12 = scalar_lea.vmem %s1428_s0, %s1044_s9  ;;  %s1207_s26 = smov 13   ;;  %v977_v14 = vld [vmem:[%s1435_s7] sm:$0xf]  ;;  %v1317_v17 = vshrl.u32 %v371_v16, 7  ;;  %vm369_vm3 = vcmask 39936   ;;  %vm397_vm4 = vcmask 1040384  }
   0xe   : > { %310 = vperm.xlu0 %1183, %v307_v1   ;;  %1098 = vmatprep.mubr.msk.bf16.mxu1 %vm1194_vm0, %v1193_v0  ;;  %v1282_v3 = vld [vmem:[%s296_s12] sm:$0xf]  ;;  %s1208_s29 = smov 124   ;;  %s1209_s30 = smov 12   ;;  %vm493_vm5 = vcmask 23552   ;;  %vm393_vm6 = vcmask 15360  }
   0xf   : > { %1184 = vset.pattern.permute.xlu1 %v1195_v2  ;;  %v306_v4 = vpack.c.bf16 %v1282_v3, %v1282_v3  ;;  %s1210_s10 = smov 123   ;;  %s1211_s11 = smov 11   ;;  %v920_v15 = vld [vmem:[%s1433_s5] sm:$0x3]  ;;  %v387_v18 = vsub.s32 1, %v1317_v17  ;;  %v373_v21 = vsub.s32 0, %v1317_v17 }
  0x10   : > { %v1323_v19 = vld [vmem:[%s1429_s1] sm:$0xff]  ;;  %v615_v25 = vsub.s32 4, %v1317_v17  ;;  %v497_v28 = vsub.s32 2, %v1317_v17  ;;  %v560_v37 = vsub.s32 3, %v1317_v17  ;;  %vm556_vm7 = vcmask 7168  }
  0x11   : > { %v319_v5 = vsel %vm317_vm1, %v306_v4, 0  ;;  %v388_v20 = vrot.slane %v1323_v19, %v387_v18  ;;  %v374_v27 = vrot.slane %v1323_v19, %v373_v21  ;;  %v1047_v38 = vld [vmem:[%s1432_s4 + $0x1] sm:$0x1]  ;;  %v678_v47 = vsub.s32 5, %v1317_v17  ;;  %v376_v48 = vld [vmem:[%s1432_s4] sm:$0x1] }
  0x12   : > { %1091 = vmatpush3.bf16.msra.mxu0 %v319_v5  ;;  %v616_v33 = vrot.slane %v1323_v19, %v615_v25  ;;  %v498_v36 = vrot.slane %v1323_v19, %v497_v28  ;;  %v561_v46 = vrot.slane %v1323_v19, %v560_v37  ;;  %vm674_vm8 = vcmask 121856   ;;  %v1050_v58 = vld [vmem:[%s1432_s4 + $0x2] sm:$0x1] }
  0x13   : > { %1102 = vmatprep.subr.bf16.mxu0 %v1193_v0  ;;  %v679_v56 = vrot.slane %v1323_v19, %v678_v47  ;;  %v741_v57 = vsub.s32 6, %v1317_v17  ;;  %vm737_vm9 = vcmask 105472   ;;  %v804_v5 = vsub.s32 7, %v1317_v17 }
  0x14   : > { %vm800_vm10 = vcmask 97280   ;;  %vm863_vm11 = vcmask 89088   ;;  %vm984_vm12 = vcmask 125952  }
  0x15   : > { %1093 = vmatmul.mubr.msk.bf16.vlgmr.msra.gmra.mxu0 %vm313_vm2, %v305_v6  ;;  %v742_v4 = vrot.slane %v1323_v19, %v741_v57  ;;  %v1052_v6 = vld [vmem:[%s1432_s4 + $0x3] sm:$0x1] }
  0x16   : > { %1104 = vmatprep.mubr.msk.bf16.mxu0 %vm1194_vm0, %v1193_v0 }
  0x89   : > { %v311_v7 = vpop.permute.xlu0 %310 }
  0xd5   : > { %v355_v8 = vpop.f32.mrf.mxu0 }
  0xd6   : > { %v356_v9 = vadd.f32 %v355_v8, %v311_v7 }
  0xd7   : > { %v1094_v10 = vpop.f32.mrf.mxu0 }
  0xd8   : > { %v1293_v11 = vmax.f32 %v356_v9, 0.0 }
  0xd9   : > { %v358_v12 = vpop.f32.mrf.mxu0 }
  0xda   : > { %381 = vrot.lane.b32.xlu1 %v1293_v11, %s1196_s15  ;;  %378 = vrot.lane.b32.xlu0 %v1293_v11, %s1197_s16  ;;  %v617_v43 = vmul.f32 %v616_v33, %v1293_v11  ;;  %v1063_v33 = vld [vmem:[%s1432_s4 + $0x8] sm:$0x1] }
  0xdb   : > { %v1095_v13 = vpop.f32.mrf.mxu0 }
  0xdc   : > { %v620_v53 = vpack.c.bf16 %v617_v43, %v617_v43  ;;  %v805_v13 = vrot.slane %v1323_v19, %v804_v5  ;;  %v1062_v19 = vld [vmem:[%s1429_s1 + $0x8] ss:$0 sm:$0xff] }
  0xde   : > { %363 = vrot.lane.b32.xlu1 %v1293_v11, %s1198_s17  ;;  %366 = vrot.lane.b32.xlu0 %v1293_v11, %s1199_s18  ;;  %v625_v63 = vsel %vm397_vm4, %v620_v53, 0 }
  0xe2   : > { %487 = vrot.lane.b32.xlu1 %v1293_v11, %s1200_s19  ;;  %490 = vrot.lane.b32.xlu0 %v1293_v11, %s1201_s20 }
  0xe6   : > { %550 = vrot.lane.b32.xlu1 %v1293_v11, %s1202_s21  ;;  %553 = vrot.lane.b32.xlu0 %v1293_v11, %s1203_s22 }
  0xea   : > { %668 = vrot.lane.b32.xlu1 %v1293_v11, %s1204_s23  ;;  %671 = vrot.lane.b32.xlu0 %v1293_v11, %s1205_s24  ;;  %s300_s23 = scalar_lea.vmem %s1436_s8, %s1044_s9 }
  0xee   : > { %731 = vrot.lane.b32.xlu1 %v1293_v11, %s1206_s25  ;;  %734 = vrot.lane.b32.xlu0 %v1293_v11, %s1207_s26 }
  0xf2   : > { %794 = vrot.lane.b32.xlu1 %v1293_v11, %s1208_s29  ;;  %797 = vrot.lane.b32.xlu0 %v1293_v11, %s1209_s30 }
  0xf6   : > { %857 = vrot.lane.b32.xlu1 %v1293_v11, %s1210_s10  ;;  %860 = vrot.lane.b32.xlu0 %v1293_v11, %s1211_s11 }
  0xfa   : > { %980 = vperm.xlu0 %1183, %v977_v14   ;;  %923 = vperm.xlu1 %1184, %v920_v15   ;;  %v1054_v14 = vld [vmem:[%s1432_s4 + $0x4] sm:$0x1] }
 0x14c   : > { %v382_v22 = vpop.permute.xlu1 %381  ;;  %v379_v23 = vpop.permute.xlu0 %378 }
 0x14d   : > { %v384_v24 = vsel %vm313_vm2, %v379_v23, %v382_v22  ;;  %v1056_v22 = vld [vmem:[%s1432_s4 + $0x5] sm:$0x1] }
 0x14e   : > { %v389_v26 = vmul.f32 %v388_v20, %v384_v24 }
 0x150   : > { %v364_v29 = vpop.permute.xlu1 %363  ;;  %v367_v30 = vpop.permute.xlu0 %366  ;;  %v392_v31 = vpack.c.bf16 %v389_v26, %v389_v26 }
 0x151   : > { %v370_v32 = vsel %vm369_vm3, %v364_v29, %v367_v30  ;;  %v1058_v29 = vld [vmem:[%s1432_s4 + $0x6] sm:$0x1] }
 0x152   : > { %v375_v34 = vmul.f32 %v374_v27, %v370_v32  ;;  %v399_v35 = vsel %vm397_vm4, %v392_v31, 0  ;;  %v1060_v32 = vld [vmem:[%s1432_s4 + $0x7] sm:$0x1] }
 0x153   : > { %1097 = vmatpush3.bf16.msra.mxu1 %v399_v35 }
 0x154   : > { %v377_v39 = vpack.c.bf16 %v375_v34, %v375_v34  ;;  %v488_v40 = vpop.permute.xlu1 %487  ;;  %v491_v41 = vpop.permute.xlu0 %490  ;;  %1108 = vmatprep.subr.bf16.mxu1 %v1193_v0 }
 0x155   : > { %v494_v42 = vsel %vm493_vm5, %v488_v40, %v491_v41 }
 0x156   : > { %v499_v44 = vmul.f32 %v498_v36, %v494_v42  ;;  %1099 = vmatmul.mubr.msk.bf16.vlgmr.msra.gmra.mxu1 %vm393_vm6, %v1047_v38  ;;  %v445_v45 = vsel %vm397_vm4, %v377_v39, 0 }
 0x157   : > { %1103 = vmatpush3.bf16.msra.mxu0 %v445_v45  ;;  %1110 = vmatprep.mubr.msk.bf16.mxu1 %vm1194_vm0, %v1193_v0 }
 0x158   : > { %v502_v49 = vpack.c.bf16 %v499_v44, %v499_v44  ;;  %v551_v50 = vpop.permute.xlu1 %550  ;;  %v554_v51 = vpop.permute.xlu0 %553  ;;  %1114 = vmatprep.subr.bf16.mxu0 %v1193_v0 }
 0x159   : > { %v557_v52 = vsel %vm556_vm7, %v551_v50, %v554_v51 }
 0x15a   : > { %v562_v54 = vmul.f32 %v561_v46, %v557_v52  ;;  %1105 = vmatmul.mubr.msk.bf16.vlgmr.msra.gmra.mxu0 %vm393_vm6, %v376_v48  ;;  %v507_v55 = vsel %vm397_vm4, %v502_v49, 0 }
 0x15b   : > { %1109 = vmatpush3.bf16.msra.mxu1 %v507_v55  ;;  %1116 = vmatprep.mubr.msk.bf16.mxu0 %vm1194_vm0, %v1193_v0 }
 0x15c   : > { %v565_v59 = vpack.c.bf16 %v562_v54, %v562_v54  ;;  %v669_v60 = vpop.permute.xlu1 %668  ;;  %v672_v61 = vpop.permute.xlu0 %671  ;;  %1120 = vmatprep.subr.bf16.mxu1 %v1193_v0 }
 0x15d   : > { %v675_v62 = vsel %vm674_vm8, %v669_v60, %v672_v61 }
 0x15e   : > { %v680_v1 = vmul.f32 %v679_v56, %v675_v62  ;;  %1111 = vmatmul.mubr.msk.bf16.vlgmr.msra.gmra.mxu1 %vm393_vm6, %v1050_v58  ;;  %v570_v2 = vsel %vm397_vm4, %v565_v59, 0 }
 0x15f   : > { %1115 = vmatpush3.bf16.msra.mxu0 %v570_v2  ;;  %1121 = vmatpush3.bf16.msra.mxu1 %v625_v63 }
 0x160   : > { %v683_v7 = vpack.c.bf16 %v680_v1, %v680_v1  ;;  %v732_v8 = vpop.permute.xlu1 %731  ;;  %v735_v9 = vpop.permute.xlu0 %734  ;;  %1126 = vmatprep.subr.bf16.mxu0 %v1193_v0  ;;  %1122 = vmatprep.mubr.msk.bf16.mxu1 %vm1194_vm0, %v1193_v0 }
 0x161   : > { %v738_v10 = vsel %vm737_vm9, %v732_v8, %v735_v9  ;;  %1132 = vmatprep.subr.bf16.mxu1 %v1193_v0 }
 0x162   : > { %v743_v11 = vmul.f32 %v742_v4, %v738_v10  ;;  %1117 = vmatmul.mubr.msk.bf16.vlgmr.msra.gmra.mxu0 %vm393_vm6, %v1052_v6  ;;  %v688_v12 = vsel %vm397_vm4, %v683_v7, 0 }
 0x163   : > { %1127 = vmatpush3.bf16.msra.mxu0 %v688_v12  ;;  %1128 = vmatprep.mubr.msk.bf16.mxu0 %vm1194_vm0, %v1193_v0 }
 0x164   : > { %v746_v15 = vpack.c.bf16 %v743_v11, %v743_v11  ;;  %v795_v16 = vpop.permute.xlu1 %794  ;;  %v798_v17 = vpop.permute.xlu0 %797  ;;  %1138 = vmatprep.subr.bf16.mxu0 %v1193_v0 }
 0x165   : > { %v801_v18 = vsel %vm800_vm10, %v795_v16, %v798_v17 }
 0x166   : > { %v806_v20 = vmul.f32 %v805_v13, %v801_v18  ;;  %1123 = vmatmul.mubr.msk.bf16.vlgmr.msra.gmra.mxu1 %vm393_vm6, %v1054_v14  ;;  %v751_v21 = vsel %vm397_vm4, %v746_v15, 0 }
 0x167   : > { %1133 = vmatpush3.bf16.msra.mxu1 %v751_v21  ;;  %1134 = vmatprep.mubr.msk.bf16.mxu1 %vm1194_vm0, %v1193_v0  ;;  %v928_v21 = vld [vmem:[%s1434_s6] sm:$0x3] }
 0x168   : > { %v809_v23 = vpack.c.bf16 %v806_v20, %v806_v20  ;;  %v858_v24 = vpop.permute.xlu1 %857  ;;  %v861_v25 = vpop.permute.xlu0 %860  ;;  %1144 = vmatprep.subr.bf16.mxu1 %v1193_v0 }
 0x169   : > { %v864_v26 = vsel %vm863_vm11, %v858_v24, %v861_v25 }
 0x16a   : > { %v869_v27 = vmul.f32 %v1062_v19, %v864_v26  ;;  %1129 = vmatmul.mubr.msk.bf16.vlgmr.msra.gmra.mxu0 %vm393_vm6, %v1056_v22  ;;  %v814_v28 = vsel %vm397_vm4, %v809_v23, 0 }
 0x16b   : > { %1139 = vmatpush3.bf16.msra.mxu0 %v814_v28  ;;  %1140 = vmatprep.mubr.msk.bf16.mxu0 %vm1194_vm0, %v1193_v0 }
 0x16c   : > { %v872_v30 = vpack.c.bf16 %v869_v27, %v869_v27  ;;  %1150 = vmatprep.subr.bf16.mxu0 %v1193_v0 }
 0x16e   : > { %1135 = vmatmul.mubr.msk.bf16.vlgmr.msra.gmra.mxu1 %vm393_vm6, %v1058_v29  ;;  %v877_v31 = vsel %vm397_vm4, %v872_v30, 0 }
 0x16f   : > { %1145 = vmatpush3.bf16.msra.mxu1 %v877_v31  ;;  %1146 = vmatprep.mubr.msk.bf16.mxu1 %vm1194_vm0, %v1193_v0 }
 0x172   : > { %1141 = vmatmul.mubr.msk.bf16.vlgmr.msra.gmra.mxu0 %vm393_vm6, %v1060_v32 }
 0x173   : > { %1152 = vmatprep.mubr.msk.bf16.mxu0 %vm1194_vm0, %v1193_v0 }
 0x175   : > { %v924_v8 = vpop.permute.xlu1 %923  ;;  %v981_v23 = vpop.permute.xlu0 %980 }
 0x176   : > { %1147 = vmatmul.mubr.msk.bf16.vlgmr.msra.gmra.mxu1 %vm393_vm6, %v1063_v33 }
 0x216   : > { %v435_v34 = vpop.f32.mrf.mxu1 }
 0x218   : > { %v1100_v35 = vpop.f32.mrf.mxu1 }
 0x21a   : > { %v438_v36 = vpop.f32.mrf.mxu1  ;;  %v481_v37 = vpop.f32.mrf.mxu0 }
 0x21b   : > { %v482_v51 = vadd.f32 %v481_v37, %v435_v34 }
 0x21c   : > { %v1101_v38 = vpop.f32.mrf.mxu1  ;;  %v1106_v39 = vpop.f32.mrf.mxu0 }
 0x21e   : > { %v484_v40 = vpop.f32.mrf.mxu0  ;;  %v543_v41 = vpop.f32.mrf.mxu1 }
 0x21f   : > { %v549_v54 = vadd.f32 %v543_v41, %v482_v51 }
 0x220   : > { %v1107_v42 = vpop.f32.mrf.mxu0  ;;  %v1112_v43 = vpop.f32.mrf.mxu1 }
 0x222   : > { %v546_v44 = vpop.f32.mrf.mxu1  ;;  %v606_v45 = vpop.f32.mrf.mxu0 }
 0x223   : > { %v612_v57 = vadd.f32 %v606_v45, %v549_v54 }
 0x224   : > { %v1113_v46 = vpop.f32.mrf.mxu1  ;;  %v1118_v47 = vpop.f32.mrf.mxu0 }
 0x226   : > { %v609_v48 = vpop.f32.mrf.mxu0  ;;  %v661_v49 = vpop.f32.mrf.mxu1 }
 0x227   : > { %v667_v60 = vadd.f32 %v661_v49, %v612_v57 }
 0x228   : > { %v1119_v50 = vpop.f32.mrf.mxu0  ;;  %v1124_v0 = vpop.f32.mrf.mxu1 }
 0x22a   : > { %v664_v52 = vpop.f32.mrf.mxu1  ;;  %v724_v53 = vpop.f32.mrf.mxu0 }
 0x22b   : > { %v730_v63 = vadd.f32 %v724_v53, %v667_v60 }
 0x22c   : > { %v1125_v55 = vpop.f32.mrf.mxu1  ;;  %v1130_v56 = vpop.f32.mrf.mxu0 }
 0x22e   : > { %v727_v58 = vpop.f32.mrf.mxu0  ;;  %v787_v59 = vpop.f32.mrf.mxu1 }
 0x22f   : > { %v793_v4 = vadd.f32 %v787_v59, %v730_v63 }
 0x230   : > { %v1131_v61 = vpop.f32.mrf.mxu0  ;;  %v1136_v62 = vpop.f32.mrf.mxu1 }
 0x232   : > { %v790_v1 = vpop.f32.mrf.mxu1  ;;  %v850_v2 = vpop.f32.mrf.mxu0 }
 0x233   : > { %v856_v7 = vadd.f32 %v850_v2, %v793_v4 }
 0x234   : > { %v1137_v5 = vpop.f32.mrf.mxu1  ;;  %v1142_v6 = vpop.f32.mrf.mxu0 }
 0x236   : > { %v853_v9 = vpop.f32.mrf.mxu0  ;;  %v913_v10 = vpop.f32.mrf.mxu1 }
 0x237   : > { %v919_v11 = vadd.f32 %v913_v10, %v856_v7 }
 0x238   : > { %v1143_v12 = vpop.f32.mrf.mxu0  ;;  %v1148_v13 = vpop.f32.mrf.mxu1 }
 0x239   : > { %v926_v14 = vadd.f32 %v924_v8, %v919_v11 }
 0x23a   : > { %v916_v15 = vpop.f32.mrf.mxu1 }
 0x23b   : > { %v927_v16 = vmax.f32 %v926_v14, 0.0 }
 0x23c   : > { %v1149_v17 = vpop.f32.mrf.mxu1 }
 0x23d   : > { %v929_v18 = vpack.c.bf16 %v927_v16, %v927_v16 }
 0x23f   : > { %v934_v20 = vsel %vm397_vm4, %v929_v18, 0 }
 0x240   : > { %1151 = vmatpush3.bf16.msra.mxu0 %v934_v20 }
 0x243   : > { %1153 = vmatmul.mubr.msk.bf16.vlgmr.msra.gmra.mxu0 %vm393_vm6, %v928_v21 }
 0x303   : > { %v970_v19 = vpop.f32.mrf.mxu0 }
 0x304   : > { %v976_v22 = vadd.f32 %v970_v19, %v1282_v3 }
 0x305   : > { %v1154_v24 = vpop.f32.mrf.mxu0 }
 0x306   : > { %v983_v25 = vadd.f32 %v981_v23, %v976_v22 }
 0x307   : > { %v973_v26 = vpop.f32.mrf.mxu0 }
 0x308   : > { %985 = vst.msk [vmem:[%s300_s23] sm:$0xf] %vm984_vm12, %v983_v25 }
 0x309   : > { %v1155_v27 = vpop.f32.mrf.mxu0 }
 0x30a PF: > { %s18_s27 = sadd.s32 1, %s1191_s27  }
 0x30b   : > { %p15_p4 = scmp.ge.s32.totalorder %s18_s27, 4  }
 0x30d   :  { %17 = sbr.rel (!%p15_p4) target bundleno = 1 (0x1), region = 90 }

// kernel: hourglass_forward.9
= control target key start
LH: loop header
LB: loop body
LE: loop exit
PB: predicated region body
PF: predicated region fallthrough
CT: control target
= control target key end

     0   :  { %s1258_s27 = smov 0   ;;  %s1427_s0 = inlined_call_operand.vmem [shape: f32[2,4,64], index: 0, kind: input, shape index: {}]   ;;  %s1428_s1 = inlined_call_operand.vmem [shape: f32[9,64], index: 1, kind: input, shape index: {}]   ;;  %s1429_s2 = inlined_call_operand.vmem [shape: bf16[2,4], index: 2, kind: input, shape index: {}]   ;;  %s1430_s3 = inlined_call_operand.vmem [shape: f32[2,1], index: 3, kind: input, shape index: {}]   ;;  %s1431_s4 = inlined_call_operand.vmem [shape: bf16[9,2,2], index: 4, kind: input, shape index: {}]   ;;  %s1432_s5 = inlined_call_operand.vmem [shape: f32[2,1], index: 5, kind: input, shape index: {}]   ;;  %s1433_s6 = inlined_call_operand.vmem [shape: bf16[4,2], index: 6, kind: input, shape index: {}]   ;;  %s1434_s7 = inlined_call_operand.vmem [shape: f32[4,1], index: 7, kind: input, shape index: {}]   ;;  %s1435_s8 = inlined_call_operand.vmem [shape: f32[2,4,64], index: 8, kind: output, shape index: {}]  }
   0x1 LB: > { %s1040_s28 = sadd.s32 4294967295, %s1192_s27   ;;  %p1044_p0 = scmp.ge.s32.totalorder %s1192_s27, 1  ;;  %s1192_s27 = sphi %s1258_s27, %s18_s27  }
   0x2   : > { %p261_p1 = scmp.lt.s32.totalorder %s1192_s27, 3 }
   0x4   : > { %p262_p2 = pnand %p1044_p0, %p261_p1 }
   0x5   : > { %p293_p3 = scmp.lt.s32.totalorder (!%p262_p2), %s1040_s28, 1  ;;  %s1197_s15 = smov (!%p262_p2), 8  }
   0x6   : > { %265 = sbr.rel (%p262_p2) target bundleno = 778 (0x30a), region = 52  ;;  %s1198_s16 = smov (!%p262_p2), 72  }
   0x7   : > { %s1199_s17 = smov (!%p262_p2), 73   ;;  %s1200_s18 = smov (!%p262_p2), 9  }
   0x8   : > { %s1201_s19 = smov (!%p262_p2), 71   ;;  %s1202_s20 = smov (!%p262_p2), 7  }
   0x9   : > { %s1203_s21 = smov (!%p262_p2), 65   ;;  %s1204_s22 = smov (!%p262_p2), 1  }
   0xa   : > { %s1205_s23 = smov (!%p262_p2), 127   ;;  %s1206_s24 = smov (!%p262_p2), 63  }
   0xb   : > { %v1194_v0 = vmov 0.0   ;;  %vm1195_vm0 = vmmov 0   ;;  %v307_v1 = vld [vmem:[%s1430_s3] sm:$0x3]  ;;  %s1437_s28 = smov (!%p293_p3, %s1040_s28), 1  ;;  %v1196_v2 = vmov 0   ;;  %v371_v16 = vlaneseq }
   0xc   : > { %1091 = vmatprep.subr.bf16.mxu0 %v1194_v0  ;;  %1093 = vmatprep.mubr.msk.bf16.mxu0 %vm1195_vm0, %v1194_v0  ;;  %s1045_s9 = sshll.u32 %s1437_s28, 2  ;;  %vm317_vm1 = vcmask 1041408   ;;  %v305_v6 = vld [vmem:[%s1429_s2] sm:$0x1]  ;;  %vm313_vm2 = vcmask 31744   ;;  %s1207_s25 = smov 121  }
   0xd   : > { %1184 = vset.pattern.permute.xlu0 %v1196_v2  ;;  %1097 = vmatprep.subr.bf16.mxu1 %v1194_v0  ;;  %s296_s12 = scalar_lea.vmem %s1427_s0, %s1045_s9  ;;  %s1208_s26 = smov 57   ;;  %v978_v14 = vld [vmem:[%s1434_s7] sm:$0xf]  ;;  %v1317_v17 = vshrl.u32 %v371_v16, 7  ;;  %vm384_vm3 = vcmask 64512   ;;  %vm369_vm4 = vcmask 72704  }
   0xe   : > { %310 = vperm.xlu0 %1184, %v307_v1   ;;  %1099 = vmatprep.mubr.msk.bf16.mxu1 %vm1195_vm0, %v1194_v0  ;;  %v1283_v3 = vld [vmem:[%s296_s12] sm:$0xf]  ;;  %s1209_s29 = smov 120   ;;  %s1210_s30 = smov 56   ;;  %vm398_vm5 = vcmask 1040384   ;;  %vm494_vm6 = vcmask 56320  }
   0xf   : > { %1185 = vset.pattern.permute.xlu1 %v1196_v2  ;;  %v306_v4 = vpack.c.bf16 %v1283_v3, %v1283_v3  ;;  %s1211_s10 = smov 119   ;;  %s1212_s11 = smov 55   ;;  %v921_v15 = vld [vmem:[%s1432_s5] sm:$0x3]  ;;  %v388_v18 = vsub.s32 1, %v1317_v17  ;;  %v373_v21 = vsub.s32 0, %v1317_v17 }
  0x10   : > { %v1323_v19 = vld [vmem:[%s1428_s1] sm:$0xff]  ;;  %v616_v25 = vsub.s32 4, %v1317_v17  ;;  %v498_v28 = vsub.s32 2, %v1317_v17  ;;  %v561_v37 = vsub.s32 3, %v1317_v17  ;;  %vm394_vm7 = vcmask 15360  }
  0x11   : > { %v319_v5 = vsel %vm317_vm1, %v306_v4, 0  ;;  %v389_v20 = vrot.slane %v1323_v19, %v388_v18  ;;  %v374_v27 = vrot.slane %v1323_v19, %v373_v21  ;;  %v1048_v38 = vld [vmem:[%s1431_s4 + $0x1] sm:$0x1]  ;;  %vm557_vm8 = vcmask 7168   ;;  %v376_v48 = vld [vmem:[%s1431_s4] sm:$0x1] }
  0x12   : > { %1092 = vmatpush3.bf16.msra.mxu0 %v319_v5  ;;  %v617_v33 = vrot.slane %v1323_v19, %v616_v25  ;;  %v499_v36 = vrot.slane %v1323_v19, %v498_v28  ;;  %v562_v46 = vrot.slane %v1323_v19, %v561_v37  ;;  %v679_v47 = vsub.s32 5, %v1317_v17  ;;  %v1051_v58 = vld [vmem:[%s1431_s4 + $0x2] sm:$0x1] }
  0x13   : > { %1103 = vmatprep.subr.bf16.mxu0 %v1194_v0  ;;  %vm675_vm9 = vcmask 515072   ;;  %v742_v57 = vsub.s32 6, %v1317_v17  ;;  %vm738_vm10 = vcmask 465920   ;;  %v805_v5 = vsub.s32 7, %v1317_v17 }
  0x14   : > { %v680_v56 = vrot.slane %v1323_v19, %v679_v47  ;;  %vm801_vm11 = vcmask 457728   ;;  %vm864_vm12 = vcmask 449536   ;;  %vm985_vm13 = vcmask 519168  }
  0x15   : > { %1094 = vmatmul.mubr.msk.bf16.vlgmr.msra.gmra.mxu0 %vm313_vm2, %v305_v6  ;;  %v743_v4 = vrot.slane %v1323_v19, %v742_v57  ;;  %v1053_v6 = vld [vmem:[%s1431_s4 + $0x3] sm:$0x1] }
  0x16   : > { %1105 = vmatprep.mubr.msk.bf16.mxu0 %vm1195_vm0, %v1194_v0 }
  0x89   : > { %v311_v7 = vpop.permute.xlu0 %310 }
  0xd5   : > { %v355_v8 = vpop.f32.mrf.mxu0 }
  0xd6   : > { %v356_v9 = vadd.f32 %v355_v8, %v311_v7 }
  0xd7   : > { %v1095_v10 = vpop.f32.mrf.mxu0 }
  0xd8   : > { %v1293_v11 = vmax.f32 %v356_v9, 0.0 }
  0xd9   : > { %v358_v12 = vpop.f32.mrf.mxu0 }
  0xda   : > { %381 = vrot.lane.b32.xlu1 %v1293_v11, %s1197_s15  ;;  %378 = vrot.lane.b32.xlu0 %v1293_v11, %s1198_s16  ;;  %v618_v43 = vmul.f32 %v617_v33, %v1293_v11  ;;  %v1064_v33 = vld [vmem:[%s1431_s4 + $0x8] sm:$0x1] }
  0xdb   : > { %v1096_v13 = vpop.f32.mrf.mxu0 }
  0xdc   : > { %v621_v53 = vpack.c.bf16 %v618_v43, %v618_v43  ;;  %v806_v13 = vrot.slane %v1323_v19, %v805_v5  ;;  %v1063_v19 = vld [vmem:[%s1428_s1 + $0x8] ss:$0 sm:$0xff] }
  0xde   : > { %363 = vrot.lane.b32.xlu1 %v1293_v11, %s1199_s17  ;;  %366 = vrot.lane.b32.xlu0 %v1293_v11, %s1200_s18  ;;  %v626_v63 = vsel %vm398_vm5, %v621_v53, 0 }
  0xe2   : > { %488 = vrot.lane.b32.xlu1 %v1293_v11, %s1201_s19  ;;  %491 = vrot.lane.b32.xlu0 %v1293_v11, %s1202_s20 }
  0xe6   : > { %551 = vrot.lane.b32.xlu1 %v1293_v11, %s1203_s21  ;;  %554 = vrot.lane.b32.xlu0 %v1293_v11, %s1204_s22 }
  0xea   : > { %669 = vrot.lane.b32.xlu1 %v1293_v11, %s1205_s23  ;;  %672 = vrot.lane.b32.xlu0 %v1293_v11, %s1206_s24  ;;  %s300_s23 = scalar_lea.vmem %s1435_s8, %s1045_s9 }
  0xee   : > { %732 = vrot.lane.b32.xlu1 %v1293_v11, %s1207_s25  ;;  %735 = vrot.lane.b32.xlu0 %v1293_v11, %s1208_s26 }
  0xf2   : > { %795 = vrot.lane.b32.xlu1 %v1293_v11, %s1209_s29  ;;  %798 = vrot.lane.b32.xlu0 %v1293_v11, %s1210_s30 }
  0xf6   : > { %858 = vrot.lane.b32.xlu1 %v1293_v11, %s1211_s10  ;;  %861 = vrot.lane.b32.xlu0 %v1293_v11, %s1212_s11 }
  0xfa   : > { %981 = vperm.xlu0 %1184, %v978_v14   ;;  %924 = vperm.xlu1 %1185, %v921_v15   ;;  %v1055_v14 = vld [vmem:[%s1431_s4 + $0x4] sm:$0x1] }
 0x14c   : > { %v382_v22 = vpop.permute.xlu1 %381  ;;  %v379_v23 = vpop.permute.xlu0 %378 }
 0x14d   : > { %v385_v24 = vsel %vm384_vm3, %v379_v23, %v382_v22  ;;  %v1057_v22 = vld [vmem:[%s1431_s4 + $0x5] sm:$0x1] }
 0x14e   : > { %v390_v26 = vmul.f32 %v389_v20, %v385_v24 }
 0x150   : > { %v364_v29 = vpop.permute.xlu1 %363  ;;  %v367_v30 = vpop.permute.xlu0 %366  ;;  %v393_v31 = vpack.c.bf16 %v390_v26, %v390_v26 }
 0x151   : > { %v370_v32 = vsel %vm369_vm4, %v364_v29, %v367_v30  ;;  %v1059_v29 = vld [vmem:[%s1431_s4 + $0x6] sm:$0x1] }
 0x152   : > { %v375_v34 = vmul.f32 %v374_v27, %v370_v32  ;;  %v400_v35 = vsel %vm398_vm5, %v393_v31, 0  ;;  %v1061_v32 = vld [vmem:[%s1431_s4 + $0x7] sm:$0x1] }
 0x153   : > { %1098 = vmatpush3.bf16.msra.mxu1 %v400_v35 }
 0x154   : > { %v377_v39 = vpack.c.bf16 %v375_v34, %v375_v34  ;;  %v489_v40 = vpop.permute.xlu1 %488  ;;  %v492_v41 = vpop.permute.xlu0 %491  ;;  %1109 = vmatprep.subr.bf16.mxu1 %v1194_v0 }
 0x155   : > { %v495_v42 = vsel %vm494_vm6, %v489_v40, %v492_v41 }
 0x156   : > { %v500_v44 = vmul.f32 %v499_v36, %v495_v42  ;;  %1100 = vmatmul.mubr.msk.bf16.vlgmr.msra.gmra.mxu1 %vm394_vm7, %v1048_v38  ;;  %v446_v45 = vsel %vm398_vm5, %v377_v39, 0 }
 0x157   : > { %1104 = vmatpush3.bf16.msra.mxu0 %v446_v45  ;;  %1111 = vmatprep.mubr.msk.bf16.mxu1 %vm1195_vm0, %v1194_v0 }
 0x158   : > { %v503_v49 = vpack.c.bf16 %v500_v44, %v500_v44  ;;  %v552_v50 = vpop.permute.xlu1 %551  ;;  %v555_v51 = vpop.permute.xlu0 %554  ;;  %1115 = vmatprep.subr.bf16.mxu0 %v1194_v0 }
 0x159   : > { %v558_v52 = vsel %vm557_vm8, %v552_v50, %v555_v51 }
 0x15a   : > { %v563_v54 = vmul.f32 %v562_v46, %v558_v52  ;;  %1106 = vmatmul.mubr.msk.bf16.vlgmr.msra.gmra.mxu0 %vm394_vm7, %v376_v48  ;;  %v508_v55 = vsel %vm398_vm5, %v503_v49, 0 }
 0x15b   : > { %1110 = vmatpush3.bf16.msra.mxu1 %v508_v55  ;;  %1117 = vmatprep.mubr.msk.bf16.mxu0 %vm1195_vm0, %v1194_v0 }
 0x15c   : > { %v566_v59 = vpack.c.bf16 %v563_v54, %v563_v54  ;;  %v670_v60 = vpop.permute.xlu1 %669  ;;  %v673_v61 = vpop.permute.xlu0 %672  ;;  %1121 = vmatprep.subr.bf16.mxu1 %v1194_v0 }
 0x15d   : > { %v676_v62 = vsel %vm675_vm9, %v670_v60, %v673_v61 }
 0x15e   : > { %v681_v1 = vmul.f32 %v680_v56, %v676_v62  ;;  %1112 = vmatmul.mubr.msk.bf16.vlgmr.msra.gmra.mxu1 %vm394_vm7, %v1051_v58  ;;  %v571_v2 = vsel %vm398_vm5, %v566_v59, 0 }
 0x15f   : > { %1116 = vmatpush3.bf16.msra.mxu0 %v571_v2  ;;  %1122 = vmatpush3.bf16.msra.mxu1 %v626_v63 }
 0x160   : > { %v684_v7 = vpack.c.bf16 %v681_v1, %v681_v1  ;;  %v733_v8 = vpop.permute.xlu1 %732  ;;  %v736_v9 = vpop.permute.xlu0 %735  ;;  %1127 = vmatprep.subr.bf16.mxu0 %v1194_v0  ;;  %1123 = vmatprep.mubr.msk.bf16.mxu1 %vm1195_vm0, %v1194_v0 }
 0x161   : > { %v739_v10 = vsel %vm738_vm10, %v733_v8, %v736_v9  ;;  %1133 = vmatprep.subr.bf16.mxu1 %v1194_v0 }
 0x162   : > { %v744_v11 = vmul.f32 %v743_v4, %v739_v10  ;;  %1118 = vmatmul.mubr.msk.bf16.vlgmr.msra.gmra.mxu0 %vm394_vm7, %v1053_v6  ;;  %v689_v12 = vsel %vm398_vm5, %v684_v7, 0 }
 0x163   : > { %1128 = vmatpush3.bf16.msra.mxu0 %v689_v12  ;;  %1129 = vmatprep.mubr.msk.bf16.mxu0 %vm1195_vm0, %v1194_v0 }
 0x164   : > { %v747_v15 = vpack.c.bf16 %v744_v11, %v744_v11  ;;  %v796_v16 = vpop.permute.xlu1 %795  ;;  %v799_v17 = vpop.permute.xlu0 %798  ;;  %1139 = vmatprep.subr.bf16.mxu0 %v1194_v0 }
 0x165   : > { %v802_v18 = vsel %vm801_vm11, %v796_v16, %v799_v17 }
 0x166   : > { %v807_v20 = vmul.f32 %v806_v13, %v802_v18  ;;  %1124 = vmatmul.mubr.msk.bf16.vlgmr.msra.gmra.mxu1 %vm394_vm7, %v1055_v14  ;;  %v752_v21 = vsel %vm398_vm5, %v747_v15, 0 }
 0x167   : > { %1134 = vmatpush3.bf16.msra.mxu1 %v752_v21  ;;  %1135 = vmatprep.mubr.msk.bf16.mxu1 %vm1195_vm0, %v1194_v0  ;;  %v929_v21 = vld [vmem:[%s1433_s6] sm:$0x3] }
 0x168   : > { %v810_v23 = vpack.c.bf16 %v807_v20, %v807_v20  ;;  %v859_v24 = vpop.permute.xlu1 %858  ;;  %v862_v25 = vpop.permute.xlu0 %861  ;;  %1145 = vmatprep.subr.bf16.mxu1 %v1194_v0 }
 0x169   : > { %v865_v26 = vsel %vm864_vm12, %v859_v24, %v862_v25 }
 0x16a   : > { %v870_v27 = vmul.f32 %v1063_v19, %v865_v26  ;;  %1130 = vmatmul.mubr.msk.bf16.vlgmr.msra.gmra.mxu0 %vm394_vm7, %v1057_v22  ;;  %v815_v28 = vsel %vm398_vm5, %v810_v23, 0 }
 0x16b   : > { %1140 = vmatpush3.bf16.msra.mxu0 %v815_v28  ;;  %1141 = vmatprep.mubr.msk.bf16.mxu0 %vm1195_vm0, %v1194_v0 }
 0x16c   : > { %v873_v30 = vpack.c.bf16 %v870_v27, %v870_v27  ;;  %1151 = vmatprep.subr.bf16.mxu0 %v1194_v0 }
 0x16e   : > { %1136 = vmatmul.mubr.msk.bf16.vlgmr.msra.gmra.mxu1 %vm394_vm7, %v1059_v29  ;;  %v878_v31 = vsel %vm398_vm5, %v873_v30, 0 }
 0x16f   : > { %1146 = vmatpush3.bf16.msra.mxu1 %v878_v31  ;;  %1147 = vmatprep.mubr.msk.bf16.mxu1 %vm1195_vm0, %v1194_v0 }
 0x172   : > { %1142 = vmatmul.mubr.msk.bf16.vlgmr.msra.gmra.mxu0 %vm394_vm7, %v1061_v32 }
 0x173   : > { %1153 = vmatprep.mubr.msk.bf16.mxu0 %vm1195_vm0, %v1194_v0 }
 0x175   : > { %v925_v8 = vpop.permute.xlu1 %924  ;;  %v982_v23 = vpop.permute.xlu0 %981 }
 0x176   : > { %1148 = vmatmul.mubr.msk.bf16.vlgmr.msra.gmra.mxu1 %vm394_vm7, %v1064_v33 }
 0x216   : > { %v436_v34 = vpop.f32.mrf.mxu1 }
 0x218   : > { %v1101_v35 = vpop.f32.mrf.mxu1 }
 0x21a   : > { %v439_v36 = vpop.f32.mrf.mxu1  ;;  %v482_v37 = vpop.f32.mrf.mxu0 }
 0x21b   : > { %v483_v51 = vadd.f32 %v482_v37, %v436_v34 }
 0x21c   : > { %v1102_v38 = vpop.f32.mrf.mxu1  ;;  %v1107_v39 = vpop.f32.mrf.mxu0 }
 0x21e   : > { %v485_v40 = vpop.f32.mrf.mxu0  ;;  %v544_v41 = vpop.f32.mrf.mxu1 }
 0x21f   : > { %v550_v54 = vadd.f32 %v544_v41, %v483_v51 }
 0x220   : > { %v1108_v42 = vpop.f32.mrf.mxu0  ;;  %v1113_v43 = vpop.f32.mrf.mxu1 }
 0x222   : > { %v547_v44 = vpop.f32.mrf.mxu1  ;;  %v607_v45 = vpop.f32.mrf.mxu0 }
 0x223   : > { %v613_v57 = vadd.f32 %v607_v45, %v550_v54 }
 0x224   : > { %v1114_v46 = vpop.f32.mrf.mxu1  ;;  %v1119_v47 = vpop.f32.mrf.mxu0 }
 0x226   : > { %v610_v48 = vpop.f32.mrf.mxu0  ;;  %v662_v49 = vpop.f32.mrf.mxu1 }
 0x227   : > { %v668_v60 = vadd.f32 %v662_v49, %v613_v57 }
 0x228   : > { %v1120_v50 = vpop.f32.mrf.mxu0  ;;  %v1125_v0 = vpop.f32.mrf.mxu1 }
 0x22a   : > { %v665_v52 = vpop.f32.mrf.mxu1  ;;  %v725_v53 = vpop.f32.mrf.mxu0 }
 0x22b   : > { %v731_v63 = vadd.f32 %v725_v53, %v668_v60 }
 0x22c   : > { %v1126_v55 = vpop.f32.mrf.mxu1  ;;  %v1131_v56 = vpop.f32.mrf.mxu0 }
 0x22e   : > { %v728_v58 = vpop.f32.mrf.mxu0  ;;  %v788_v59 = vpop.f32.mrf.mxu1 }
 0x22f   : > { %v794_v4 = vadd.f32 %v788_v59, %v731_v63 }
 0x230   : > { %v1132_v61 = vpop.f32.mrf.mxu0  ;;  %v1137_v62 = vpop.f32.mrf.mxu1 }
 0x232   : > { %v791_v1 = vpop.f32.mrf.mxu1  ;;  %v851_v2 = vpop.f32.mrf.mxu0 }
 0x233   : > { %v857_v7 = vadd.f32 %v851_v2, %v794_v4 }
 0x234   : > { %v1138_v5 = vpop.f32.mrf.mxu1  ;;  %v1143_v6 = vpop.f32.mrf.mxu0 }
 0x236   : > { %v854_v9 = vpop.f32.mrf.mxu0  ;;  %v914_v10 = vpop.f32.mrf.mxu1 }
 0x237   : > { %v920_v11 = vadd.f32 %v914_v10, %v857_v7 }
 0x238   : > { %v1144_v12 = vpop.f32.mrf.mxu0  ;;  %v1149_v13 = vpop.f32.mrf.mxu1 }
 0x239   : > { %v927_v14 = vadd.f32 %v925_v8, %v920_v11 }
 0x23a   : > { %v917_v15 = vpop.f32.mrf.mxu1 }
 0x23b   : > { %v928_v16 = vmax.f32 %v927_v14, 0.0 }
 0x23c   : > { %v1150_v17 = vpop.f32.mrf.mxu1 }
 0x23d   : > { %v930_v18 = vpack.c.bf16 %v928_v16, %v928_v16 }
 0x23f   : > { %v935_v20 = vsel %vm398_vm5, %v930_v18, 0 }
 0x240   : > { %1152 = vmatpush3.bf16.msra.mxu0 %v935_v20 }
 0x243   : > { %1154 = vmatmul.mubr.msk.bf16.vlgmr.msra.gmra.mxu0 %vm394_vm7, %v929_v21 }
 0x303   : > { %v971_v19 = vpop.f32.mrf.mxu0 }
 0x304   : > { %v977_v22 = vadd.f32 %v971_v19, %v1283_v3 }
 0x305   : > { %v1155_v24 = vpop.f32.mrf.mxu0 }
 0x306   : > { %v984_v25 = vadd.f32 %v982_v23, %v977_v22 }
 0x307   : > { %v974_v26 = vpop.f32.mrf.mxu0 }
 0x308   : > { %986 = vst.msk [vmem:[%s300_s23] sm:$0xf] %vm985_vm13, %v984_v25 }
 0x309   : > { %v1156_v27 = vpop.f32.mrf.mxu0 }
 0x30a PF: > { %s18_s27 = sadd.s32 1, %s1192_s27  }
 0x30b   : > { %p15_p4 = scmp.ge.s32.totalorder %s18_s27, 4  }
 0x30d   :  { %17 = sbr.rel (!%p15_p4) target bundleno = 1 (0x1), region = 90 }

// kernel: hourglass_forward.10
= control target key start
LH: loop header
LB: loop body
LE: loop exit
PB: predicated region body
PF: predicated region fallthrough
CT: control target
= control target key end

     0   :  { %s1438_s30 = smov 0   ;;  %s1645_s0 = inlined_call_operand.vmem [shape: f32[2,4,64], index: 0, kind: input, shape index: {}]   ;;  %s1646_s1 = inlined_call_operand.vmem [shape: f32[64,16], index: 1, kind: input, shape index: {}]   ;;  %s1647_s2 = inlined_call_operand.vmem [shape: f32[9,16], index: 2, kind: input, shape index: {}]   ;;  %s1648_s3 = inlined_call_operand.vmem [shape: bf16[2,4], index: 3, kind: input, shape index: {}]   ;;  %s1649_s4 = inlined_call_operand.vmem [shape: f32[2,1], index: 4, kind: input, shape index: {}]   ;;  %s1650_s5 = inlined_call_operand.vmem [shape: bf16[9,2,2], index: 5, kind: input, shape index: {}]   ;;  %s1651_s6 = inlined_call_operand.vmem [shape: f32[2,1], index: 6, kind: input, shape index: {}]   ;;  %s1652_s7 = inlined_call_operand.vmem [shape: bf16[4,2], index: 7, kind: input, shape index: {}]   ;;  %s1653_s8 = inlined_call_operand.vmem [shape: f32[4,1], index: 8, kind: input, shape index: {}]   ;;  %s1654_s9 = inlined_call_operand.vmem [shape: f32[2,4,16], index: 9, kind: output, shape index: {}]  }
   0x1 LB: > { %s1176_s10 = sadd.s32 4294967295, %s1362_s30   ;;  %p1180_p0 = scmp.ge.s32.totalorder %s1362_s30, 1  ;;  %s1362_s30 = sphi %s1438_s30, %s19_s30  }
   0x2   : > { %p286_p1 = scmp.lt.s32.totalorder %s1362_s30, 3 }
   0x4   : > { %p287_p2 = pnand %p1180_p0, %p286_p1 }
   0x5   : > { %p320_p3 = scmp.lt.s32.totalorder (!%p287_p2), %s1176_s10, 1  ;;  %s1366_s23 = smov (!%p287_p2), 120  }
   0x6   : > { %290 = sbr.rel (%p287_p2) target bundleno = 1102 (0x44e), region = 56  ;;  %s1367_s24 = smov (!%p287_p2), 127  }
   0x7   : > { %s1368_s27 = smov (!%p287_p2), 56   ;;  %s1369_s28 = smov (!%p287_p2), 63  }
   0x8   : > { %s1370_s14 = smov (!%p287_p2), 55   ;;  %s1371_s15 = smov (!%p287_p2), 119  }
   0x9   : > { %s1374_s25 = smov (!%p287_p2), 116   ;;  %s1375_s26 = smov (!%p287_p2), 115  }
   0xa   : > { %s1378_s29 = smov (!%p287_p2), 5   ;;  %s1379_s11 = smov (!%p287_p2), 3  }
   0xb   : > { %v365_v0 = vld [vmem:[%s1646_s1 + $0x38] sm:$0xff]  ;;  %v1364_v1 = vmov 0.0   ;;  %v364_v2 = vld [vmem:[%s1646_s1 + $0x30] sm:$0xff]  ;;  %s1656_s10 = smov (!%p320_p3, %s1176_s10), 1  ;;  %v363_v3 = vld [vmem:[%s1646_s1 + $0x28] sm:$0xff]  ;;  %vm1365_vm0 = vmmov 0   ;;  %v508_v37 = vlaneseq }
   0xc   : > { %1237 = vmatprep.subr.mxu0 %v1364_v1  ;;  %1256 = vmatprep.subr.bf16.mxu1 %v1364_v1  ;;  %s1181_s17 = sshll.u32 %s1656_s10, 2  ;;  %v362_v5 = vld [vmem:[%s1646_s1 + $0x20] sm:$0xff]  ;;  %v361_v6 = vld [vmem:[%s1646_s1 + $0x18] sm:$0xff]  ;;  %v360_v7 = vld [vmem:[%s1646_s1 + $0x10] sm:$0xff]  ;;  %vm337_vm1 = vcmask 515072   ;;  %vm346_vm2 = vcmask 457728  }
   0xd   : > { %1238 = vmatpush3.msra.mxu0 %v365_v0  ;;  %1253 = vmatprep.mubr.msk.f32.mxu0 %vm1365_vm0, %v1364_v1  ;;  %s323_s20 = scalar_lea.vmem %s1645_s0, %s1181_s17  ;;  %v359_v8 = vld [vmem:[%s1646_s1 + $0x8] sm:$0xff]  ;;  %v358_v9 = vld [vmem:[%s1646_s1] sm:$0xff]  ;;  %vm355_vm3 = vcmask 449536   ;;  %vm366_vm4 = vcmask 523264   ;;  %v1372_v23 = vmov 0   ;;  %vm454_vm5 = vcmask 1041408  }
   0xe   : > { %1239 = vmatprep.subr.mxu0 %v1364_v1  ;;  %1258 = vmatprep.mubr.msk.bf16.mxu1 %vm1365_vm0, %v1364_v1  ;;  %v329_v4 = vld [vmem:[%s323_s20] sm:$0xf]  ;;  %vm450_vm6 = vcmask 31744   ;;  %s1380_s12 = smov 125   ;;  %s1381_s13 = smov 1   ;;  %v1531_v38 = vshrl.u32 %v508_v37, 7 }
   0xf   : > { %1240 = vmatpush3.msra.mxu0 %v364_v2  ;;  %340 = vrot.lane.b32.xlu1 %v329_v4, %s1366_s23  ;;  %v444_v22 = vld [vmem:[%s1649_s4] sm:$0x3]  ;;  %s1373_s23 = smov 117   ;;  %s1384_s16 = smov 123   ;;  %vm506_vm7 = vcmask 39936   ;;  %vm534_vm8 = vcmask 1040384  }
  0x10   : > { %1241 = vmatprep.subr.mxu0 %v1364_v1  ;;  %331 = vrot.lane.b32.xlu0 %v329_v4, %s1367_s24  ;;  %v442_v28 = vld [vmem:[%s1648_s3] sm:$0x1]  ;;  %s1385_s18 = smov 13   ;;  %s1386_s20 = smov 12   ;;  %v524_v39 = vsub.s32 1, %v1531_v38  ;;  %v510_v44 = vsub.s32 0, %v1531_v38 }
  0x11   : > { %1242 = vmatpush3.msra.mxu0 %v363_v3  ;;  %1354 = vset.pattern.permute.xlu0 %v1372_v23  ;;  %v1057_v36 = vld [vmem:[%s1651_s6] sm:$0x3]  ;;  %s1387_s21 = smov 11   ;;  %v752_v48 = vsub.s32 4, %v1531_v38  ;;  %v634_v51 = vsub.s32 2, %v1531_v38  ;;  %vm630_vm9 = vcmask 23552  }
  0x12   : > { %1243 = vmatprep.subr.mxu0 %v1364_v1  ;;  %1355 = vset.pattern.permute.xlu1 %v1372_v23  ;;  %v1537_v42 = vld [vmem:[%s1647_s2] sm:$0xff]  ;;  %v697_v60 = vsub.s32 3, %v1531_v38  ;;  %vm530_vm10 = vcmask 15360   ;;  %vm693_vm11 = vcmask 7168   ;;  %vm811_vm12 = vcmask 121856  }
  0x13   : > { %1244 = vmatpush3.msra.mxu0 %v362_v5  ;;  %343 = vrot.lane.b32.xlu1 %v329_v4, %s1368_s27  ;;  %s1376_s27 = smov 4   ;;  %v525_v43 = vrot.slane %v1537_v42, %v524_v39  ;;  %v511_v50 = vrot.slane %v1537_v42, %v510_v44  ;;  %v753_v56 = vrot.slane %v1537_v42, %v752_v48  ;;  %v1185_v61 = vld [vmem:[%s1650_s5 + $0x1] sm:$0x1]  ;;  %vm874_vm13 = vcmask 105472  }
  0x14   : > { %1245 = vmatprep.subr.mxu0 %v1364_v1  ;;  %334 = vrot.lane.b32.xlu0 %v329_v4, %s1369_s28  ;;  %s1377_s28 = smov 113   ;;  %v635_v59 = vrot.slane %v1537_v42, %v634_v51  ;;  %vm937_vm14 = vcmask 97280   ;;  %vm1000_vm15 = vcmask 89088  }
  0x15   : > { %1246 = vmatpush3.msra.mxu0 %v361_v6  ;;  %v698_v6 = vrot.slane %v1537_v42, %v697_v60 }
  0x16   : > { %1247 = vmatprep.subr.mxu0 %v1364_v1 }
  0x17   : > { %1248 = vmatpush3.msra.mxu0 %v360_v7  ;;  %352 = vrot.lane.b32.xlu1 %v329_v4, %s1370_s14  ;;  %s1382_s14 = smov 124   ;;  %v815_v7 = vsub.s32 5, %v1531_v38 }
  0x18   : > { %349 = vrot.lane.b32.xlu0 %v329_v4, %s1371_s15  ;;  %1249 = vmatprep.subr.mxu0 %v1364_v1  ;;  %s1383_s15 = smov 15  }
  0x19   : > { %1250 = vmatpush3.msra.mxu0 %v359_v8  ;;  %v513_v8 = vld [vmem:[%s1650_s5] sm:$0x1] }
  0x1a   : > { %1251 = vmatprep.subr.mxu0 %v1364_v1 }
  0x1b   : > { %1252 = vmatpush3.msra.mxu0 %v358_v9 }
  0x1c   : > { %1268 = vmatprep.subr.bf16.mxu0 %v1364_v1  ;;  %447 = vperm.xlu0 %1354, %v444_v22  }
  0x81   : > { %v341_v10 = vpop.permute.xlu1 %340 }
  0x82   : > { %v332_v11 = vpop.permute.xlu0 %331 }
  0x85   : > { %v344_v12 = vpop.permute.xlu1 %343 }
  0x86   : > { %v335_v13 = vpop.permute.xlu0 %334  ;;  %v347_v16 = vsel %vm346_vm2, %v341_v10, %v344_v12 }
  0x87   : > { %v338_v14 = vsel %vm337_vm1, %v332_v11, %v335_v13 }
  0x88   : > { %v339_v15 = vmax.f32 %v329_v4, %v338_v14 }
  0x89   : > { %v353_v17 = vpop.permute.xlu1 %352 }
  0x8a   : > { %v348_v18 = vmax.f32 %v339_v15, %v347_v16  ;;  %v350_v19 = vpop.permute.xlu0 %349  ;;  %v816_v15 = vrot.slane %v1537_v42, %v815_v7  ;;  %v878_v16 = vsub.s32 6, %v1531_v38 }
  0x8b   : > { %v356_v20 = vsel %vm355_vm3, %v350_v19, %v353_v17  ;;  %v1188_v17 = vld [vmem:[%s1650_s5 + $0x2] sm:$0x1] }
  0x8c   : > { %v357_v21 = vmax.f32 %v348_v18, %v356_v20 }
  0x8e   : > { %1254 = vmatmul.mubr.msk.f32.vlgmr.msra.gmra.mxu0 %vm366_vm4, %v357_v21 }
  0x8f   : > { %1270 = vmatprep.mubr.msk.bf16.mxu0 %vm1365_vm0, %v1364_v1 }
  0x97   : > { %v448_v29 = vpop.permute.xlu0 %447 }
 0x14e   : > { %v1498_v24 = vpop.f32.mrf.mxu0 }
 0x14f   : > { %v443_v25 = vpack.c.bf16 %v1498_v24, %v1498_v24 }
 0x150   : > { %v1255_v26 = vpop.f32.mrf.mxu0 }
 0x151   : > { %v456_v27 = vsel %vm454_vm5, %v443_v25, 0  ;;  %v879_v26 = vrot.slane %v1537_v42, %v878_v16 }
 0x152   : > { %1257 = vmatpush3.bf16.msra.mxu1 %v456_v27  ;;  %v941_v27 = vsub.s32 7, %v1531_v38 }
 0x153   : > { %1262 = vmatprep.subr.bf16.mxu1 %v1364_v1 }
 0x155   : > { %1259 = vmatmul.mubr.msk.bf16.vlgmr.msra.gmra.mxu1 %vm450_vm6, %v442_v28  ;;  %v1190_v28 = vld [vmem:[%s1650_s5 + $0x3] sm:$0x1] }
 0x156   : > { %1264 = vmatprep.mubr.msk.bf16.mxu1 %vm1365_vm0, %v1364_v1 }
 0x215   : > { %v492_v30 = vpop.f32.mrf.mxu1 }
 0x216   : > { %v493_v31 = vadd.f32 %v492_v30, %v448_v29 }
 0x217   : > { %v1260_v32 = vpop.f32.mrf.mxu1 }
 0x218   : > { %v1509_v33 = vmax.f32 %v493_v31, 0.0 }
 0x219   : > { %v495_v34 = vpop.f32.mrf.mxu1 }
 0x21a   : > { %500 = vrot.lane.b32.xlu0 %v1509_v33, %s1373_s23  ;;  %515 = vrot.lane.b32.xlu1 %v1509_v33, %s1374_s25  ;;  %v754_v2 = vmul.f32 %v753_v56, %v1509_v33 }
 0x21b   : > { %v1261_v35 = vpop.f32.mrf.mxu1 }
 0x21c   : > { %v757_v12 = vpack.c.bf16 %v754_v2, %v754_v2  ;;  %v942_v35 = vrot.slane %v1537_v42, %v941_v27  ;;  %v1200_v42 = vld [vmem:[%s1647_s2 + $0x8] ss:$0 sm:$0xff] }
 0x21e   : > { %624 = vrot.lane.b32.xlu0 %v1509_v33, %s1375_s26  ;;  %518 = vrot.lane.b32.xlu1 %v1509_v33, %s1376_s27  ;;  %v762_v22 = vsel %vm534_vm8, %v757_v12, 0 }
 0x222   : > { %687 = vrot.lane.b32.xlu0 %v1509_v33, %s1377_s28  ;;  %503 = vrot.lane.b32.xlu1 %v1509_v33, %s1378_s29 }
 0x226   : > { %805 = vrot.lane.b32.xlu0 %v1509_v33, %s1367_s24  ;;  %627 = vrot.lane.b32.xlu1 %v1509_v33, %s1379_s11 }
 0x22a   : > { %868 = vrot.lane.b32.xlu0 %v1509_v33, %s1380_s12  ;;  %690 = vrot.lane.b32.xlu1 %v1509_v33, %s1381_s13 }
 0x22e   : > { %931 = vrot.lane.b32.xlu0 %v1509_v33, %s1382_s14  ;;  %808 = vrot.lane.b32.xlu1 %v1509_v33, %s1383_s15  ;;  %s327_s14 = scalar_lea.vmem %s1654_s9, %s1181_s17 }
 0x232   : > { %994 = vrot.lane.b32.xlu0 %v1509_v33, %s1384_s16  ;;  %871 = vrot.lane.b32.xlu1 %v1509_v33, %s1385_s18 }
 0x236   : > { %1060 = vperm.xlu0 %1354, %v1057_v36   ;;  %934 = vrot.lane.b32.xlu1 %v1509_v33, %s1386_s20  ;;  %v1192_v36 = vld [vmem:[%s1650_s5 + $0x4] sm:$0x1] }
 0x23a   : > { %997 = vrot.lane.b32.xlu1 %v1509_v33, %s1387_s21 }
 0x28c   : > { %v501_v40 = vpop.permute.xlu0 %500  ;;  %v516_v41 = vpop.permute.xlu1 %515 }
 0x290   : > { %v625_v45 = vpop.permute.xlu0 %624  ;;  %v519_v46 = vpop.permute.xlu1 %518 }
 0x291   : > { %v521_v47 = vsel %vm450_vm6, %v516_v41, %v519_v46 }
 0x292   : > { %v526_v49 = vmul.f32 %v525_v43, %v521_v47  ;;  %v1194_v43 = vld [vmem:[%s1650_s5 + $0x5] sm:$0x1] }
 0x294   : > { %v529_v52 = vpack.c.bf16 %v526_v49, %v526_v49  ;;  %v688_v53 = vpop.permute.xlu0 %687  ;;  %v504_v54 = vpop.permute.xlu1 %503 }
 0x295   : > { %v507_v55 = vsel %vm506_vm7, %v501_v40, %v504_v54  ;;  %v1201_v54 = vld [vmem:[%s1650_s5 + $0x8] sm:$0x1] }
 0x296   : > { %v512_v57 = vmul.f32 %v511_v50, %v507_v55  ;;  %v536_v58 = vsel %vm534_vm8, %v529_v52, 0  ;;  %v1196_v50 = vld [vmem:[%s1650_s5 + $0x6] sm:$0x1]  ;;  %v1114_v55 = vld [vmem:[%s1653_s8] sm:$0xf] }
 0x297   : > { %1263 = vmatpush3.bf16.msra.mxu1 %v536_v58  ;;  %1117 = vperm.xlu1 %1355, %v1114_v55  }
 0x298   : > { %v514_v62 = vpack.c.bf16 %v512_v57, %v512_v57  ;;  %v628_v63 = vpop.permute.xlu1 %627  ;;  %1274 = vmatprep.subr.bf16.mxu1 %v1364_v1  ;;  %v806_v3 = vpop.permute.xlu0 %805 }
 0x299   : > { %v631_v0 = vsel %vm630_vm9, %v625_v45, %v628_v63 }
 0x29a   : > { %v636_v4 = vmul.f32 %v635_v59, %v631_v0  ;;  %1265 = vmatmul.mubr.msk.bf16.vlgmr.msra.gmra.mxu1 %vm530_vm10, %v1185_v61  ;;  %v582_v5 = vsel %vm534_vm8, %v514_v62, 0 }
 0x29b   : > { %1269 = vmatpush3.bf16.msra.mxu0 %v582_v5  ;;  %1276 = vmatprep.mubr.msk.bf16.mxu1 %vm1365_vm0, %v1364_v1 }
 0x29c   : > { %v639_v9 = vpack.c.bf16 %v636_v4, %v636_v4  ;;  %v691_v10 = vpop.permute.xlu1 %690  ;;  %1280 = vmatprep.subr.bf16.mxu0 %v1364_v1  ;;  %v869_v18 = vpop.permute.xlu0 %868 }
 0x29d   : > { %v694_v11 = vsel %vm693_vm11, %v688_v53, %v691_v10  ;;  %v1198_v53 = vld [vmem:[%s1650_s5 + $0x7] sm:$0x1] }
 0x29e   : > { %v699_v13 = vmul.f32 %v698_v6, %v694_v11  ;;  %1271 = vmatmul.mubr.msk.bf16.vlgmr.msra.gmra.mxu0 %vm530_vm10, %v513_v8  ;;  %v644_v14 = vsel %vm534_vm8, %v639_v9, 0 }
 0x29f   : > { %1275 = vmatpush3.bf16.msra.mxu1 %v644_v14  ;;  %1282 = vmatprep.mubr.msk.bf16.mxu0 %vm1365_vm0, %v1364_v1 }
 0x2a0   : > { %v702_v19 = vpack.c.bf16 %v699_v13, %v699_v13  ;;  %v809_v20 = vpop.permute.xlu1 %808  ;;  %1286 = vmatprep.subr.bf16.mxu1 %v1364_v1  ;;  %v932_v32 = vpop.permute.xlu0 %931 }
 0x2a1   : > { %v812_v21 = vsel %vm811_vm12, %v806_v3, %v809_v20 }
 0x2a2   : > { %v817_v23 = vmul.f32 %v816_v15, %v812_v21  ;;  %1277 = vmatmul.mubr.msk.bf16.vlgmr.msra.gmra.mxu1 %vm530_vm10, %v1188_v17  ;;  %v707_v25 = vsel %vm534_vm8, %v702_v19, 0 }
 0x2a3   : > { %1281 = vmatpush3.bf16.msra.mxu0 %v707_v25  ;;  %1287 = vmatpush3.bf16.msra.mxu1 %v762_v22 }
 0x2a4   : > { %v820_v29 = vpack.c.bf16 %v817_v23, %v817_v23  ;;  %v872_v30 = vpop.permute.xlu1 %871  ;;  %1292 = vmatprep.subr.bf16.mxu0 %v1364_v1  ;;  %1288 = vmatprep.mubr.msk.bf16.mxu1 %vm1365_vm0, %v1364_v1  ;;  %v995_v44 = vpop.permute.xlu0 %994 }
 0x2a5   : > { %v875_v31 = vsel %vm874_vm13, %v869_v18, %v872_v30  ;;  %1298 = vmatprep.subr.bf16.mxu1 %v1364_v1 }
 0x2a6   : > { %v880_v33 = vmul.f32 %v879_v26, %v875_v31  ;;  %1283 = vmatmul.mubr.msk.bf16.vlgmr.msra.gmra.mxu0 %vm530_vm10, %v1190_v28  ;;  %v825_v34 = vsel %vm534_vm8, %v820_v29, 0 }
 0x2a7   : > { %1293 = vmatpush3.bf16.msra.mxu0 %v825_v34  ;;  %1294 = vmatprep.mubr.msk.bf16.mxu0 %vm1365_vm0, %v1364_v1 }
 0x2a8   : > { %v883_v37 = vpack.c.bf16 %v880_v33, %v880_v33  ;;  %v935_v38 = vpop.permute.xlu1 %934  ;;  %1304 = vmatprep.subr.bf16.mxu0 %v1364_v1 }
 0x2a9   : > { %v938_v39 = vsel %vm937_vm14, %v932_v32, %v935_v38 }
 0x2aa   : > { %v943_v40 = vmul.f32 %v942_v35, %v938_v39  ;;  %1289 = vmatmul.mubr.msk.bf16.vlgmr.msra.gmra.mxu1 %vm530_vm10, %v1192_v36  ;;  %v888_v41 = vsel %vm534_vm8, %v883_v37, 0 }
 0x2ab   : > { %1299 = vmatpush3.bf16.msra.mxu1 %v888_v41  ;;  %1300 = vmatprep.mubr.msk.bf16.mxu1 %vm1365_vm0, %v1364_v1 }
 0x2ac   : > { %v946_v45 = vpack.c.bf16 %v943_v40, %v943_v40  ;;  %v998_v46 = vpop.permute.xlu1 %997  ;;  %1310 = vmatprep.subr.bf16.mxu1 %v1364_v1 }
 0x2ad   : > { %v1001_v47 = vsel %vm1000_vm15, %v995_v44, %v998_v46 }
 0x2ae   : > { %v1006_v48 = vmul.f32 %v1200_v42, %v1001_v47  ;;  %1295 = vmatmul.mubr.msk.bf16.vlgmr.msra.gmra.mxu0 %vm530_vm10, %v1194_v43  ;;  %v951_v49 = vsel %vm534_vm8, %v946_v45, 0  ;;  %v1065_v42 = vld [vmem:[%s1652_s7] sm:$0x3] }
 0x2af   : > { %1305 = vmatpush3.bf16.msra.mxu0 %v951_v49  ;;  %1306 = vmatprep.mubr.msk.bf16.mxu0 %vm1365_vm0, %v1364_v1 }
 0x2b0   : > { %v1009_v51 = vpack.c.bf16 %v1006_v48, %v1006_v48  ;;  %1316 = vmatprep.subr.bf16.mxu0 %v1364_v1 }
 0x2b1   : > { %v1061_v32 = vpop.permute.xlu0 %1060 }
 0x2b2   : > { %1301 = vmatmul.mubr.msk.bf16.vlgmr.msra.gmra.mxu1 %vm530_vm10, %v1196_v50  ;;  %v1014_v52 = vsel %vm534_vm8, %v1009_v51, 0 }
 0x2b3   : > { %1311 = vmatpush3.bf16.msra.mxu1 %v1014_v52  ;;  %1312 = vmatprep.mubr.msk.bf16.mxu1 %vm1365_vm0, %v1364_v1 }
 0x2b6   : > { %1307 = vmatmul.mubr.msk.bf16.vlgmr.msra.gmra.mxu0 %vm530_vm10, %v1198_v53 }
 0x2b7   : > { %1318 = vmatprep.mubr.msk.bf16.mxu0 %vm1365_vm0, %v1364_v1  ;;  %vm1121_vm0 = vcmask 125952  }
 0x2ba   : > { %1313 = vmatmul.mubr.msk.bf16.vlgmr.msra.gmra.mxu1 %vm530_vm10, %v1201_v54 }
 0x312   : > { %v1118_v44 = vpop.permute.xlu1 %1117 }
 0x35a   : > { %v572_v56 = vpop.f32.mrf.mxu1 }
 0x35c   : > { %v1266_v57 = vpop.f32.mrf.mxu1 }
 0x35e   : > { %v575_v58 = vpop.f32.mrf.mxu1  ;;  %v618_v59 = vpop.f32.mrf.mxu0 }
 0x35f   : > { %v619_v10 = vadd.f32 %v618_v59, %v572_v56 }
 0x360   : > { %v1267_v60 = vpop.f32.mrf.mxu1  ;;  %v1272_v61 = vpop.f32.mrf.mxu0 }
 0x362   : > { %v621_v62 = vpop.f32.mrf.mxu0  ;;  %v680_v63 = vpop.f32.mrf.mxu1 }
 0x363   : > { %v686_v13 = vadd.f32 %v680_v63, %v619_v10 }
 0x364   : > { %v1273_v0 = vpop.f32.mrf.mxu0  ;;  %v1278_v2 = vpop.f32.mrf.mxu1 }
 0x366   : > { %v683_v3 = vpop.f32.mrf.mxu1  ;;  %v743_v4 = vpop.f32.mrf.mxu0 }
 0x367   : > { %v749_v16 = vadd.f32 %v743_v4, %v686_v13 }
 0x368   : > { %v1279_v1 = vpop.f32.mrf.mxu1  ;;  %v1284_v5 = vpop.f32.mrf.mxu0 }
 0x36a   : > { %v746_v6 = vpop.f32.mrf.mxu0  ;;  %v798_v7 = vpop.f32.mrf.mxu1 }
 0x36b   : > { %v804_v19 = vadd.f32 %v798_v7, %v749_v16 }
 0x36c   : > { %v1285_v8 = vpop.f32.mrf.mxu0  ;;  %v1290_v9 = vpop.f32.mrf.mxu1 }
 0x36e   : > { %v801_v11 = vpop.f32.mrf.mxu1  ;;  %v861_v12 = vpop.f32.mrf.mxu0 }
 0x36f   : > { %v867_v22 = vadd.f32 %v861_v12, %v804_v19 }
 0x370   : > { %v1291_v14 = vpop.f32.mrf.mxu1  ;;  %v1296_v15 = vpop.f32.mrf.mxu0 }
 0x372   : > { %v864_v17 = vpop.f32.mrf.mxu0  ;;  %v924_v18 = vpop.f32.mrf.mxu1 }
 0x373   : > { %v930_v26 = vadd.f32 %v924_v18, %v867_v22 }
 0x374   : > { %v1297_v20 = vpop.f32.mrf.mxu0  ;;  %v1302_v21 = vpop.f32.mrf.mxu1 }
 0x376   : > { %v927_v23 = vpop.f32.mrf.mxu1  ;;  %v987_v25 = vpop.f32.mrf.mxu0 }
 0x377   : > { %v993_v29 = vadd.f32 %v987_v25, %v930_v26 }
 0x378   : > { %v1303_v27 = vpop.f32.mrf.mxu1  ;;  %v1308_v28 = vpop.f32.mrf.mxu0 }
 0x37a   : > { %v990_v30 = vpop.f32.mrf.mxu0  ;;  %v1050_v31 = vpop.f32.mrf.mxu1 }
 0x37b   : > { %v1056_v33 = vadd.f32 %v1050_v31, %v993_v29 }
 0x37c   : > { %v1309_v34 = vpop.f32.mrf.mxu0  ;;  %v1314_v35 = vpop.f32.mrf.mxu1 }
 0x37d   : > { %v1063_v36 = vadd.f32 %v1061_v32, %v1056_v33 }
 0x37e   : > { %v1053_v37 = vpop.f32.mrf.mxu1 }
 0x37f   : > { %v1064_v38 = vmax.f32 %v1063_v36, 0.0 }
 0x380   : > { %v1315_v39 = vpop.f32.mrf.mxu1 }
 0x381   : > { %v1066_v40 = vpack.c.bf16 %v1064_v38, %v1064_v38 }
 0x383   : > { %v1071_v41 = vsel %vm534_vm8, %v1066_v40, 0 }
 0x384   : > { %1317 = vmatpush3.bf16.msra.mxu0 %v1071_v41 }
 0x387   : > { %1319 = vmatmul.mubr.msk.bf16.vlgmr.msra.gmra.mxu0 %vm530_vm10, %v1065_v42 }
 0x447   : > { %v1107_v43 = vpop.f32.mrf.mxu0 }
 0x448   : > { %v1113_v45 = vadd.f32 %v1107_v43, %v1498_v24 }
 0x449   : > { %v1320_v46 = vpop.f32.mrf.mxu0 }
 0x44a   : > { %v1120_v47 = vadd.f32 %v1118_v44, %v1113_v45 }
 0x44b   : > { %v1110_v48 = vpop.f32.mrf.mxu0 }
 0x44c   : > { %1122 = vst.msk [vmem:[%s327_s14] sm:$0xf] %vm1121_vm0, %v1120_v47 }
 0x44d   : > { %v1321_v49 = vpop.f32.mrf.mxu0 }
 0x44e PF: > { %s19_s30 = sadd.s32 1, %s1362_s30  }
 0x44f   : > { %p16_p4 = scmp.ge.s32.totalorder %s19_s30, 4  }
 0x451   :  { %18 = sbr.rel (!%p16_p4) target bundleno = 1 (0x1), region = 94 }

// kernel: hourglass_forward.12
= control target key start
LH: loop header
LB: loop body
LE: loop exit
PB: predicated region body
PF: predicated region fallthrough
CT: control target
= control target key end

     0   :  { %s1439_s13 = smov 0   ;;  %s1621_s0 = inlined_call_operand.vmem [shape: f32[2,4,16], index: 0, kind: input, shape index: {}]   ;;  %s1622_s1 = inlined_call_operand.vmem [shape: f32[2,4,64], index: 1, kind: input, shape index: {}]   ;;  %s1623_s2 = inlined_call_operand.vmem [shape: f32[16,64], index: 2, kind: input, shape index: {}]   ;;  %s1624_s3 = inlined_call_operand.vmem [shape: f32[9,16], index: 3, kind: input, shape index: {}]   ;;  %s1625_s4 = inlined_call_operand.vmem [shape: bf16[2,4], index: 4, kind: input, shape index: {}]   ;;  %s1626_s5 = inlined_call_operand.vmem [shape: f32[2,1], index: 5, kind: input, shape index: {}]   ;;  %s1627_s6 = inlined_call_operand.vmem [shape: bf16[9,2,2], index: 6, kind: input, shape index: {}]   ;;  %s1628_s7 = inlined_call_operand.vmem [shape: f32[2,1], index: 7, kind: input, shape index: {}]   ;;  %s1629_s8 = inlined_call_operand.vmem [shape: bf16[4,2], index: 8, kind: input, shape index: {}]   ;;  %s1630_s9 = inlined_call_operand.vmem [shape: f32[4,1], index: 9, kind: input, shape index: {}]   ;;  %s1631_s10 = inlined_call_operand.vmem [shape: f32[2,4,64], index: 10, kind: output, shape index: {}]  }
   0x1 LB: > { %s1199_s14 = sadd.s32 4294967295, %s1363_s13   ;;  %p1203_p0 = scmp.ge.s32.totalorder %s1363_s13, 1  ;;  %s1363_s13 = sphi %s1439_s13, %s20_s13  }
   0x2   : > { %p320_p1 = scmp.lt.s32.totalorder %s1363_s13, 3 }
   0x4   : > { %p321_p2 = pnand %p1203_p0, %p320_p1 }
   0x5   : > { %p360_p3 = scmp.lt.s32.totalorder (!%p321_p2), %s1199_s14, 1  ;;  %s1368_s23 = smov (!%p321_p2), 4  }
   0x6   : > { %324 = sbr.rel (%p321_p2) target bundleno = 972 (0x3cc), region = 60  ;;  %s1369_s24 = smov (!%p321_p2), 116  }
   0x7   : > { %s1370_s25 = smov (!%p321_p2), 117   ;;  %s1371_s26 = smov (!%p321_p2), 5  }
   0x8   : > { %s1372_s27 = smov (!%p321_p2), 115   ;;  %s1373_s28 = smov (!%p321_p2), 3  }
   0x9   : > { %s1374_s29 = smov (!%p321_p2), 113   ;;  %s1375_s30 = smov (!%p321_p2), 1  }
   0xa   : > { %s1376_s11 = smov (!%p321_p2), 127   ;;  %s1377_s12 = smov (!%p321_p2), 15  }
   0xb   : > { %v1365_v0 = vmov 0.0   ;;  %vm1366_vm0 = vmmov 0   ;;  %v378_v1 = vld [vmem:[%s1626_s5] sm:$0x3]  ;;  %s1633_s14 = smov (!%p360_p3, %s1199_s14), 1  ;;  %v1367_v2 = vmov 0   ;;  %v442_v16 = vlaneseq }
   0xc   : > { %1255 = vmatprep.subr.bf16.mxu0 %v1365_v0  ;;  %1257 = vmatprep.mubr.msk.bf16.mxu0 %vm1366_vm0, %v1365_v0  ;;  %s1456_s17 = sshll.u32 %s1633_s14, 2  ;;  %vm388_vm1 = vcmask 1041408   ;;  %v376_v6 = vld [vmem:[%s1625_s4] sm:$0x1]  ;;  %vm384_vm2 = vcmask 31744   ;;  %s1378_s14 = smov 125  }
   0xd   : > { %1355 = vset.pattern.permute.xlu0 %v1367_v2  ;;  %1261 = vmatprep.subr.bf16.mxu1 %v1365_v0  ;;  %s363_s20 = scalar_lea.vmem %s1621_s0, %s1456_s17  ;;  %s1379_s15 = smov 13   ;;  %v1048_v14 = vld [vmem:[%s1630_s9] sm:$0xf]  ;;  %v1497_v17 = vshrl.u32 %v442_v16, 7  ;;  %vm440_vm3 = vcmask 39936   ;;  %vm468_vm4 = vcmask 1040384  }
   0xe   : > { %381 = vperm.xlu0 %1355, %v378_v1   ;;  %1263 = vmatprep.mubr.msk.bf16.mxu1 %vm1366_vm0, %v1365_v0  ;;  %v1462_v3 = vld [vmem:[%s363_s20] sm:$0xf]  ;;  %s1380_s16 = smov 124   ;;  %s1381_s18 = smov 12   ;;  %vm564_vm5 = vcmask 23552   ;;  %vm464_vm6 = vcmask 15360  }
   0xf   : > { %1356 = vset.pattern.permute.xlu1 %v1367_v2  ;;  %v377_v4 = vpack.c.bf16 %v1462_v3, %v1462_v3  ;;  %s1382_s19 = smov 123   ;;  %s1383_s20 = smov 11   ;;  %v991_v15 = vld [vmem:[%s1628_s7] sm:$0x3]  ;;  %v458_v18 = vsub.s32 1, %v1497_v17  ;;  %v444_v21 = vsub.s32 0, %v1497_v17 }
  0x10   : > { %v1503_v19 = vld [vmem:[%s1624_s3] sm:$0xff]  ;;  %v686_v25 = vsub.s32 4, %v1497_v17  ;;  %v568_v28 = vsub.s32 2, %v1497_v17  ;;  %v631_v37 = vsub.s32 3, %v1497_v17  ;;  %vm627_vm7 = vcmask 7168   ;;  %s371_s22 = scalar_lea.vmem %s1631_s10, %s1456_s17 }
  0x11   : > { %v390_v5 = vsel %vm388_vm1, %v377_v4, 0  ;;  %v459_v20 = vrot.slane %v1503_v19, %v458_v18  ;;  %v445_v27 = vrot.slane %v1503_v19, %v444_v21  ;;  %v1208_v38 = vld [vmem:[%s1627_s6 + $0x1] sm:$0x1]  ;;  %v749_v47 = vsub.s32 5, %v1497_v17  ;;  %v447_v48 = vld [vmem:[%s1627_s6] sm:$0x1] }
  0x12   : > { %1256 = vmatpush3.bf16.msra.mxu0 %v390_v5  ;;  %v687_v33 = vrot.slane %v1503_v19, %v686_v25  ;;  %v569_v36 = vrot.slane %v1503_v19, %v568_v28  ;;  %v632_v46 = vrot.slane %v1503_v19, %v631_v37  ;;  %vm745_vm8 = vcmask 121856   ;;  %v1211_v58 = vld [vmem:[%s1627_s6 + $0x2] sm:$0x1] }
  0x13   : > { %1267 = vmatprep.subr.bf16.mxu0 %v1365_v0  ;;  %v750_v56 = vrot.slane %v1503_v19, %v749_v47  ;;  %v812_v57 = vsub.s32 6, %v1497_v17  ;;  %vm808_vm9 = vcmask 105472   ;;  %v875_v5 = vsub.s32 7, %v1497_v17 }
  0x14   : > { %vm871_vm10 = vcmask 97280   ;;  %vm934_vm11 = vcmask 89088   ;;  %vm1058_vm12 = vcmask 130048   ;;  %vm1132_vm13 = vcmask 519168  }
  0x15   : > { %1258 = vmatmul.mubr.msk.bf16.vlgmr.msra.gmra.mxu0 %vm384_vm2, %v376_v6  ;;  %v813_v4 = vrot.slane %v1503_v19, %v812_v57  ;;  %v1213_v6 = vld [vmem:[%s1627_s6 + $0x3] sm:$0x1] }
  0x16   : > { %1269 = vmatprep.mubr.msk.bf16.mxu0 %vm1366_vm0, %v1365_v0 }
  0x89   : > { %v382_v7 = vpop.permute.xlu0 %381 }
  0xd5   : > { %v426_v8 = vpop.f32.mrf.mxu0 }
  0xd6   : > { %v427_v9 = vadd.f32 %v426_v8, %v382_v7 }
  0xd7   : > { %v1259_v10 = vpop.f32.mrf.mxu0 }
  0xd8   : > { %v1473_v11 = vmax.f32 %v427_v9, 0.0 }
  0xd9   : > { %v429_v12 = vpop.f32.mrf.mxu0 }
  0xda   : > { %452 = vrot.lane.b32.xlu1 %v1473_v11, %s1368_s23  ;;  %449 = vrot.lane.b32.xlu0 %v1473_v11, %s1369_s24  ;;  %v688_v43 = vmul.f32 %v687_v33, %v1473_v11  ;;  %v1224_v33 = vld [vmem:[%s1627_s6 + $0x8] sm:$0x1] }
  0xdb   : > { %v1260_v13 = vpop.f32.mrf.mxu0 }
  0xdc   : > { %v691_v53 = vpack.c.bf16 %v688_v43, %v688_v43  ;;  %v876_v13 = vrot.slane %v1503_v19, %v875_v5  ;;  %v1223_v19 = vld [vmem:[%s1624_s3 + $0x8] ss:$0 sm:$0xff] }
  0xde   : > { %434 = vrot.lane.b32.xlu1 %v1473_v11, %s1370_s25  ;;  %437 = vrot.lane.b32.xlu0 %v1473_v11, %s1371_s26  ;;  %v696_v63 = vsel %vm468_vm4, %v691_v53, 0 }
  0xe2   : > { %558 = vrot.lane.b32.xlu1 %v1473_v11, %s1372_s27  ;;  %561 = vrot.lane.b32.xlu0 %v1473_v11, %s1373_s28 }
  0xe6   : > { %621 = vrot.lane.b32.xlu1 %v1473_v11, %s1374_s29  ;;  %624 = vrot.lane.b32.xlu0 %v1473_v11, %s1375_s30 }
  0xea   : > { %739 = vrot.lane.b32.xlu1 %v1473_v11, %s1376_s11  ;;  %742 = vrot.lane.b32.xlu0 %v1473_v11, %s1377_s12 }
  0xee   : > { %802 = vrot.lane.b32.xlu1 %v1473_v11, %s1378_s14  ;;  %805 = vrot.lane.b32.xlu0 %v1473_v11, %s1379_s15 }
  0xf2   : > { %865 = vrot.lane.b32.xlu1 %v1473_v11, %s1380_s16  ;;  %868 = vrot.lane.b32.xlu0 %v1473_v11, %s1381_s18 }
  0xf6   : > { %928 = vrot.lane.b32.xlu1 %v1473_v11, %s1382_s19  ;;  %931 = vrot.lane.b32.xlu0 %v1473_v11, %s1383_s20  ;;  %s367_s19 = scalar_lea.vmem %s1622_s1, %s1456_s17 }
  0xfa   : > { %1051 = vperm.xlu0 %1355, %v1048_v14   ;;  %994 = vperm.xlu1 %1356, %v991_v15   ;;  %v1215_v14 = vld [vmem:[%s1627_s6 + $0x4] sm:$0x1] }
 0x14c   : > { %v453_v22 = vpop.permute.xlu1 %452  ;;  %v450_v23 = vpop.permute.xlu0 %449 }
 0x14d   : > { %v455_v24 = vsel %vm384_vm2, %v450_v23, %v453_v22  ;;  %v1217_v22 = vld [vmem:[%s1627_s6 + $0x5] sm:$0x1] }
 0x14e   : > { %v460_v26 = vmul.f32 %v459_v20, %v455_v24 }
 0x150   : > { %v435_v29 = vpop.permute.xlu1 %434  ;;  %v438_v30 = vpop.permute.xlu0 %437  ;;  %v463_v31 = vpack.c.bf16 %v460_v26, %v460_v26 }
 0x151   : > { %v441_v32 = vsel %vm440_vm3, %v435_v29, %v438_v30  ;;  %v1219_v29 = vld [vmem:[%s1627_s6 + $0x6] sm:$0x1] }
 0x152   : > { %v446_v34 = vmul.f32 %v445_v27, %v441_v32  ;;  %v470_v35 = vsel %vm468_vm4, %v463_v31, 0  ;;  %v1221_v32 = vld [vmem:[%s1627_s6 + $0x7] sm:$0x1] }
 0x153   : > { %1262 = vmatpush3.bf16.msra.mxu1 %v470_v35 }
 0x154   : > { %v448_v39 = vpack.c.bf16 %v446_v34, %v446_v34  ;;  %v559_v40 = vpop.permute.xlu1 %558  ;;  %v562_v41 = vpop.permute.xlu0 %561  ;;  %1273 = vmatprep.subr.bf16.mxu1 %v1365_v0 }
 0x155   : > { %v565_v42 = vsel %vm564_vm5, %v559_v40, %v562_v41 }
 0x156   : > { %v570_v44 = vmul.f32 %v569_v36, %v565_v42  ;;  %1264 = vmatmul.mubr.msk.bf16.vlgmr.msra.gmra.mxu1 %vm464_vm6, %v1208_v38  ;;  %v516_v45 = vsel %vm468_vm4, %v448_v39, 0 }
 0x157   : > { %1268 = vmatpush3.bf16.msra.mxu0 %v516_v45  ;;  %1275 = vmatprep.mubr.msk.bf16.mxu1 %vm1366_vm0, %v1365_v0 }
 0x158   : > { %v573_v49 = vpack.c.bf16 %v570_v44, %v570_v44  ;;  %v622_v50 = vpop.permute.xlu1 %621  ;;  %v625_v51 = vpop.permute.xlu0 %624  ;;  %1279 = vmatprep.subr.bf16.mxu0 %v1365_v0 }
 0x159   : > { %v628_v52 = vsel %vm627_vm7, %v622_v50, %v625_v51 }
 0x15a   : > { %v633_v54 = vmul.f32 %v632_v46, %v628_v52  ;;  %1270 = vmatmul.mubr.msk.bf16.vlgmr.msra.gmra.mxu0 %vm464_vm6, %v447_v48  ;;  %v578_v55 = vsel %vm468_vm4, %v573_v49, 0 }
 0x15b   : > { %1274 = vmatpush3.bf16.msra.mxu1 %v578_v55  ;;  %1281 = vmatprep.mubr.msk.bf16.mxu0 %vm1366_vm0, %v1365_v0 }
 0x15c   : > { %v636_v59 = vpack.c.bf16 %v633_v54, %v633_v54  ;;  %v740_v60 = vpop.permute.xlu1 %739  ;;  %v743_v61 = vpop.permute.xlu0 %742  ;;  %1285 = vmatprep.subr.bf16.mxu1 %v1365_v0 }
 0x15d   : > { %v746_v62 = vsel %vm745_vm8, %v740_v60, %v743_v61 }
 0x15e   : > { %v751_v1 = vmul.f32 %v750_v56, %v746_v62  ;;  %1276 = vmatmul.mubr.msk.bf16.vlgmr.msra.gmra.mxu1 %vm464_vm6, %v1211_v58  ;;  %v641_v2 = vsel %vm468_vm4, %v636_v59, 0 }
 0x15f   : > { %1280 = vmatpush3.bf16.msra.mxu0 %v641_v2  ;;  %1286 = vmatpush3.bf16.msra.mxu1 %v696_v63 }
 0x160   : > { %v754_v7 = vpack.c.bf16 %v751_v1, %v751_v1  ;;  %v803_v8 = vpop.permute.xlu1 %802  ;;  %v806_v9 = vpop.permute.xlu0 %805  ;;  %1291 = vmatprep.subr.bf16.mxu0 %v1365_v0  ;;  %1287 = vmatprep.mubr.msk.bf16.mxu1 %vm1366_vm0, %v1365_v0 }
 0x161   : > { %v809_v10 = vsel %vm808_vm9, %v803_v8, %v806_v9  ;;  %1297 = vmatprep.subr.bf16.mxu1 %v1365_v0 }
 0x162   : > { %v814_v11 = vmul.f32 %v813_v4, %v809_v10  ;;  %1282 = vmatmul.mubr.msk.bf16.vlgmr.msra.gmra.mxu0 %vm464_vm6, %v1213_v6  ;;  %v759_v12 = vsel %vm468_vm4, %v754_v7, 0 }
 0x163   : > { %1292 = vmatpush3.bf16.msra.mxu0 %v759_v12  ;;  %1293 = vmatprep.mubr.msk.bf16.mxu0 %vm1366_vm0, %v1365_v0 }
 0x164   : > { %v817_v15 = vpack.c.bf16 %v814_v11, %v814_v11  ;;  %v866_v16 = vpop.permute.xlu1 %865  ;;  %v869_v17 = vpop.permute.xlu0 %868  ;;  %1303 = vmatprep.subr.bf16.mxu0 %v1365_v0 }
 0x165   : > { %v872_v18 = vsel %vm871_vm10, %v866_v16, %v869_v17 }
 0x166   : > { %v877_v20 = vmul.f32 %v876_v13, %v872_v18  ;;  %1288 = vmatmul.mubr.msk.bf16.vlgmr.msra.gmra.mxu1 %vm464_vm6, %v1215_v14  ;;  %v822_v21 = vsel %vm468_vm4, %v817_v15, 0 }
 0x167   : > { %1298 = vmatpush3.bf16.msra.mxu1 %v822_v21  ;;  %1299 = vmatprep.mubr.msk.bf16.mxu1 %vm1366_vm0, %v1365_v0 }
 0x168   : > { %v880_v23 = vpack.c.bf16 %v877_v20, %v877_v20  ;;  %v929_v24 = vpop.permute.xlu1 %928  ;;  %v932_v25 = vpop.permute.xlu0 %931  ;;  %1309 = vmatprep.subr.bf16.mxu1 %v1365_v0 }
 0x169   : > { %v935_v26 = vsel %vm934_vm11, %v929_v24, %v932_v25 }
 0x16a   : > { %v940_v27 = vmul.f32 %v1223_v19, %v935_v26  ;;  %1294 = vmatmul.mubr.msk.bf16.vlgmr.msra.gmra.mxu0 %vm464_vm6, %v1217_v22  ;;  %v885_v28 = vsel %vm468_vm4, %v880_v23, 0  ;;  %v999_v19 = vld [vmem:[%s1629_s8] sm:$0x3]  ;;  %v1056_v22 = vld [vmem:[%s1623_s2 + $0x8] sm:$0xff] }
 0x16b   : > { %1304 = vmatpush3.bf16.msra.mxu0 %v885_v28  ;;  %1305 = vmatprep.mubr.msk.bf16.mxu0 %vm1366_vm0, %v1365_v0  ;;  %v1055_v23 = vld [vmem:[%s1623_s2] sm:$0xff] }
 0x16c   : > { %v943_v30 = vpack.c.bf16 %v940_v27, %v940_v27  ;;  %1315 = vmatprep.subr.bf16.mxu0 %v1365_v0 }
 0x16e   : > { %1300 = vmatmul.mubr.msk.bf16.vlgmr.msra.gmra.mxu1 %vm464_vm6, %v1219_v29  ;;  %v948_v31 = vsel %vm468_vm4, %v943_v30, 0 }
 0x16f   : > { %1310 = vmatpush3.bf16.msra.mxu1 %v948_v31  ;;  %1311 = vmatprep.mubr.msk.bf16.mxu1 %vm1366_vm0, %v1365_v0 }
 0x170   : > { %1321 = vmatprep.subr.mxu1 %v1365_v0 }
 0x172   : > { %1306 = vmatmul.mubr.msk.bf16.vlgmr.msra.gmra.mxu0 %vm464_vm6, %v1221_v32 }
 0x173   : > { %1317 = vmatprep.mubr.msk.bf16.mxu0 %vm1366_vm0, %v1365_v0 }
 0x175   : > { %v995_v9 = vpop.permute.xlu1 %994  ;;  %v1052_v26 = vpop.permute.xlu0 %1051 }
 0x176   : > { %1312 = vmatmul.mubr.msk.bf16.vlgmr.msra.gmra.mxu1 %vm464_vm6, %v1224_v33 }
 0x177   : > { %1325 = vmatprep.mubr.msk.f32.mxu1 %vm1366_vm0, %v1365_v0  ;;  %1322 = vmatpush3.msra.mxu1 %v1056_v22 }
 0x178   : > { %1323 = vmatprep.subr.mxu1 %v1365_v0  ;;  %v1057_v0 = vld [vmem:[%s367_s19] sm:$0xf] }
 0x179   : > { %1324 = vmatpush3.msra.mxu1 %v1055_v23 }
 0x216   : > { %v506_v34 = vpop.f32.mrf.mxu1 }
 0x218   : > { %v1265_v35 = vpop.f32.mrf.mxu1 }
 0x21a   : > { %v509_v36 = vpop.f32.mrf.mxu1  ;;  %v552_v37 = vpop.f32.mrf.mxu0 }
 0x21b   : > { %v553_v52 = vadd.f32 %v552_v37, %v506_v34 }
 0x21c   : > { %v1266_v38 = vpop.f32.mrf.mxu1  ;;  %v1271_v39 = vpop.f32.mrf.mxu0 }
 0x21e   : > { %v555_v40 = vpop.f32.mrf.mxu0  ;;  %v614_v41 = vpop.f32.mrf.mxu1 }
 0x21f   : > { %v620_v55 = vadd.f32 %v614_v41, %v553_v52 }
 0x220   : > { %v1272_v42 = vpop.f32.mrf.mxu0  ;;  %v1277_v43 = vpop.f32.mrf.mxu1 }
 0x222   : > { %v617_v44 = vpop.f32.mrf.mxu1  ;;  %v677_v45 = vpop.f32.mrf.mxu0 }
 0x223   : > { %v683_v58 = vadd.f32 %v677_v45, %v620_v55 }
 0x224   : > { %v1278_v46 = vpop.f32.mrf.mxu1  ;;  %v1283_v47 = vpop.f32.mrf.mxu0 }
 0x226   : > { %v680_v48 = vpop.f32.mrf.mxu0  ;;  %v732_v49 = vpop.f32.mrf.mxu1 }
 0x227   : > { %v738_v61 = vadd.f32 %v732_v49, %v683_v58 }
 0x228   : > { %v1284_v50 = vpop.f32.mrf.mxu0  ;;  %v1289_v51 = vpop.f32.mrf.mxu1 }
 0x22a   : > { %v735_v53 = vpop.f32.mrf.mxu1  ;;  %v795_v54 = vpop.f32.mrf.mxu0 }
 0x22b   : > { %v801_v1 = vadd.f32 %v795_v54, %v738_v61 }
 0x22c   : > { %v1290_v56 = vpop.f32.mrf.mxu1  ;;  %v1295_v57 = vpop.f32.mrf.mxu0 }
 0x22e   : > { %v798_v59 = vpop.f32.mrf.mxu0  ;;  %v858_v60 = vpop.f32.mrf.mxu1 }
 0x22f   : > { %v864_v5 = vadd.f32 %v858_v60, %v801_v1 }
 0x230   : > { %v1296_v62 = vpop.f32.mrf.mxu0  ;;  %v1301_v63 = vpop.f32.mrf.mxu1 }
 0x232   : > { %v861_v2 = vpop.f32.mrf.mxu1  ;;  %v921_v4 = vpop.f32.mrf.mxu0 }
 0x233   : > { %v927_v8 = vadd.f32 %v921_v4, %v864_v5 }
 0x234   : > { %v1302_v6 = vpop.f32.mrf.mxu1  ;;  %v1307_v7 = vpop.f32.mrf.mxu0 }
 0x236   : > { %v924_v10 = vpop.f32.mrf.mxu0  ;;  %v984_v11 = vpop.f32.mrf.mxu1 }
 0x237   : > { %v990_v12 = vadd.f32 %v984_v11, %v927_v8 }
 0x238   : > { %v1308_v13 = vpop.f32.mrf.mxu0  ;;  %v1313_v14 = vpop.f32.mrf.mxu1 }
 0x239   : > { %v997_v15 = vadd.f32 %v995_v9, %v990_v12 }
 0x23a   : > { %v987_v16 = vpop.f32.mrf.mxu1 }
 0x23b   : > { %v998_v17 = vmax.f32 %v997_v15, 0.0 }
 0x23c   : > { %v1314_v18 = vpop.f32.mrf.mxu1 }
 0x23d   : > { %v1000_v20 = vpack.c.bf16 %v998_v17, %v998_v17 }
 0x23f   : > { %v1005_v21 = vsel %vm468_vm4, %v1000_v20, 0 }
 0x240   : > { %1316 = vmatpush3.bf16.msra.mxu0 %v1005_v21 }
 0x243   : > { %1318 = vmatmul.mubr.msk.bf16.vlgmr.msra.gmra.mxu0 %vm464_vm6, %v999_v19 }
 0x303   : > { %v1041_v24 = vpop.f32.mrf.mxu0 }
 0x304   : > { %v1047_v25 = vadd.f32 %v1041_v24, %v1462_v3 }
 0x305   : > { %v1319_v27 = vpop.f32.mrf.mxu0 }
 0x306   : > { %v1054_v28 = vadd.f32 %v1052_v26, %v1047_v25 }
 0x307   : > { %v1044_v29 = vpop.f32.mrf.mxu0 }
 0x308   : > { %1326 = vmatmul.mubr.msk.f32.vlgmr.msra.gmra.mxu1 %vm1058_vm12, %v1054_v28 }
 0x309   : > { %v1320_v30 = vpop.f32.mrf.mxu0 }
 0x3c8   : > { %v1128_v31 = vpop.f32.mrf.mxu1 }
 0x3c9   : > { %v1129_v32 = vadd.f32 %v1128_v31, %v1057_v0 }
 0x3ca   : > { %v1327_v3 = vpop.f32.mrf.mxu1 }
 0x3cb   : > { %1133 = vst.msk [vmem:[%s371_s22] sm:$0xf] %vm1132_vm13, %v1129_v32 }
 0x3cc PF: > { %s20_s13 = sadd.s32 1, %s1363_s13  }
 0x3cd   : > { %p17_p4 = scmp.ge.s32.totalorder %s20_s13, 4  }
 0x3cf   :  { %19 = sbr.rel (!%p17_p4) target bundleno = 1 (0x1), region = 101 }

// kernel: hourglass_forward.7
= control target key start
LH: loop header
LB: loop body
LE: loop exit
PB: predicated region body
PF: predicated region fallthrough
CT: control target
= control target key end

     0   :  { %s1318_s27 = smov 0   ;;  %s1509_s0 = inlined_call_operand.vmem [shape: f32[2,4,256], index: 0, kind: input, shape index: {}]   ;;  %s1510_s1 = inlined_call_operand.vmem [shape: f32[9,256], index: 1, kind: input, shape index: {}]   ;;  %s1511_s2 = inlined_call_operand.vmem [shape: bf16[2,4], index: 2, kind: input, shape index: {}]   ;;  %s1512_s3 = inlined_call_operand.vmem [shape: f32[2,1], index: 3, kind: input, shape index: {}]   ;;  %s1513_s4 = inlined_call_operand.vmem [shape: bf16[9,2,2], index: 4, kind: input, shape index: {}]   ;;  %s1514_s5 = inlined_call_operand.vmem [shape: f32[2,1], index: 5, kind: input, shape index: {}]   ;;  %s1515_s6 = inlined_call_operand.vmem [shape: bf16[4,2], index: 6, kind: input, shape index: {}]   ;;  %s1516_s7 = inlined_call_operand.vmem [shape: f32[4,1], index: 7, kind: input, shape index: {}]   ;;  %s1517_s8 = inlined_call_operand.vmem [shape: f32[2,4,256], index: 8, kind: output, shape index: {}]  }
   0x1 LB: > { %s1189_s28 = sadd.s32 4294967295, %s1261_s27   ;;  %p1193_p0 = scmp.ge.s32.totalorder %s1261_s27, 1  ;;  %s1261_s27 = sphi %s1318_s27, %s18_s27  }
   0x2   : > { %p262_p1 = scmp.lt.s32.totalorder %s1261_s27, 3 }
   0x4   : > { %p263_p2 = pnand %p1193_p0, %p262_p1 }
   0x5   : > { %p296_p3 = scmp.lt.s32.totalorder (!%p263_p2), %s1189_s28, 1  ;;  %s1264_s15 = smov (!%p263_p2), 16  }
   0x6   : > { %266 = sbr.rel (%p263_p2) target bundleno = 787 (0x313), region = 52  ;;  %s1265_s16 = smov (!%p263_p2), 17  }
   0x7   : > { %s1266_s17 = smov (!%p263_p2), 15   ;;  %s1267_s18 = smov (!%p263_p2), 1  }
   0x8   : > { %s1268_s19 = smov (!%p263_p2), 127   ;;  %s1269_s20 = smov (!%p263_p2), 113  }
   0x9   : > { %s1270_s21 = smov (!%p263_p2), 112   ;;  %s1271_s22 = smov (!%p263_p2), 111  }
   0xb   : > { %v1263_v0 = vmov 0   ;;  %v318_v1 = vld [vmem:[%s1512_s3] sm:$0x3]  ;;  %s1519_s28 = smov (!%p296_p3, %s1189_s28), 1  ;;  %vm328_vm0 = vcmask 1041408   ;;  %vm324_vm1 = vcmask 31744   ;;  %v390_v19 = vlaneseq }
   0xc   : > { %367 = vmatprep.mubr.bf16.mxu0 %v1263_v0  ;;  %1252 = vset.pattern.permute.xlu0 %v1263_v0  ;;  %s1232_s9 = sshll.u32 %s1519_s28, 3  ;;  %v312_v7 = vld [vmem:[%s1511_s2] sm:$0x1]  ;;  %v1388_v23 = vld [vmem:[%s1510_s1 + $0x8] sm:$0xff]  ;;  %vm408_vm2 = vcmask 130048   ;;  %vm385_vm3 = vcmask 138240  }
   0xd   : > { %321 = vperm.xlu0 %1252, %v318_v1   ;;  %470 = vmatprep.mubr.bf16.mxu1 %v1263_v0  ;;  %s300_s12 = scalar_lea.vmem %s1509_s0, %s1232_s9  ;;  %v1051_v17 = vld [vmem:[%s1514_s5] sm:$0x3]  ;;  %v1377_v20 = vshrl.u32 %v390_v19, 7  ;;  %vm431_vm4 = vcmask 1040384   ;;  %vm534_vm5 = vcmask 121856   ;;  %vm427_vm6 = vcmask 15360  }
   0xe   : > { %1253 = vset.pattern.permute.xlu1 %v1263_v0  ;;  %v1341_v2 = vld [vmem:[%s300_s12] sm:$0xff]  ;;  %vm610_vm7 = vcmask 7168   ;;  %vm751_vm8 = vcmask 1039360   ;;  %vm827_vm9 = vcmask 924672   ;;  %vm903_vm10 = vcmask 916480  }
   0xf   : > { %v314_v3 = vcombine.high %v1341_v2, %v1341_v2  ;;  %v316_v4 = vpack.c.bf16 %v1341_v2, %v1341_v2  ;;  %v1119_v18 = vld [vmem:[%s1516_s7] sm:$0xf]  ;;  %v415_v21 = vsub.s32 1, %v1377_v20  ;;  %v392_v26 = vsub.s32 0, %v1377_v20 }
  0x10   : > { %v1383_v22 = vld [vmem:[%s1510_s1] sm:$0xff]  ;;  %v683_v28 = vsub.s32 4, %v1377_v20  ;;  %v541_v32 = vsub.s32 2, %v1377_v20  ;;  %v617_v46 = vsub.s32 3, %v1377_v20  ;;  %v759_v57 = vsub.s32 5, %v1377_v20 }
  0x11   : > { %v317_v5 = vpack.c.bf16 %v314_v3, %v314_v3  ;;  %v330_v6 = vsel %vm328_vm0, %v316_v4, 0  ;;  %v416_v25 = vrot.slane %v1383_v22, %v415_v21  ;;  %v420_v27 = vrot.slane %v1388_v23, %v415_v21  ;;  %v1200_v52 = vld [vmem:[%s1513_s4 + $0x1] sm:$0x1]  ;;  %v1205_v21 = vld [vmem:[%s1513_s4 + $0x2] sm:$0x1] }
  0x12   : > { %v393_v35 = vrot.slane %v1383_v22, %v392_v26  ;;  %v397_v36 = vrot.slane %v1388_v23, %v392_v26  ;;  %v688_v38 = vrot.slane %v1388_v23, %v683_v28  ;;  %v684_v39 = vrot.slane %v1383_v22, %v683_v28 }
  0x13   : > { %1198 = vmatprep.subr.msk.bf16.mxu0 %vm328_vm0, %v317_v5  ;;  %v542_v45 = vrot.slane %v1383_v22, %v541_v32  ;;  %v546_v51 = vrot.slane %v1388_v23, %v541_v32  ;;  %v618_v60 = vrot.slane %v1383_v22, %v617_v46  ;;  %v622_v61 = vrot.slane %v1388_v23, %v617_v46  ;;  %v400_v5 = vld [vmem:[%s1513_s4] sm:$0x1] }
  0x14   : > { %350 = vmatpush1.bf16.msra.mxu0 %v330_v6  ;;  %vm979_vm11 = vcmask 908288  }
  0x17   : > { %1199 = vmatmul.mubr.msk.bf16.vlgmr.msra.gmra.mxu0 %vm324_vm1, %v312_v7 }
  0x18   : > { %520 = vmatprep.mubr.bf16.mxu0 %v1263_v0 }
  0x88   : > { %v322_v8 = vpop.permute.xlu0 %321 }
  0xd7   : > { %v369_v9 = vpop.f32.mrf.mxu0 }
  0xd8   : > { %v370_v10 = vadd.f32 %v369_v9, %v322_v8 }
  0xd9   : > { %v371_v11 = vpop.f32.mrf.mxu0 }
  0xda   : > { %v1351_v12 = vmax.f32 %v370_v10, 0.0  ;;  %v372_v13 = vadd.f32 %v371_v11, %v322_v8  ;;  %v760_v10 = vrot.slane %v1383_v22, %v759_v57 }
  0xdb   : > { %v373_v14 = vpop.f32.mrf.mxu0 }
  0xdc   : > { %v1353_v15 = vmax.f32 %v372_v13, 0.0  ;;  %406 = vrot.lane.b32.xlu1 %v1351_v12, %s1264_s15  ;;  %v689_v53 = vmul.f32 %v684_v39, %v1351_v12  ;;  %v764_v13 = vrot.slane %v1388_v23, %v759_v57  ;;  %v835_v14 = vsub.s32 6, %v1377_v20  ;;  %v1224_v57 = vld [vmem:[%s1510_s1 + $0x18] ss:$0 sm:$0xff] }
  0xdd   : > { %v374_v16 = vpop.f32.mrf.mxu0 }
  0xde   : > { %403 = vrot.lane.b32.xlu0 %v1353_v15, %s1264_s15  ;;  %v690_v4 = vmul.f32 %v688_v38, %v1353_v15  ;;  %v693_v6 = vpack.c.bf16 %v689_v53, %v689_v53 }
  0xe0   : > { %379 = vrot.lane.b32.xlu1 %v1353_v15, %s1265_s16  ;;  %v694_v19 = vpack.c.bf16 %v690_v4, %v690_v4 }
  0xe2   : > { %383 = vrot.lane.b32.xlu0 %v1351_v12, %s1265_s16 }
  0xe4   : > { %529 = vrot.lane.b32.xlu1 %v1353_v15, %s1266_s17 }
  0xe6   : > { %532 = vrot.lane.b32.xlu0 %v1351_v12, %s1266_s17 }
  0xe8   : > { %605 = vrot.lane.b32.xlu1 %v1353_v15, %s1267_s18 }
  0xea   : > { %608 = vrot.lane.b32.xlu0 %v1351_v12, %s1267_s18 }
  0xec   : > { %747 = vrot.lane.b32.xlu1 %v1351_v12, %s1268_s19 }
  0xee   : > { %749 = vrot.lane.b32.xlu0 %v1353_v15, %s1268_s19  ;;  %s305_s19 = scalar_lea.vmem %s1517_s8, %s1232_s9 }
  0xf0   : > { %823 = vrot.lane.b32.xlu1 %v1351_v12, %s1269_s20 }
  0xf2   : > { %825 = vrot.lane.b32.xlu0 %v1353_v15, %s1269_s20 }
  0xf4   : > { %899 = vrot.lane.b32.xlu1 %v1351_v12, %s1270_s21 }
  0xf6   : > { %901 = vrot.lane.b32.xlu0 %v1353_v15, %s1270_s21 }
  0xf8   : > { %975 = vrot.lane.b32.xlu1 %v1351_v12, %s1271_s22 }
  0xfa   : > { %977 = vrot.lane.b32.xlu0 %v1353_v15, %s1271_s22 }
  0xfc   : > { %1054 = vperm.xlu1 %1253, %v1051_v17  }
  0xfe   : > { %1122 = vperm.xlu0 %1252, %v1119_v18  }
 0x14e   : > { %v407_v24 = vpop.permute.xlu1 %406 }
 0x150   : > { %v404_v29 = vpop.permute.xlu0 %403 }
 0x151   : > { %v409_v30 = vsel %vm408_vm2, %v407_v24, %v404_v29  ;;  %v412_v31 = vsel %vm408_vm2, %v404_v29, %v407_v24 }
 0x152   : > { %v421_v33 = vmul.f32 %v416_v25, %v412_v31  ;;  %v380_v34 = vpop.permute.xlu1 %379  ;;  %v422_v37 = vmul.f32 %v420_v27, %v409_v30  ;;  %v699_v27 = vsel %vm431_vm4, %v693_v6, 0  ;;  %v836_v30 = vrot.slane %v1383_v22, %v835_v14  ;;  %v1217_v6 = vld [vmem:[%s1513_s4 + $0x6] sm:$0x1] }
 0x153   : > { %v911_v31 = vsub.s32 7, %v1377_v20 }
 0x154   : > { %v384_v40 = vpop.permute.xlu0 %383  ;;  %v426_v41 = vpack.c.bf16 %v422_v37, %v422_v37  ;;  %v425_v42 = vpack.c.bf16 %v421_v33, %v421_v33  ;;  %v1208_v37 = vld [vmem:[%s1513_s4 + $0x3] sm:$0x1] }
 0x155   : > { %v386_v43 = vsel %vm385_vm3, %v384_v40, %v380_v34  ;;  %v389_v44 = vsel %vm385_vm3, %v380_v34, %v384_v40 }
 0x156   : > { %v398_v47 = vmul.f32 %v393_v35, %v389_v44  ;;  %v399_v48 = vmul.f32 %v397_v36, %v386_v43  ;;  %1201 = vmatprep.subr.msk.bf16.mxu1 %vm431_vm4, %v426_v41  ;;  %v530_v49 = vpop.permute.xlu1 %529  ;;  %v433_v50 = vsel %vm431_vm4, %v425_v42, 0  ;;  %v840_v36 = vrot.slane %v1388_v23, %v835_v14 }
 0x157   : > { %453 = vmatpush1.bf16.msra.mxu1 %v433_v50  ;;  %v912_v43 = vrot.slane %v1383_v22, %v911_v31 }
 0x158   : > { %v401_v54 = vpack.c.bf16 %v398_v47, %v398_v47  ;;  %v402_v55 = vpack.c.bf16 %v399_v48, %v399_v48  ;;  %v533_v56 = vpop.permute.xlu0 %532  ;;  %v916_v48 = vrot.slane %v1388_v23, %v911_v31 }
 0x159   : > { %v535_v58 = vsel %vm534_vm5, %v533_v56, %v530_v49  ;;  %v538_v59 = vsel %vm534_vm5, %v530_v49, %v533_v56  ;;  %v1211_v49 = vld [vmem:[%s1513_s4 + $0x4] sm:$0x1]  ;;  %v1223_v56 = vld [vmem:[%s1510_s1 + $0x10] ss:$0 sm:$0xff] }
 0x15a   : > { %v547_v62 = vmul.f32 %v542_v45, %v538_v59  ;;  %v548_v63 = vmul.f32 %v546_v51, %v535_v58  ;;  %1202 = vmatmul.mubr.msk.bf16.vlgmr.msra.gmra.mxu1 %vm427_vm6, %v1200_v52  ;;  %1203 = vmatprep.subr.msk.bf16.mxu0 %vm431_vm4, %v402_v55  ;;  %v606_v1 = vpop.permute.xlu1 %605  ;;  %v483_v3 = vsel %vm431_vm4, %v401_v54, 0  ;;  %v1214_v58 = vld [vmem:[%s1513_s4 + $0x5] sm:$0x1] }
 0x15b   : > { %503 = vmatpush1.bf16.msra.mxu0 %v483_v3  ;;  %594 = vmatprep.mubr.bf16.mxu1 %v1263_v0 }
 0x15c   : > { %v551_v7 = vpack.c.bf16 %v547_v62, %v547_v62  ;;  %v552_v8 = vpack.c.bf16 %v548_v63, %v548_v63  ;;  %v609_v9 = vpop.permute.xlu0 %608 }
 0x15d   : > { %v611_v11 = vsel %vm610_vm7, %v609_v9, %v606_v1  ;;  %v614_v12 = vsel %vm610_vm7, %v606_v1, %v609_v9 }
 0x15e   : > { %v623_v15 = vmul.f32 %v618_v60, %v614_v12  ;;  %v624_v16 = vmul.f32 %v622_v61, %v611_v11  ;;  %1204 = vmatmul.mubr.msk.bf16.vlgmr.msra.gmra.mxu0 %vm427_vm6, %v400_v5  ;;  %1206 = vmatprep.subr.msk.bf16.mxu1 %vm431_vm4, %v552_v8  ;;  %v748_v17 = vpop.permute.xlu1 %747  ;;  %v557_v18 = vsel %vm431_vm4, %v551_v7, 0  ;;  %v1225_v11 = vld [vmem:[%s1513_s4 + $0x8] sm:$0x1] }
 0x15f   : > { %577 = vmatpush1.bf16.msra.mxu1 %v557_v18  ;;  %670 = vmatprep.mubr.bf16.mxu0 %v1263_v0 }
 0x160   : > { %v627_v24 = vpack.c.bf16 %v623_v15, %v623_v15  ;;  %v628_v25 = vpack.c.bf16 %v624_v16, %v624_v16  ;;  %v750_v26 = vpop.permute.xlu0 %749  ;;  %1212 = vmatprep.subr.msk.bf16.mxu1 %vm431_vm4, %v694_v19 }
 0x161   : > { %v752_v28 = vsel %vm751_vm8, %v748_v17, %v750_v26  ;;  %v756_v29 = vsel %vm751_vm8, %v750_v26, %v748_v17 }
 0x162   : > { %v765_v32 = vmul.f32 %v760_v10, %v752_v28  ;;  %v766_v33 = vmul.f32 %v764_v13, %v756_v29  ;;  %1207 = vmatmul.mubr.msk.bf16.vlgmr.msra.gmra.mxu1 %vm427_vm6, %v1205_v21  ;;  %1209 = vmatprep.subr.msk.bf16.mxu0 %vm431_vm4, %v628_v25  ;;  %v824_v34 = vpop.permute.xlu1 %823  ;;  %v633_v35 = vsel %vm431_vm4, %v627_v24, 0  ;;  %v1220_v10 = vld [vmem:[%s1513_s4 + $0x7] sm:$0x1] }
 0x163   : > { %653 = vmatpush1.bf16.msra.mxu0 %v633_v35  ;;  %719 = vmatpush1.bf16.msra.mxu1 %v699_v27 }
 0x164   : > { %v769_v38 = vpack.c.bf16 %v765_v32, %v765_v32  ;;  %v770_v39 = vpack.c.bf16 %v766_v33, %v766_v33  ;;  %v826_v40 = vpop.permute.xlu0 %825  ;;  %736 = vmatprep.mubr.bf16.mxu1 %v1263_v0 }
 0x165   : > { %v828_v41 = vsel %vm827_vm9, %v824_v34, %v826_v40  ;;  %v832_v42 = vsel %vm827_vm9, %v826_v40, %v824_v34 }
 0x166   : > { %v841_v44 = vmul.f32 %v836_v30, %v828_v41  ;;  %v842_v45 = vmul.f32 %v840_v36, %v832_v42  ;;  %1210 = vmatmul.mubr.msk.bf16.vlgmr.msra.gmra.mxu0 %vm427_vm6, %v1208_v37  ;;  %1215 = vmatprep.subr.msk.bf16.mxu0 %vm431_vm4, %v770_v39  ;;  %v900_v46 = vpop.permute.xlu1 %899  ;;  %v775_v47 = vsel %vm431_vm4, %v769_v38, 0 }
 0x167   : > { %795 = vmatpush1.bf16.msra.mxu0 %v775_v47  ;;  %812 = vmatprep.mubr.bf16.mxu0 %v1263_v0 }
 0x168   : > { %v845_v50 = vpack.c.bf16 %v841_v44, %v841_v44  ;;  %v846_v22 = vpack.c.bf16 %v842_v45, %v842_v45  ;;  %v902_v51 = vpop.permute.xlu0 %901 }
 0x169   : > { %v904_v52 = vsel %vm903_vm10, %v900_v46, %v902_v51  ;;  %v908_v53 = vsel %vm903_vm10, %v902_v51, %v900_v46 }
 0x16a   : > { %v917_v54 = vmul.f32 %v912_v43, %v904_v52  ;;  %v918_v55 = vmul.f32 %v916_v48, %v908_v53  ;;  %1213 = vmatmul.mubr.msk.bf16.vlgmr.msra.gmra.mxu1 %vm427_vm6, %v1211_v49  ;;  %1218 = vmatprep.subr.msk.bf16.mxu1 %vm431_vm4, %v846_v22  ;;  %v851_v23 = vsel %vm431_vm4, %v845_v50, 0  ;;  %v976_v61 = vpop.permute.xlu1 %975 }
 0x16b   : > { %871 = vmatpush1.bf16.msra.mxu1 %v851_v23  ;;  %888 = vmatprep.mubr.bf16.mxu1 %v1263_v0 }
 0x16c   : > { %v921_v59 = vpack.c.bf16 %v917_v54, %v917_v54  ;;  %v922_v60 = vpack.c.bf16 %v918_v55, %v918_v55  ;;  %v978_v62 = vpop.permute.xlu0 %977 }
 0x16d   : > { %v980_v63 = vsel %vm979_vm11, %v976_v61, %v978_v62  ;;  %v984_v1 = vsel %vm979_vm11, %v978_v62, %v976_v61 }
 0x16e   : > { %v993_v3 = vmul.f32 %v1223_v56, %v980_v63  ;;  %v994_v4 = vmul.f32 %v1224_v57, %v984_v1  ;;  %1216 = vmatmul.mubr.msk.bf16.vlgmr.msra.gmra.mxu0 %vm427_vm6, %v1214_v58  ;;  %1221 = vmatprep.subr.msk.bf16.mxu0 %vm431_vm4, %v922_v60  ;;  %v927_v5 = vsel %vm431_vm4, %v921_v59, 0 }
 0x16f   : > { %947 = vmatpush1.bf16.msra.mxu0 %v927_v5  ;;  %964 = vmatprep.mubr.bf16.mxu0 %v1263_v0 }
 0x170   : > { %v997_v7 = vpack.c.bf16 %v993_v3, %v993_v3  ;;  %v998_v8 = vpack.c.bf16 %v994_v4, %v994_v4 }
 0x172   : > { %1219 = vmatmul.mubr.msk.bf16.vlgmr.msra.gmra.mxu1 %vm427_vm6, %v1217_v6  ;;  %1226 = vmatprep.subr.msk.bf16.mxu1 %vm431_vm4, %v998_v8  ;;  %v1003_v9 = vsel %vm431_vm4, %v997_v7, 0 }
 0x173   : > { %1023 = vmatpush1.bf16.msra.mxu1 %v1003_v9  ;;  %1040 = vmatprep.mubr.bf16.mxu1 %v1263_v0 }
 0x176   : > { %1222 = vmatmul.mubr.msk.bf16.vlgmr.msra.gmra.mxu0 %vm427_vm6, %v1220_v10  ;;  %v1061_v10 = vld [vmem:[%s1515_s6] sm:$0x3] }
 0x177   : > { %1105 = vmatprep.mubr.bf16.mxu0 %v1263_v0  ;;  %v1055_v23 = vpop.permute.xlu1 %1054 }
 0x17a   : > { %1227 = vmatmul.mubr.msk.bf16.vlgmr.msra.gmra.mxu1 %vm427_vm6, %v1225_v11  ;;  %v1272_v11 = vmov 839922192  }
 0x21a   : > { %v472_v12 = vpop.f32.mrf.mxu1 }
 0x21c   : > { %v474_v13 = vpop.f32.mrf.mxu1 }
 0x21e   : > { %v476_v14 = vpop.f32.mrf.mxu1  ;;  %v522_v15 = vpop.f32.mrf.mxu0 }
 0x21f   : > { %v523_v32 = vadd.f32 %v522_v15, %v472_v12  ;;  %v1125_v12 = vunpack.c.l.s4 %v1272_v11 }
 0x220   : > { %v477_v16 = vpop.f32.mrf.mxu1  ;;  %v524_v17 = vpop.f32.mrf.mxu0 }
 0x221   : > { %v525_v35 = vadd.f32 %v524_v17, %v474_v13  ;;  %v1126_v13 = vunpack.c.0.s8 %v1125_v12  ;;  %v1123_v16 = vpop.permute.xlu0 %1122 }
 0x222   : > { %v526_v18 = vpop.f32.mrf.mxu0  ;;  %v596_v19 = vpop.f32.mrf.mxu1 }
 0x223   : > { %v603_v36 = vadd.f32 %v596_v19, %v523_v32  ;;  %v1129_v15 = vsub.s32 %v1126_v13, %v1377_v20 }
 0x224   : > { %v527_v21 = vpop.f32.mrf.mxu0  ;;  %v598_v24 = vpop.f32.mrf.mxu1 }
 0x225   : > { %v604_v39 = vadd.f32 %v598_v24, %v525_v35  ;;  %v1130_v21 = vrot.slane %v1123_v16, %v1129_v15 }
 0x226   : > { %v600_v25 = vpop.f32.mrf.mxu1  ;;  %v672_v26 = vpop.f32.mrf.mxu0 }
 0x227   : > { %v679_v40 = vadd.f32 %v672_v26, %v603_v36 }
 0x228   : > { %v601_v27 = vpop.f32.mrf.mxu1  ;;  %v674_v28 = vpop.f32.mrf.mxu0 }
 0x229   : > { %v680_v43 = vadd.f32 %v674_v28, %v604_v39 }
 0x22a   : > { %v676_v29 = vpop.f32.mrf.mxu0  ;;  %v738_v30 = vpop.f32.mrf.mxu1 }
 0x22b   : > { %v745_v44 = vadd.f32 %v738_v30, %v679_v40 }
 0x22c   : > { %v677_v31 = vpop.f32.mrf.mxu0  ;;  %v740_v0 = vpop.f32.mrf.mxu1 }
 0x22d   : > { %v746_v47 = vadd.f32 %v740_v0, %v680_v43 }
 0x22e   : > { %v742_v33 = vpop.f32.mrf.mxu1  ;;  %v814_v34 = vpop.f32.mrf.mxu0 }
 0x22f   : > { %v821_v48 = vadd.f32 %v814_v34, %v745_v44 }
 0x230   : > { %v743_v37 = vpop.f32.mrf.mxu1  ;;  %v816_v38 = vpop.f32.mrf.mxu0 }
 0x231   : > { %v822_v22 = vadd.f32 %v816_v38, %v746_v47 }
 0x232   : > { %v818_v41 = vpop.f32.mrf.mxu0  ;;  %v890_v42 = vpop.f32.mrf.mxu1 }
 0x233   : > { %v897_v51 = vadd.f32 %v890_v42, %v821_v48 }
 0x234   : > { %v819_v45 = vpop.f32.mrf.mxu0  ;;  %v892_v46 = vpop.f32.mrf.mxu1 }
 0x235   : > { %v898_v54 = vadd.f32 %v892_v46, %v822_v22 }
 0x236   : > { %v894_v49 = vpop.f32.mrf.mxu1  ;;  %v966_v50 = vpop.f32.mrf.mxu0 }
 0x237   : > { %v973_v55 = vadd.f32 %v966_v50, %v897_v51 }
 0x238   : > { %v895_v52 = vpop.f32.mrf.mxu1  ;;  %v968_v53 = vpop.f32.mrf.mxu0 }
 0x239   : > { %v974_v58 = vadd.f32 %v968_v53, %v898_v54 }
 0x23a   : > { %v970_v56 = vpop.f32.mrf.mxu0  ;;  %v1042_v57 = vpop.f32.mrf.mxu1 }
 0x23b   : > { %v1049_v59 = vadd.f32 %v1042_v57, %v973_v55 }
 0x23c   : > { %v971_v60 = vpop.f32.mrf.mxu0  ;;  %v1044_v61 = vpop.f32.mrf.mxu1 }
 0x23d   : > { %v1057_v62 = vadd.f32 %v1055_v23, %v1049_v59  ;;  %v1050_v63 = vadd.f32 %v1044_v61, %v974_v58 }
 0x23e   : > { %v1046_v1 = vpop.f32.mrf.mxu1 }
 0x23f   : > { %v1059_v3 = vmax.f32 %v1057_v62, 0.0  ;;  %v1058_v4 = vadd.f32 %v1055_v23, %v1050_v63 }
 0x240   : > { %v1047_v5 = vpop.f32.mrf.mxu1 }
 0x241   : > { %v1062_v6 = vpack.c.bf16 %v1059_v3, %v1059_v3  ;;  %v1060_v7 = vmax.f32 %v1058_v4, 0.0 }
 0x243   : > { %v1063_v8 = vpack.c.bf16 %v1060_v7, %v1060_v7  ;;  %v1068_v9 = vsel %vm431_vm4, %v1062_v6, 0 }
 0x245   : > { %1228 = vmatprep.subr.msk.bf16.mxu0 %vm431_vm4, %v1063_v8 }
 0x246   : > { %1088 = vmatpush1.bf16.msra.mxu0 %v1068_v9 }
 0x249   : > { %1229 = vmatmul.mubr.msk.bf16.vlgmr.msra.gmra.mxu0 %vm427_vm6, %v1061_v10 }
 0x309   : > { %v1107_v14 = vpop.f32.mrf.mxu0 }
 0x30b   : > { %v1109_v17 = vpop.f32.mrf.mxu0 }
 0x30c   : > { %v1116_v18 = vcombine.low %v1107_v14, %v1109_v17 }
 0x30d   : > { %v1111_v19 = vpop.f32.mrf.mxu0 }
 0x30e   : > { %v1118_v24 = vadd.f32 %v1116_v18, %v1341_v2 }
 0x30f   : > { %v1112_v25 = vpop.f32.mrf.mxu0 }
 0x310   : > { %v1132_v26 = vadd.f32 %v1130_v21, %v1118_v24 }
 0x312   : > { %1133 = vst [vmem:[%s305_s19] sm:$0xff] %v1132_v26 }
 0x313 PF: > { %s18_s27 = sadd.s32 1, %s1261_s27  }
 0x314   : > { %p15_p4 = scmp.ge.s32.totalorder %s18_s27, 4  }
 0x316   :  { %17 = sbr.rel (!%p15_p4) target bundleno = 1 (0x1), region = 90 }

// kernel: hourglass_forward.13
= control target key start
LH: loop header
LB: loop body
LE: loop exit
PB: predicated region body
PF: predicated region fallthrough
CT: control target
= control target key end

     0   :  { %s1463_s13 = smov 0   ;;  %s1681_s0 = inlined_call_operand.vmem [shape: f32[2,4,64], index: 0, kind: input, shape index: {}]   ;;  %s1682_s1 = inlined_call_operand.vmem [shape: f32[2,4,256], index: 1, kind: input, shape index: {}]   ;;  %s1683_s2 = inlined_call_operand.vmem [shape: f32[64,256], index: 2, kind: input, shape index: {}]   ;;  %s1684_s3 = inlined_call_operand.vmem [shape: f32[9,64], index: 3, kind: input, shape index: {}]   ;;  %s1685_s4 = inlined_call_operand.vmem [shape: bf16[2,4], index: 4, kind: input, shape index: {}]   ;;  %s1686_s5 = inlined_call_operand.vmem [shape: f32[2,1], index: 5, kind: input, shape index: {}]   ;;  %s1687_s6 = inlined_call_operand.vmem [shape: bf16[9,2,2], index: 6, kind: input, shape index: {}]   ;;  %s1688_s7 = inlined_call_operand.vmem [shape: f32[2,1], index: 7, kind: input, shape index: {}]   ;;  %s1689_s8 = inlined_call_operand.vmem [shape: bf16[4,2], index: 8, kind: input, shape index: {}]   ;;  %s1690_s9 = inlined_call_operand.vmem [shape: f32[4,1], index: 9, kind: input, shape index: {}]   ;;  %s1691_s10 = inlined_call_operand.vmem [shape: f32[2,4,256], index: 10, kind: output, shape index: {}]  }
   0x1 LB: > { %s1228_s14 = sadd.s32 4294967295, %s1387_s13   ;;  %p1232_p0 = scmp.ge.s32.totalorder %s1387_s13, 1  ;;  %s1387_s13 = sphi %s1463_s13, %s20_s13  }
   0x2   : > { %p321_p1 = scmp.lt.s32.totalorder %s1387_s13, 3 }
   0x4   : > { %p322_p2 = pnand %p1232_p0, %p321_p1 }
   0x5   : > { %p363_p3 = scmp.lt.s32.totalorder (!%p322_p2), %s1228_s14, 1  ;;  %s1392_s23 = smov (!%p322_p2), 8  }
   0x6   : > { %325 = sbr.rel (%p322_p2) target bundleno = 976 (0x3d0), region = 60  ;;  %s1393_s24 = smov (!%p322_p2), 72  }
   0x7   : > { %s1394_s25 = smov (!%p322_p2), 73   ;;  %s1395_s26 = smov (!%p322_p2), 9  }
   0x8   : > { %s1396_s27 = smov (!%p322_p2), 71   ;;  %s1397_s28 = smov (!%p322_p2), 7  }
   0x9   : > { %s1398_s29 = smov (!%p322_p2), 65   ;;  %s1399_s30 = smov (!%p322_p2), 1  }
   0xa   : > { %s1400_s11 = smov (!%p322_p2), 127   ;;  %s1401_s12 = smov (!%p322_p2), 63  }
   0xb   : > { %v1389_v0 = vmov 0.0   ;;  %vm1390_vm0 = vmmov 0   ;;  %v383_v1 = vld [vmem:[%s1686_s5] sm:$0x3]  ;;  %s1693_s14 = smov (!%p363_p3, %s1228_s14), 1  ;;  %v1391_v2 = vmov 0   ;;  %v447_v16 = vlaneseq }
   0xc   : > { %1285 = vmatprep.subr.bf16.mxu0 %v1389_v0  ;;  %1287 = vmatprep.mubr.msk.bf16.mxu0 %vm1390_vm0, %v1389_v0  ;;  %s1233_s17 = sshll.u32 %s1693_s14, 2  ;;  %vm393_vm1 = vcmask 1041408   ;;  %v381_v6 = vld [vmem:[%s1685_s4] sm:$0x1]  ;;  %vm389_vm2 = vcmask 31744   ;;  %s1402_s15 = smov 121  }
   0xd   : > { %1378 = vset.pattern.permute.xlu0 %v1391_v2  ;;  %1291 = vmatprep.subr.bf16.mxu1 %v1389_v0  ;;  %s366_s20 = scalar_lea.vmem %s1681_s0, %s1233_s17  ;;  %s1403_s16 = smov 57   ;;  %v1054_v14 = vld [vmem:[%s1690_s9] sm:$0xf]  ;;  %v1520_v17 = vshrl.u32 %v447_v16, 7  ;;  %vm460_vm3 = vcmask 64512   ;;  %vm445_vm4 = vcmask 72704  }
   0xe   : > { %386 = vperm.xlu0 %1378, %v383_v1   ;;  %1293 = vmatprep.mubr.msk.bf16.mxu1 %vm1390_vm0, %v1389_v0  ;;  %v1486_v3 = vld [vmem:[%s366_s20] sm:$0xf]  ;;  %s1404_s17 = smov 120   ;;  %s1405_s18 = smov 56   ;;  %vm474_vm5 = vcmask 1040384   ;;  %vm570_vm6 = vcmask 56320  }
   0xf   : > { %1379 = vset.pattern.permute.xlu1 %v1391_v2  ;;  %v382_v4 = vpack.c.bf16 %v1486_v3, %v1486_v3  ;;  %s1406_s19 = smov 119   ;;  %s1407_s20 = smov 55   ;;  %v997_v15 = vld [vmem:[%s1688_s7] sm:$0x3]  ;;  %v464_v18 = vsub.s32 1, %v1520_v17  ;;  %v449_v21 = vsub.s32 0, %v1520_v17 }
  0x10   : > { %v1526_v19 = vld [vmem:[%s1684_s3] sm:$0xff]  ;;  %v692_v25 = vsub.s32 4, %v1520_v17  ;;  %v574_v28 = vsub.s32 2, %v1520_v17  ;;  %v637_v37 = vsub.s32 3, %v1520_v17  ;;  %vm470_vm7 = vcmask 15360  }
  0x11   : > { %v395_v5 = vsel %vm393_vm1, %v382_v4, 0  ;;  %v465_v20 = vrot.slane %v1526_v19, %v464_v18  ;;  %v450_v27 = vrot.slane %v1526_v19, %v449_v21  ;;  %v1239_v38 = vld [vmem:[%s1687_s6 + $0x1] sm:$0x1]  ;;  %vm633_vm8 = vcmask 7168   ;;  %v452_v48 = vld [vmem:[%s1687_s6] sm:$0x1] }
  0x12   : > { %1286 = vmatpush3.bf16.msra.mxu0 %v395_v5  ;;  %v693_v33 = vrot.slane %v1526_v19, %v692_v25  ;;  %v575_v36 = vrot.slane %v1526_v19, %v574_v28  ;;  %v638_v46 = vrot.slane %v1526_v19, %v637_v37  ;;  %v755_v47 = vsub.s32 5, %v1520_v17  ;;  %v1242_v58 = vld [vmem:[%s1687_s6 + $0x2] sm:$0x1] }
  0x13   : > { %1297 = vmatprep.subr.bf16.mxu0 %v1389_v0  ;;  %vm751_vm9 = vcmask 515072   ;;  %v818_v57 = vsub.s32 6, %v1520_v17  ;;  %vm814_vm10 = vcmask 465920   ;;  %v881_v5 = vsub.s32 7, %v1520_v17  ;;  %v1073_v37 = vld [vmem:[%s1683_s2 + $0x60] sm:$0xff] }
  0x14   : > { %v756_v56 = vrot.slane %v1526_v19, %v755_v47  ;;  %vm877_vm11 = vcmask 457728   ;;  %vm940_vm12 = vcmask 449536   ;;  %vm1081_vm13 = vcmask 523264  }
  0x15   : > { %1288 = vmatmul.mubr.msk.bf16.vlgmr.msra.gmra.mxu0 %vm389_vm2, %v381_v6  ;;  %v819_v4 = vrot.slane %v1526_v19, %v818_v57  ;;  %v1244_v6 = vld [vmem:[%s1687_s6 + $0x3] sm:$0x1] }
  0x16   : > { %1299 = vmatprep.mubr.msk.bf16.mxu0 %vm1390_vm0, %v1389_v0 }
  0x89   : > { %v387_v7 = vpop.permute.xlu0 %386 }
  0xd5   : > { %v431_v8 = vpop.f32.mrf.mxu0 }
  0xd6   : > { %v432_v9 = vadd.f32 %v431_v8, %v387_v7 }
  0xd7   : > { %v1289_v10 = vpop.f32.mrf.mxu0 }
  0xd8   : > { %v1496_v11 = vmax.f32 %v432_v9, 0.0 }
  0xd9   : > { %v434_v12 = vpop.f32.mrf.mxu0 }
  0xda   : > { %457 = vrot.lane.b32.xlu1 %v1496_v11, %s1392_s23  ;;  %454 = vrot.lane.b32.xlu0 %v1496_v11, %s1393_s24  ;;  %v694_v43 = vmul.f32 %v693_v33, %v1496_v11  ;;  %v1255_v33 = vld [vmem:[%s1687_s6 + $0x8] sm:$0x1] }
  0xdb   : > { %v1290_v13 = vpop.f32.mrf.mxu0 }
  0xdc   : > { %v697_v53 = vpack.c.bf16 %v694_v43, %v694_v43  ;;  %v882_v13 = vrot.slane %v1526_v19, %v881_v5  ;;  %v1254_v19 = vld [vmem:[%s1684_s3 + $0x8] ss:$0 sm:$0xff] }
  0xdd   : > { %v1066_v43 = vld [vmem:[%s1683_s2 + $0x28] sm:$0xff] }
  0xde   : > { %439 = vrot.lane.b32.xlu1 %v1496_v11, %s1394_s25  ;;  %442 = vrot.lane.b32.xlu0 %v1496_v11, %s1395_s26  ;;  %v702_v63 = vsel %vm474_vm5, %v697_v53, 0 }
  0xe2   : > { %564 = vrot.lane.b32.xlu1 %v1496_v11, %s1396_s27  ;;  %567 = vrot.lane.b32.xlu0 %v1496_v11, %s1397_s28  ;;  %s1261_s27 = sshll.u32 %s1693_s14, 3 }
  0xe6   : > { %627 = vrot.lane.b32.xlu1 %v1496_v11, %s1398_s29  ;;  %630 = vrot.lane.b32.xlu0 %v1496_v11, %s1399_s30  ;;  %s371_s30 = scalar_lea.vmem %s1682_s1, %s1261_s27 }
  0xea   : > { %745 = vrot.lane.b32.xlu1 %v1496_v11, %s1400_s11  ;;  %748 = vrot.lane.b32.xlu0 %v1496_v11, %s1401_s12 }
  0xee   : > { %808 = vrot.lane.b32.xlu1 %v1496_v11, %s1402_s15  ;;  %811 = vrot.lane.b32.xlu0 %v1496_v11, %s1403_s16  ;;  %s376_s15 = scalar_lea.vmem %s1691_s10, %s1261_s27 }
  0xf2   : > { %871 = vrot.lane.b32.xlu1 %v1496_v11, %s1404_s17  ;;  %874 = vrot.lane.b32.xlu0 %v1496_v11, %s1405_s18 }
  0xf6   : > { %934 = vrot.lane.b32.xlu1 %v1496_v11, %s1406_s19  ;;  %937 = vrot.lane.b32.xlu0 %v1496_v11, %s1407_s20 }
  0xfa   : > { %1057 = vperm.xlu0 %1378, %v1054_v14   ;;  %1000 = vperm.xlu1 %1379, %v997_v15   ;;  %v1246_v14 = vld [vmem:[%s1687_s6 + $0x4] sm:$0x1] }
 0x14c   : > { %v458_v22 = vpop.permute.xlu1 %457  ;;  %v455_v23 = vpop.permute.xlu0 %454 }
 0x14d   : > { %v461_v24 = vsel %vm460_vm3, %v455_v23, %v458_v22  ;;  %v1248_v22 = vld [vmem:[%s1687_s6 + $0x5] sm:$0x1] }
 0x14e   : > { %v466_v26 = vmul.f32 %v465_v20, %v461_v24 }
 0x150   : > { %v440_v29 = vpop.permute.xlu1 %439  ;;  %v443_v30 = vpop.permute.xlu0 %442  ;;  %v469_v31 = vpack.c.bf16 %v466_v26, %v466_v26 }
 0x151   : > { %v446_v32 = vsel %vm445_vm4, %v440_v29, %v443_v30  ;;  %v1250_v29 = vld [vmem:[%s1687_s6 + $0x6] sm:$0x1] }
 0x152   : > { %v451_v34 = vmul.f32 %v450_v27, %v446_v32  ;;  %v476_v35 = vsel %vm474_vm5, %v469_v31, 0  ;;  %v1252_v32 = vld [vmem:[%s1687_s6 + $0x7] sm:$0x1] }
 0x153   : > { %1292 = vmatpush3.bf16.msra.mxu1 %v476_v35  ;;  %v1075_v35 = vld [vmem:[%s1683_s2 + $0x70] sm:$0xff] }
 0x154   : > { %v453_v39 = vpack.c.bf16 %v451_v34, %v451_v34  ;;  %v565_v40 = vpop.permute.xlu1 %564  ;;  %v568_v41 = vpop.permute.xlu0 %567  ;;  %1303 = vmatprep.subr.bf16.mxu1 %v1389_v0  ;;  %v1076_v34 = vld [vmem:[%s1683_s2 + $0x78] sm:$0xff] }
 0x155   : > { %v571_v42 = vsel %vm570_vm6, %v565_v40, %v568_v41  ;;  %v1069_v40 = vld [vmem:[%s1683_s2 + $0x40] sm:$0xff]  ;;  %v1068_v41 = vld [vmem:[%s1683_s2 + $0x38] sm:$0xff] }
 0x156   : > { %v576_v44 = vmul.f32 %v575_v36, %v571_v42  ;;  %1294 = vmatmul.mubr.msk.bf16.vlgmr.msra.gmra.mxu1 %vm470_vm7, %v1239_v38  ;;  %v522_v45 = vsel %vm474_vm5, %v453_v39, 0  ;;  %v1074_v36 = vld [vmem:[%s1683_s2 + $0x68] sm:$0xff]  ;;  %v1071_v38 = vld [vmem:[%s1683_s2 + $0x50] sm:$0xff] }
 0x157   : > { %1298 = vmatpush3.bf16.msra.mxu0 %v522_v45  ;;  %1305 = vmatprep.mubr.msk.bf16.mxu1 %vm1390_vm0, %v1389_v0  ;;  %v1070_v39 = vld [vmem:[%s1683_s2 + $0x48] sm:$0xff]  ;;  %v1067_v42 = vld [vmem:[%s1683_s2 + $0x30] sm:$0xff] }
 0x158   : > { %v579_v49 = vpack.c.bf16 %v576_v44, %v576_v44  ;;  %v628_v50 = vpop.permute.xlu1 %627  ;;  %v631_v51 = vpop.permute.xlu0 %630  ;;  %1309 = vmatprep.subr.bf16.mxu0 %v1389_v0 }
 0x159   : > { %v634_v52 = vsel %vm633_vm8, %v628_v50, %v631_v51 }
 0x15a   : > { %v639_v54 = vmul.f32 %v638_v46, %v634_v52  ;;  %1300 = vmatmul.mubr.msk.bf16.vlgmr.msra.gmra.mxu0 %vm470_vm7, %v452_v48  ;;  %v584_v55 = vsel %vm474_vm5, %v579_v49, 0 }
 0x15b   : > { %1304 = vmatpush3.bf16.msra.mxu1 %v584_v55  ;;  %1311 = vmatprep.mubr.msk.bf16.mxu0 %vm1390_vm0, %v1389_v0 }
 0x15c   : > { %v642_v59 = vpack.c.bf16 %v639_v54, %v639_v54  ;;  %v746_v60 = vpop.permute.xlu1 %745  ;;  %v749_v61 = vpop.permute.xlu0 %748  ;;  %1315 = vmatprep.subr.bf16.mxu1 %v1389_v0 }
 0x15d   : > { %v752_v62 = vsel %vm751_vm9, %v746_v60, %v749_v61 }
 0x15e   : > { %v757_v1 = vmul.f32 %v756_v56, %v752_v62  ;;  %1306 = vmatmul.mubr.msk.bf16.vlgmr.msra.gmra.mxu1 %vm470_vm7, %v1242_v58  ;;  %v647_v2 = vsel %vm474_vm5, %v642_v59, 0 }
 0x15f   : > { %1310 = vmatpush3.bf16.msra.mxu0 %v647_v2  ;;  %1316 = vmatpush3.bf16.msra.mxu1 %v702_v63 }
 0x160   : > { %v760_v7 = vpack.c.bf16 %v757_v1, %v757_v1  ;;  %v809_v8 = vpop.permute.xlu1 %808  ;;  %v812_v9 = vpop.permute.xlu0 %811  ;;  %1321 = vmatprep.subr.bf16.mxu0 %v1389_v0  ;;  %1317 = vmatprep.mubr.msk.bf16.mxu1 %vm1390_vm0, %v1389_v0 }
 0x161   : > { %v815_v10 = vsel %vm814_vm10, %v809_v8, %v812_v9  ;;  %1327 = vmatprep.subr.bf16.mxu1 %v1389_v0 }
 0x162   : > { %v820_v11 = vmul.f32 %v819_v4, %v815_v10  ;;  %1312 = vmatmul.mubr.msk.bf16.vlgmr.msra.gmra.mxu0 %vm470_vm7, %v1244_v6  ;;  %v765_v12 = vsel %vm474_vm5, %v760_v7, 0 }
 0x163   : > { %1322 = vmatpush3.bf16.msra.mxu0 %v765_v12  ;;  %1323 = vmatprep.mubr.msk.bf16.mxu0 %vm1390_vm0, %v1389_v0 }
 0x164   : > { %v823_v15 = vpack.c.bf16 %v820_v11, %v820_v11  ;;  %v872_v16 = vpop.permute.xlu1 %871  ;;  %v875_v17 = vpop.permute.xlu0 %874  ;;  %1333 = vmatprep.subr.bf16.mxu0 %v1389_v0 }
 0x165   : > { %v878_v18 = vsel %vm877_vm11, %v872_v16, %v875_v17 }
 0x166   : > { %v883_v20 = vmul.f32 %v882_v13, %v878_v18  ;;  %1318 = vmatmul.mubr.msk.bf16.vlgmr.msra.gmra.mxu1 %vm470_vm7, %v1246_v14  ;;  %v828_v21 = vsel %vm474_vm5, %v823_v15, 0 }
 0x167   : > { %1328 = vmatpush3.bf16.msra.mxu1 %v828_v21  ;;  %1329 = vmatprep.mubr.msk.bf16.mxu1 %vm1390_vm0, %v1389_v0 }
 0x168   : > { %v886_v23 = vpack.c.bf16 %v883_v20, %v883_v20  ;;  %v935_v24 = vpop.permute.xlu1 %934  ;;  %v938_v25 = vpop.permute.xlu0 %937  ;;  %1339 = vmatprep.subr.bf16.mxu1 %v1389_v0 }
 0x169   : > { %v941_v26 = vsel %vm940_vm12, %v935_v24, %v938_v25 }
 0x16a   : > { %v946_v27 = vmul.f32 %v1254_v19, %v941_v26  ;;  %1324 = vmatmul.mubr.msk.bf16.vlgmr.msra.gmra.mxu0 %vm470_vm7, %v1248_v22  ;;  %v891_v28 = vsel %vm474_vm5, %v886_v23, 0 }
 0x16b   : > { %1334 = vmatpush3.bf16.msra.mxu0 %v891_v28  ;;  %1335 = vmatprep.mubr.msk.bf16.mxu0 %vm1390_vm0, %v1389_v0 }
 0x16c   : > { %v949_v30 = vpack.c.bf16 %v946_v27, %v946_v27  ;;  %1345 = vmatprep.subr.bf16.mxu0 %v1389_v0 }
 0x16e   : > { %1330 = vmatmul.mubr.msk.bf16.vlgmr.msra.gmra.mxu1 %vm470_vm7, %v1250_v29  ;;  %v954_v31 = vsel %vm474_vm5, %v949_v30, 0 }
 0x16f   : > { %1340 = vmatpush3.bf16.msra.mxu1 %v954_v31  ;;  %1341 = vmatprep.mubr.msk.bf16.mxu1 %vm1390_vm0, %v1389_v0  ;;  %v1005_v31 = vld [vmem:[%s1689_s8] sm:$0x3] }
 0x170   : > { %1101 = vmatprep.subr.mxu1 %v1076_v34  ;;  %v1063_v34 = vld [vmem:[%s1683_s2 + $0x10] sm:$0xff] }
 0x172   : > { %1336 = vmatmul.mubr.msk.bf16.vlgmr.msra.gmra.mxu0 %vm470_vm7, %v1252_v32  ;;  %v1065_v32 = vld [vmem:[%s1683_s2 + $0x20] sm:$0xff] }
 0x173   : > { %1347 = vmatprep.mubr.msk.bf16.mxu0 %vm1390_vm0, %v1389_v0 }
 0x175   : > { %v1001_v20 = vpop.permute.xlu1 %1000 }
 0x176   : > { %1342 = vmatmul.mubr.msk.bf16.vlgmr.msra.gmra.mxu1 %vm470_vm7, %v1255_v33  ;;  %v1064_v33 = vld [vmem:[%s1683_s2 + $0x18] sm:$0xff] }
 0x177   : > { %1149 = vmatprep.mubr.f32.mxu1 %v1389_v0  ;;  %1102 = vmatpush1.msra.mxu1 %v1075_v35  ;;  %v1072_v0 = vld [vmem:[%s1683_s2 + $0x58] sm:$0xff]  ;;  %v1062_v35 = vld [vmem:[%s1683_s2 + $0x8] sm:$0xff] }
 0x178   : > { %1103 = vmatprep.subr.mxu1 %v1074_v36  ;;  %v1061_v36 = vld [vmem:[%s1683_s2] sm:$0xff] }
 0x179   : > { %1104 = vmatpush1.msra.mxu1 %v1073_v37 }
 0x17a   : > { %1105 = vmatprep.subr.mxu1 %v1072_v0 }
 0x17b   : > { %1106 = vmatpush1.msra.mxu1 %v1071_v38  ;;  %v1058_v38 = vpop.permute.xlu0 %1057 }
 0x17c   : > { %1107 = vmatprep.subr.mxu1 %v1070_v39 }
 0x17d   : > { %1108 = vmatpush1.msra.mxu1 %v1069_v40 }
 0x17e   : > { %1109 = vmatprep.subr.mxu1 %v1068_v41 }
 0x17f   : > { %1110 = vmatpush1.msra.mxu1 %v1067_v42 }
 0x180   : > { %1111 = vmatprep.subr.mxu1 %v1066_v43  ;;  %v1077_v43 = vld [vmem:[%s371_s30] sm:$0xff] }
 0x181   : > { %1112 = vmatpush1.msra.mxu1 %v1065_v32 }
 0x182   : > { %1113 = vmatprep.subr.mxu1 %v1064_v33 }
 0x183   : > { %1114 = vmatpush1.msra.mxu1 %v1063_v34 }
 0x184   : > { %1115 = vmatprep.subr.mxu1 %v1062_v35 }
 0x185   : > { %1116 = vmatpush1.msra.mxu1 %v1061_v36 }
 0x216   : > { %v512_v44 = vpop.f32.mrf.mxu1 }
 0x218   : > { %v1295_v45 = vpop.f32.mrf.mxu1 }
 0x21a   : > { %v515_v46 = vpop.f32.mrf.mxu1  ;;  %v558_v47 = vpop.f32.mrf.mxu0 }
 0x21b   : > { %v559_v62 = vadd.f32 %v558_v47, %v512_v44  ;;  %v1079_v44 = vcombine.high %v1077_v43, %v1077_v43 }
 0x21c   : > { %v1296_v48 = vpop.f32.mrf.mxu1  ;;  %v1301_v49 = vpop.f32.mrf.mxu0 }
 0x21e   : > { %v561_v50 = vpop.f32.mrf.mxu0  ;;  %v620_v51 = vpop.f32.mrf.mxu1 }
 0x21f   : > { %v626_v2 = vadd.f32 %v620_v51, %v559_v62 }
 0x220   : > { %v1302_v52 = vpop.f32.mrf.mxu0  ;;  %v1307_v53 = vpop.f32.mrf.mxu1 }
 0x222   : > { %v623_v54 = vpop.f32.mrf.mxu1  ;;  %v683_v55 = vpop.f32.mrf.mxu0 }
 0x223   : > { %v689_v6 = vadd.f32 %v683_v55, %v626_v2 }
 0x224   : > { %v1308_v56 = vpop.f32.mrf.mxu1  ;;  %v1313_v57 = vpop.f32.mrf.mxu0 }
 0x226   : > { %v686_v58 = vpop.f32.mrf.mxu0  ;;  %v738_v59 = vpop.f32.mrf.mxu1 }
 0x227   : > { %v744_v9 = vadd.f32 %v738_v59, %v689_v6 }
 0x228   : > { %v1314_v60 = vpop.f32.mrf.mxu0  ;;  %v1319_v61 = vpop.f32.mrf.mxu1 }
 0x22a   : > { %v741_v63 = vpop.f32.mrf.mxu1  ;;  %v801_v1 = vpop.f32.mrf.mxu0 }
 0x22b   : > { %v807_v12 = vadd.f32 %v801_v1, %v744_v9 }
 0x22c   : > { %v1320_v4 = vpop.f32.mrf.mxu1  ;;  %v1325_v5 = vpop.f32.mrf.mxu0 }
 0x22e   : > { %v804_v7 = vpop.f32.mrf.mxu0  ;;  %v864_v8 = vpop.f32.mrf.mxu1 }
 0x22f   : > { %v870_v15 = vadd.f32 %v864_v8, %v807_v12 }
 0x230   : > { %v1326_v10 = vpop.f32.mrf.mxu0  ;;  %v1331_v11 = vpop.f32.mrf.mxu1 }
 0x232   : > { %v867_v13 = vpop.f32.mrf.mxu1  ;;  %v927_v14 = vpop.f32.mrf.mxu0 }
 0x233   : > { %v933_v18 = vadd.f32 %v927_v14, %v870_v15 }
 0x234   : > { %v1332_v16 = vpop.f32.mrf.mxu1  ;;  %v1337_v17 = vpop.f32.mrf.mxu0 }
 0x236   : > { %v930_v21 = vpop.f32.mrf.mxu0  ;;  %v990_v19 = vpop.f32.mrf.mxu1 }
 0x237   : > { %v996_v22 = vadd.f32 %v990_v19, %v933_v18 }
 0x238   : > { %v1338_v23 = vpop.f32.mrf.mxu0  ;;  %v1343_v24 = vpop.f32.mrf.mxu1 }
 0x239   : > { %v1003_v25 = vadd.f32 %v1001_v20, %v996_v22 }
 0x23a   : > { %v993_v26 = vpop.f32.mrf.mxu1 }
 0x23b   : > { %v1004_v27 = vmax.f32 %v1003_v25, 0.0 }
 0x23c   : > { %v1344_v28 = vpop.f32.mrf.mxu1 }
 0x23d   : > { %v1006_v29 = vpack.c.bf16 %v1004_v27, %v1004_v27 }
 0x23f   : > { %v1011_v30 = vsel %vm474_vm5, %v1006_v29, 0 }
 0x240   : > { %1346 = vmatpush3.bf16.msra.mxu0 %v1011_v30 }
 0x243   : > { %1348 = vmatmul.mubr.msk.bf16.vlgmr.msra.gmra.mxu0 %vm470_vm7, %v1005_v31 }
 0x303   : > { %v1047_v37 = vpop.f32.mrf.mxu0 }
 0x304   : > { %v1053_v0 = vadd.f32 %v1047_v37, %v1486_v3 }
 0x305   : > { %v1349_v39 = vpop.f32.mrf.mxu0 }
 0x306   : > { %v1060_v40 = vadd.f32 %v1058_v38, %v1053_v0 }
 0x307   : > { %v1050_v41 = vpop.f32.mrf.mxu0 }
 0x308   : > { %1258 = vmatmul.mubr.msk.f32.vlgmr.msra.gmra.mxu1 %vm1081_vm13, %v1060_v40 }
 0x309   : > { %v1350_v42 = vpop.f32.mrf.mxu0 }
 0x3c8   : > { %v1151_v45 = vpop.f32.mrf.mxu1 }
 0x3c9   : > { %v1152_v47 = vadd.f32 %v1151_v45, %v1077_v43 }
 0x3ca   : > { %v1153_v46 = vpop.f32.mrf.mxu1 }
 0x3cb   : > { %v1154_v48 = vadd.f32 %v1153_v46, %v1079_v44 }
 0x3cd   : > { %v1158_v3 = vcombine.low %v1152_v47, %v1154_v48 }
 0x3cf   : > { %1160 = vst [vmem:[%s376_s15] sm:$0xff] %v1158_v3 }
 0x3d0 PF: > { %s20_s13 = sadd.s32 1, %s1387_s13  }
 0x3d1   : > { %p17_p4 = scmp.ge.s32.totalorder %s20_s13, 4  }
 0x3d3   :  { %19 = sbr.rel (!%p17_p4) target bundleno = 1 (0x1), region = 101 }

</bundles_post_ra>
